<compile_context>
chip_gen: v5e
topology: v5e:2x2
jax: 0.10.0
libtpu: 0.0.40
codegen_flags: <defaults>
</compile_context>

<pallas_src>
import functools

import jax
import jax.numpy as jnp
from jax import lax
from jax.experimental import pallas as pl
from jax.experimental.pallas import tpu as pltpu


def fused_gat_kernel(x_ref, xt_ref, maskb_ref, wdst_ref, wsrct_ref, w12_ref,
                     lin2_ref, out_ref, *, negative_slope):
    """Fused GATConv(H heads, concat) -> GATConv(1 head) -> sigmoid."""
    H = wsrct_ref.shape[0]
    N, F = x_ref.shape

    x_bf = x_ref[...]                                    # [N, F]  bf16
    mask_bias = maskb_ref[...].astype(jnp.float32)       # [N, N]  additive (0 / -1e30)

    # ---------------- layer 1: multi-head attention logits ----------------
    # dst logits: one lane-dense matmul (a_dst folded through W1 in wrapper).
    a_dst_nh = jnp.dot(x_bf, wdst_ref[...],
                       preferred_element_type=jnp.float32)            # [N, H]
    # relayout [N, H] -> [H, N, 1] via one-hot head select + lane reduction
    sel_d = (lax.broadcasted_iota(jnp.int32, (H, N, H), 0) ==
             lax.broadcasted_iota(jnp.int32, (H, N, H), 2))
    dst3 = jnp.sum(jnp.where(sel_d,
                             jnp.broadcast_to(a_dst_nh[None], (H, N, H)),
                             0.0),
                   axis=-1, keepdims=True)                            # [H, N, 1]

    # src logits: batched M=1 matvec (a_src folded through W1); output lands
    # directly in the [H, 1, N] layout the attention broadcast needs.
    xt_b = jnp.broadcast_to(xt_ref[...][None], (H, F, N))             # [H, F, N] bf16
    src3 = jnp.einsum('huf,hfj->huj', wsrct_ref[...], xt_b,
                      preferred_element_type=jnp.float32)             # [H, 1, N]

    e = dst3 + src3                                                   # [H, N, N]
    e = jnp.where(e >= 0, e, negative_slope * e)                      # LeakyReLU(0.2)
    e = e + mask_bias[None, :, :]                                     # mask non-edges
    m = jnp.max(e, axis=-1, keepdims=True)
    p = jnp.exp(e - m)
    s = jnp.sum(p, axis=-1, keepdims=True)
    attn = p * pl.reciprocal(s, approx=True)                          # [H, N, N]

    # ------ aggregate raw features once (flat 2D matmul), then W1@W2 projection ------
    agg = jnp.dot(attn.reshape(H * N, N).astype(jnp.bfloat16), x_bf,
                  preferred_element_type=jnp.float32)                 # [H*N, F]
    t = jnp.einsum('hnf,hfd->hnd',
                   agg.reshape(H, N, F).astype(jnp.bfloat16),
                   w12_ref[...],
                   preferred_element_type=jnp.float32)                # [H, N, 128]
    xp2 = jnp.sum(t, axis=0) + lin2_ref[0:1, :]                       # [N, 128]

    # ------------- layer 2: single-head GATConv, concat=False, + sigmoid -------------
    a_dst2 = jnp.sum(xp2 * lin2_ref[1:2, :], axis=-1, keepdims=True)  # [N, 1]
    a_src2 = jnp.einsum('uc,jc->uj', lin2_ref[2:3, :], xp2,
                        preferred_element_type=jnp.float32)           # [1, N]
    e2 = a_dst2 + a_src2                                              # [N, N]
    e2 = jnp.where(e2 >= 0, e2, negative_slope * e2)
    e2 = e2 + mask_bias
    m2 = jnp.max(e2, axis=-1, keepdims=True)
    p2 = jnp.exp(e2 - m2)
    s2 = jnp.sum(p2, axis=-1, keepdims=True)
    attn2 = p2 * pl.reciprocal(s2, approx=True)                       # [N, N]

    out2 = jnp.dot(attn2.astype(jnp.bfloat16), xp2.astype(jnp.bfloat16),
                   preferred_element_type=jnp.float32) + lin2_ref[3:4, :]
    out_ref[...] = jax.nn.sigmoid(out2).astype(out_ref.dtype)         # [N, 128] lane-dense store


def gat_forward(x, mask, params):
    """Parameter folding in plain JAX; the whole hot path is one Pallas kernel."""
    (w1, as1, ad1, b1, w2, as2, ad2, b2, heads, hidden, out_ch) = params
    N, F = x.shape
    H, C1, C2 = heads, hidden, out_ch
    C2P = 128   # lane-dense padded layer-2 width (sliced back to C2 below)

    # Additive mask bias shared by both layers (bf16 halves the N^2 DMA stream).
    mask_bias = jnp.where(mask > 0.5, 0.0, -1e30).astype(jnp.bfloat16)        # [N, N]

    # Layer-1 weights (PyG layout: lin weight column index = h*C1 + c).
    w1_3d = w1.reshape(F, H, C1).transpose(1, 0, 2).astype(jnp.float32)       # [H, F, C1]
    # Fold the attention vectors through W1 -> logits become plain matmuls on x.
    w_dst = jnp.einsum('hfc,hc->fh', w1_3d, ad1.astype(jnp.float32))          # [F, H]
    w_srcT = jnp.einsum('hfc,hc->hf', w1_3d, as1.astype(jnp.float32))         # [H, F]
    w_srcT = w_srcT.reshape(H, 1, F)

    # Fold layer-2's linear through layer-1 (exact: no activation between layers).
    w2_h = w2.reshape(H, C1, C2).astype(jnp.float32)                          # [H, C1, C2]
    w12 = jnp.einsum('hfc,hcd->hfd', w1_3d, w2_h)                             # [H, F, C2]
    w12_p = jnp.zeros((H, F, C2P), jnp.float32).at[:, :, :C2].set(w12)

    def pad_row(v):
        return jnp.zeros((1, C2P), jnp.float32).at[0, :C2].set(v.reshape(-1))
    lin2 = jnp.concatenate([pad_row(b1 @ w2),      # layer-1 bias pushed through W2
                            pad_row(ad2),          # layer-2 att_dst
                            pad_row(as2),          # layer-2 att_src
                            pad_row(b2)], axis=0)  # layer-2 bias          [4, C2P]

    kernel = functools.partial(fused_gat_kernel, negative_slope=0.2)
    vmem = pl.BlockSpec(memory_space=pltpu.MemorySpace.VMEM)
    y_pad = pl.pallas_call(
        kernel,
        out_shape=jax.ShapeDtypeStruct((N, C2P), jnp.float32),
        in_specs=[vmem] * 7,
        out_specs=vmem,
    )(x.astype(jnp.bfloat16),
      x.T.astype(jnp.bfloat16),
      mask_bias,
      w_dst.astype(jnp.bfloat16),
      w_srcT.astype(jnp.bfloat16),
      w12_p.astype(jnp.bfloat16),
      lin2)
    return y_pad[:, :C2]


if __name__ == "__main__":
    N = 16                     # number of nodes
    in_channels = 16
    hidden_channels = 8
    out_channels = 4
    num_heads = 32             # module default

    key = jax.random.PRNGKey(0)
    ks = jax.random.split(key, 9)

    # Node features
    x = jax.random.normal(ks[0], (N, in_channels), jnp.float32)

    # Deterministic ring graph, both directions, no self-loops / duplicates.
    src = jnp.arange(N, dtype=jnp.int32)
    dst = (src + 1) % N
    edge_index = jnp.stack([jnp.concatenate([src, dst]),
                            jnp.concatenate([dst, src])], axis=0)   # [2, E]

    # Dense adjacency mask: mask[i, j] = 1 iff edge j -> i; add self loops
    # (matches GATConv add_self_loops=True).
    mask = jnp.zeros((N, N), jnp.float32)
    mask = mask.at[edge_index[1], edge_index[0]].set(1.0)
    mask = jnp.maximum(mask, jnp.eye(N, dtype=jnp.float32))

    # Deterministic parameter init (shapes follow GATConv).
    s = 0.1
    w1 = s * jax.random.normal(ks[1], (in_channels, num_heads * hidden_channels), jnp.float32)
    as1 = s * jax.random.normal(ks[2], (num_heads, hidden_channels), jnp.float32)
    ad1 = s * jax.random.normal(ks[3], (num_heads, hidden_channels), jnp.float32)
    b1 = s * jax.random.normal(ks[4], (num_heads * hidden_channels,), jnp.float32)

    w2 = s * jax.random.normal(ks[5], (num_heads * hidden_channels, out_channels), jnp.float32)
    as2 = s * jax.random.normal(ks[6], (1, out_channels), jnp.float32)
    ad2 = s * jax.random.normal(ks[7], (1, out_channels), jnp.float32)
    b2 = s * jax.random.normal(ks[8], (out_channels,), jnp.float32)

    params = (w1, as1, ad1, b1, w2, as2, ad2, b2,
              num_heads, hidden_channels, out_channels)

    y = gat_forward(x, mask, params)
    jax.block_until_ready(y)
    assert y.shape == (N, out_channels)
    assert bool(jnp.all(jnp.isfinite(y)))
    print("KERNEL_OK")
</pallas_src>

<mosaic_0001>
module attributes {stable_mosaic.version = 11 : i64} {
  func.func @fused_gat_kernel(%arg0: memref<16x16xbf16, #tpu.memory_space<vmem>>, %arg1: memref<16x16xbf16, #tpu.memory_space<vmem>>, %arg2: memref<16x16xbf16, #tpu.memory_space<vmem>>, %arg3: memref<16x32xbf16, #tpu.memory_space<vmem>>, %arg4: memref<32x1x16xbf16, #tpu.memory_space<vmem>>, %arg5: memref<32x16x128xbf16, #tpu.memory_space<vmem>>, %arg6: memref<4x128xf32, #tpu.memory_space<vmem>>, %arg7: memref<16x128xf32, #tpu.memory_space<vmem>>) attributes {dimension_semantics = [], scalar_prefetch = 0 : i64, scratch_operands = 0 : i64, tpu.core_type = #tpu.core_type<tc>} {
    %c0 = arith.constant 0 : index
    %c0_0 = arith.constant 0 : index
    %0 = vector.load %arg0[%c0, %c0_0] : memref<16x16xbf16, #tpu.memory_space<vmem>>, vector<16x16xbf16>
    %c0_1 = arith.constant 0 : index
    %c0_2 = arith.constant 0 : index
    %1 = vector.load %arg2[%c0_1, %c0_2] : memref<16x16xbf16, #tpu.memory_space<vmem>>, vector<16x16xbf16>
    %2 = arith.extf %1 : vector<16x16xbf16> to vector<16x16xf32>
    %c0_3 = arith.constant 0 : index
    %c0_4 = arith.constant 0 : index
    %3 = vector.load %arg3[%c0_3, %c0_4] : memref<16x32xbf16, #tpu.memory_space<vmem>>, vector<16x32xbf16>
    %cst = arith.constant dense<0.000000e+00> : vector<16x32xf32>
    %4 = tpu.matmul %0, %3, %cst {dimension_numbers = #tpu.dot_dimension_numbers<[1], [0], [0], [1], [0, 0, 1, 1], [], []>} : vector<16x16xbf16>, vector<16x32xbf16>, vector<16x32xf32> -> vector<16x32xf32>
    %5 = tpu.iota {dimensions = array<i32: 0>} : vector<32x16x32xi32>
    %6 = tpu.iota {dimensions = array<i32: 2>} : vector<32x16x32xi32>
    %7 = arith.cmpi eq, %5, %6 : vector<32x16x32xi32>
    %8 = vector.shape_cast %4 : vector<16x32xf32> to vector<1x16x32xf32>
    %9 = vector.shape_cast %8 : vector<1x16x32xf32> to vector<1x16x32xf32>
    %10 = vector.broadcast %9 : vector<1x16x32xf32> to vector<32x16x32xf32>
    %cst_5 = arith.constant 0.000000e+00 : f32
    %11 = vector.broadcast %cst_5 : f32 to vector<32x16x32xf32>
    %12 = arith.select %7, %10, %11 : vector<32x16x32xi1>, vector<32x16x32xf32>
    %cst_6 = arith.constant dense<0.000000e+00> : vector<32x16xf32>
    %13 = vector.multi_reduction <add>, %12, %cst_6 [2] : vector<32x16x32xf32> to vector<32x16xf32>
    %14 = vector.shape_cast %13 : vector<32x16xf32> to vector<32x16x1xf32>
    %c0_7 = arith.constant 0 : index
    %c0_8 = arith.constant 0 : index
    %15 = vector.load %arg1[%c0_7, %c0_8] : memref<16x16xbf16, #tpu.memory_space<vmem>>, vector<16x16xbf16>
    %16 = vector.shape_cast %15 : vector<16x16xbf16> to vector<1x16x16xbf16>
    %17 = vector.shape_cast %16 : vector<1x16x16xbf16> to vector<1x16x16xbf16>
    %18 = vector.broadcast %17 : vector<1x16x16xbf16> to vector<32x16x16xbf16>
    %c0_9 = arith.constant 0 : index
    %c0_10 = arith.constant 0 : index
    %c0_11 = arith.constant 0 : index
    %19 = vector.load %arg4[%c0_9, %c0_10, %c0_11] : memref<32x1x16xbf16, #tpu.memory_space<vmem>>, vector<32x1x16xbf16>
    "tpu.trace_start"() <{level = 10 : i32, message = "huf,hfj->huj"}> : () -> ()
    %cst_12 = arith.constant dense<0.000000e+00> : vector<32x1x16xf32>
    %20 = tpu.matmul %19, %18, %cst_12 {dimension_numbers = #tpu.dot_dimension_numbers<[2], [1], [1], [2], [0, 0, 0, 1, 1, 2], [0], [0]>} : vector<32x1x16xbf16>, vector<32x16x16xbf16>, vector<32x1x16xf32> -> vector<32x1x16xf32>
    "tpu.trace_stop"() : () -> ()
    %21 = vector.broadcast %14 : vector<32x16x1xf32> to vector<32x16x16xf32>
    %22 = vector.broadcast %20 : vector<32x1x16xf32> to vector<32x16x16xf32>
    %23 = arith.addf %21, %22 : vector<32x16x16xf32>
    %cst_13 = arith.constant 0.000000e+00 : f32
    %24 = vector.broadcast %cst_13 : f32 to vector<32x16x16xf32>
    %25 = arith.cmpf oge, %23, %24 : vector<32x16x16xf32>
    %cst_14 = arith.constant 2.000000e-01 : f32
    %26 = vector.broadcast %cst_14 : f32 to vector<32x16x16xf32>
    %27 = arith.mulf %26, %23 : vector<32x16x16xf32>
    %28 = arith.select %25, %23, %27 : vector<32x16x16xi1>, vector<32x16x16xf32>
    %29 = vector.shape_cast %2 : vector<16x16xf32> to vector<1x16x16xf32>
    %30 = vector.broadcast %29 : vector<1x16x16xf32> to vector<32x16x16xf32>
    %31 = arith.addf %28, %30 : vector<32x16x16xf32>
    %cst_15 = arith.constant dense<0xFF800000> : vector<32x16xf32>
    %32 = vector.multi_reduction <maximumf>, %31, %cst_15 [2] : vector<32x16x16xf32> to vector<32x16xf32>
    %33 = vector.shape_cast %32 : vector<32x16xf32> to vector<32x16x1xf32>
    %34 = vector.broadcast %33 : vector<32x16x1xf32> to vector<32x16x16xf32>
    %35 = arith.subf %31, %34 : vector<32x16x16xf32>
    %36 = math.exp %35 : vector<32x16x16xf32>
    %cst_16 = arith.constant dense<0.000000e+00> : vector<32x16xf32>
    %37 = vector.multi_reduction <add>, %36, %cst_16 [2] : vector<32x16x16xf32> to vector<32x16xf32>
    %38 = vector.shape_cast %37 : vector<32x16xf32> to vector<32x16x1xf32>
    %39 = tpu.reciprocal %38 {approx = true} : vector<32x16x1xf32> -> vector<32x16x1xf32>
    %40 = vector.broadcast %39 : vector<32x16x1xf32> to vector<32x16x16xf32>
    %41 = arith.mulf %36, %40 : vector<32x16x16xf32>
    %42 = vector.shape_cast %41 : vector<32x16x16xf32> to vector<512x16xf32>
    %43 = arith.truncf %42 : vector<512x16xf32> to vector<512x16xbf16>
    %cst_17 = arith.constant dense<0.000000e+00> : vector<512x16xf32>
    %44 = tpu.matmul %43, %0, %cst_17 {dimension_numbers = #tpu.dot_dimension_numbers<[1], [0], [0], [1], [0, 0, 1, 1], [], []>} : vector<512x16xbf16>, vector<16x16xbf16>, vector<512x16xf32> -> vector<512x16xf32>
    %45 = vector.shape_cast %44 : vector<512x16xf32> to vector<32x16x16xf32>
    %46 = arith.truncf %45 : vector<32x16x16xf32> to vector<32x16x16xbf16>
    %c0_18 = arith.constant 0 : index
    %c0_19 = arith.constant 0 : index
    %c0_20 = arith.constant 0 : index
    %47 = vector.load %arg5[%c0_18, %c0_19, %c0_20] : memref<32x16x128xbf16, #tpu.memory_space<vmem>>, vector<32x16x128xbf16>
    "tpu.trace_start"() <{level = 10 : i32, message = "hnf,hfd->hnd"}> : () -> ()
    %cst_21 = arith.constant dense<0.000000e+00> : vector<32x16x128xf32>
    %48 = tpu.matmul %46, %47, %cst_21 {dimension_numbers = #tpu.dot_dimension_numbers<[2], [1], [1], [2], [0, 0, 0, 1, 1, 2], [0], [0]>} : vector<32x16x16xbf16>, vector<32x16x128xbf16>, vector<32x16x128xf32> -> vector<32x16x128xf32>
    "tpu.trace_stop"() : () -> ()
    %cst_22 = arith.constant dense<0.000000e+00> : vector<16x128xf32>
    %49 = vector.multi_reduction <add>, %48, %cst_22 [0] : vector<32x16x128xf32> to vector<16x128xf32>
    %c0_23 = arith.constant 0 : index
    %c0_24 = arith.constant 0 : index
    %50 = vector.load %arg6[%c0_23, %c0_24] : memref<4x128xf32, #tpu.memory_space<vmem>>, vector<1x128xf32>
    %51 = vector.broadcast %50 : vector<1x128xf32> to vector<16x128xf32>
    %52 = arith.addf %49, %51 : vector<16x128xf32>
    %c1 = arith.constant 1 : index
    %c0_25 = arith.constant 0 : index
    %53 = vector.load %arg6[%c1, %c0_25] : memref<4x128xf32, #tpu.memory_space<vmem>>, vector<1x128xf32>
    %54 = vector.broadcast %53 : vector<1x128xf32> to vector<16x128xf32>
    %55 = arith.mulf %52, %54 : vector<16x128xf32>
    %cst_26 = arith.constant dense<0.000000e+00> : vector<16xf32>
    %56 = vector.multi_reduction <add>, %55, %cst_26 [1] : vector<16x128xf32> to vector<16xf32>
    %57 = vector.shape_cast %56 : vector<16xf32> to vector<16x1xf32>
    %c2 = arith.constant 2 : index
    %c0_27 = arith.constant 0 : index
    %58 = vector.load %arg6[%c2, %c0_27] : memref<4x128xf32, #tpu.memory_space<vmem>>, vector<1x128xf32>
    "tpu.trace_start"() <{level = 10 : i32, message = "uc,jc->uj"}> : () -> ()
    %cst_28 = arith.constant dense<0.000000e+00> : vector<1x16xf32>
    %59 = tpu.matmul %58, %52, %cst_28 {dimension_numbers = #tpu.dot_dimension_numbers<[1], [1], [0], [0], [0, 0, 1, 0], [], []>} : vector<1x128xf32>, vector<16x128xf32>, vector<1x16xf32> -> vector<1x16xf32>
    "tpu.trace_stop"() : () -> ()
    %60 = vector.broadcast %57 : vector<16x1xf32> to vector<16x16xf32>
    %61 = vector.broadcast %59 : vector<1x16xf32> to vector<16x16xf32>
    %62 = arith.addf %60, %61 : vector<16x16xf32>
    %cst_29 = arith.constant 0.000000e+00 : f32
    %63 = vector.broadcast %cst_29 : f32 to vector<16x16xf32>
    %64 = arith.cmpf oge, %62, %63 : vector<16x16xf32>
    %cst_30 = arith.constant 2.000000e-01 : f32
    %65 = vector.broadcast %cst_30 : f32 to vector<16x16xf32>
    %66 = arith.mulf %65, %62 : vector<16x16xf32>
    %67 = arith.select %64, %62, %66 : vector<16x16xi1>, vector<16x16xf32>
    %68 = arith.addf %67, %2 : vector<16x16xf32>
    %cst_31 = arith.constant dense<0xFF800000> : vector<16xf32>
    %69 = vector.multi_reduction <maximumf>, %68, %cst_31 [1] : vector<16x16xf32> to vector<16xf32>
    %70 = vector.shape_cast %69 : vector<16xf32> to vector<16x1xf32>
    %71 = vector.broadcast %70 : vector<16x1xf32> to vector<16x16xf32>
    %72 = arith.subf %68, %71 : vector<16x16xf32>
    %73 = math.exp %72 : vector<16x16xf32>
    %cst_32 = arith.constant dense<0.000000e+00> : vector<16xf32>
    %74 = vector.multi_reduction <add>, %73, %cst_32 [1] : vector<16x16xf32> to vector<16xf32>
    %75 = vector.shape_cast %74 : vector<16xf32> to vector<16x1xf32>
    %76 = tpu.reciprocal %75 {approx = true} : vector<16x1xf32> -> vector<16x1xf32>
    %77 = vector.broadcast %76 : vector<16x1xf32> to vector<16x16xf32>
    %78 = arith.mulf %73, %77 : vector<16x16xf32>
    %79 = arith.truncf %78 : vector<16x16xf32> to vector<16x16xbf16>
    %80 = arith.truncf %52 : vector<16x128xf32> to vector<16x128xbf16>
    %cst_33 = arith.constant dense<0.000000e+00> : vector<16x128xf32>
    %81 = tpu.matmul %79, %80, %cst_33 {dimension_numbers = #tpu.dot_dimension_numbers<[1], [0], [0], [1], [0, 0, 1, 1], [], []>} : vector<16x16xbf16>, vector<16x128xbf16>, vector<16x128xf32> -> vector<16x128xf32>
    %c3 = arith.constant 3 : index
    %c0_34 = arith.constant 0 : index
    %82 = vector.load %arg6[%c3, %c0_34] : memref<4x128xf32, #tpu.memory_space<vmem>>, vector<1x128xf32>
    %83 = vector.broadcast %82 : vector<1x128xf32> to vector<16x128xf32>
    %84 = arith.addf %81, %83 : vector<16x128xf32>
    %85 = arith.negf %84 : vector<16x128xf32>
    %86 = math.exp %85 : vector<16x128xf32>
    %cst_35 = arith.constant 1.000000e+00 : f32
    %87 = vector.broadcast %cst_35 : f32 to vector<16x128xf32>
    %88 = arith.addf %87, %86 : vector<16x128xf32>
    %89 = arith.divf %87, %88 : vector<16x128xf32>
    %c0_36 = arith.constant 0 : index
    %c0_37 = arith.constant 0 : index
    %90 = vector.load %arg7[%c0_36, %c0_37] : memref<16x128xf32, #tpu.memory_space<vmem>>, vector<16x128xf32>
    tpu.vector_store %arg7[%c0_36, %c0_37], %89 {strides = array<i32>} : memref<16x128xf32, #tpu.memory_space<vmem>>, vector<16x128xf32>,
    return
  }
}

</mosaic_0001>

<bundles_post_ra>
// kernel: tpu_custom_call.1
= control target key start
LH: loop header
LB: loop body
LE: loop exit
PB: predicated region body
PF: predicated region fallthrough
CT: control target
= control target key end

     0   :  { %12 = vsyncpa [#allocation3], 0  ;;  %s6115_s0 = inlined_call_operand.vmem [shape: bf16[16,16], index: 0, kind: input, shape index: {}]   ;;  %s6116_s1 = inlined_call_operand.vmem [shape: bf16[16,16], index: 1, kind: input, shape index: {}]   ;;  %s6117_s2 = inlined_call_operand.vmem [shape: bf16[16,16], index: 2, kind: input, shape index: {}]   ;;  %s6118_s3 = inlined_call_operand.vmem [shape: bf16[16,32], index: 3, kind: input, shape index: {}]   ;;  %s6119_s4 = inlined_call_operand.vmem [shape: bf16[32,1,16], index: 4, kind: input, shape index: {}]   ;;  %s6120_s5 = inlined_call_operand.hbm [shape: bf16[32,16,128], index: 5, kind: input, shape index: {}]   ;;  %s6121_s6 = inlined_call_operand.vmem [shape: f32[4,128], index: 6, kind: input, shape index: {}]   ;;  %s6122_s7 = inlined_call_operand.hbm [shape: f32[16,128], index: 7, kind: output, shape index: {}]  }
   0x1   :  { %13 = vsyncpa [#allocation4], 0  ;;  %s28_s26 = sshll.u32 %s6120_s5, 4  ;;  %s4127_s27 = smov [#allocation2]   ;;  %s29_s26 = int_to_ptr.hbm [resolvable:$true] %s28_s26 }
   0x2   :  { %s30_s28 = sshll.u32 %s4127_s27, 4  ;;  %s4128_s29 = smov 64   ;;  %s31_s28 = int_to_ptr.vmem [resolvable:$true] %s30_s28 }
   0x3   :  { %s4129_s30 = smov 4  }
   0x4   :  { %36 = dma.hbm_to_vmem [thread:$0]  %s29_s26, 4096, %s31_s28, [#allocation3], %s4128_s29, %s4128_s29, %s4129_s30  }
   0x5   :  { %4123 = dma.done.wait [#allocation3], 4096  }
   0x6   :  { %4124 = vsyncadd [#allocation3], 4294963200  ;;  %v3751_v0 = vld [vmem:[%s6118_s3] sm:$0xff]  ;;  %vm6128_vm0 = vcmask 130048   ;;  %v384_v11 = vld [vmem:[%s6119_s4 + $0xa] sm:$0x1]  ;;  %v81_v23 = vlaneseq }
   0x7   :  { %v4182_v1 = vld [vmem:[%s6116_s1] sm:$0xff]  ;;  %74 = vmatpush.bf16.msra.mxu2 %v3751_v0  ;;  %v385_v12 = vld [vmem:[%s6119_s4 + $0xb] sm:$0x1]  ;;  %v382_v13 = vld [vmem:[%s6119_s4 + $0x8] sm:$0x1]  ;;  %vm179_vm4 = vcmask 261120  }
   0x8   :  { %v4187_v2 = vld [vmem:[%s6115_s0] sm:$0xff]  ;;  %454 = vmatpush.bf16.msra.mxu3 %v4182_v1  ;;  %470 = vmatpush.bf16.msra.mxu0 %v4182_v1  ;;  %v383_v14 = vld [vmem:[%s6119_s4 + $0x9] sm:$0x1]  ;;  %v388_v15 = vld [vmem:[%s6119_s4 + $0xe] sm:$0x1]  ;;  %v4299_v24 = vand.u32 127, %v81_v23 }
   0x9   :  { %v376_v3 = vld [vmem:[%s6119_s4 + $0x2] sm:$0x1]  ;;  %v377_v4 = vld [vmem:[%s6119_s4 + $0x3] sm:$0x1]  ;;  %422 = vmatpush.bf16.msra.mxu1 %v4182_v1  ;;  %v374_v5 = vld [vmem:[%s6119_s4] sm:$0x1] }
   0xa   :  { %3518 = vmatmul.msk.bf16.vlgmr.msra.gmra.mxu2 %vm6128_vm0, %v4187_v2  ;;  %v375_v6 = vld [vmem:[%s6119_s4 + $0x1] sm:$0x1]  ;;  %v380_v7 = vld [vmem:[%s6119_s4 + $0x6] sm:$0x1]  ;;  %v381_v8 = vld [vmem:[%s6119_s4 + $0x7] sm:$0x1] }
   0xb   :  { %438 = vmatpush.bf16.msrb.mxu2 %v4182_v1  ;;  %3525 = vmatmul.msk.bf16.vlgmr.msra.gmra.mxu3 %vm6128_vm0, %v376_v3  ;;  %v378_v9 = vld [vmem:[%s6119_s4 + $0x4] sm:$0x1]  ;;  %v379_v10 = vld [vmem:[%s6119_s4 + $0x5] sm:$0x1]  ;;  %v389_v16 = vld [vmem:[%s6119_s4 + $0xf] sm:$0x1] }
   0xc   :  { %518 = vmatpush.bf16.msrb.mxu3 %v4182_v1  ;;  %3526 = vmatmul.msk.bf16.vlgmr.msra.gmra.mxu0 %vm6128_vm0, %v377_v4  ;;  %v387_v17 = vld [vmem:[%s6119_s4 + $0xd] sm:$0x1]  ;;  %v392_v18 = vld [vmem:[%s6119_s4 + $0x12] sm:$0x1]  ;;  %v386_v19 = vld [vmem:[%s6119_s4 + $0xc] sm:$0x1] }
   0xd   :  { %3523 = vmatmul.msk.bf16.vlgmr.msra.gmra.mxu1 %vm6128_vm0, %v374_v5  ;;  %534 = vmatpush.bf16.msrb.mxu0 %v4182_v1  ;;  %v393_v20 = vld [vmem:[%s6119_s4 + $0x13] sm:$0x1]  ;;  %v396_v21 = vld [vmem:[%s6119_s4 + $0x16] sm:$0x1]  ;;  %v391_v22 = vld [vmem:[%s6119_s4 + $0x11] sm:$0x1] }
   0xe   :  { %486 = vmatpush.bf16.msrb.mxu1 %v4182_v1  ;;  %v390_v25 = vld [vmem:[%s6119_s4 + $0x10] sm:$0x1]  ;;  %v397_v26 = vld [vmem:[%s6119_s4 + $0x17] sm:$0x1]  ;;  %vm91_vm1 = vcmp.eq.s32.totalorder %v4299_v24, 8  ;;  %vm6124_vm2 = vcmp.eq.s32.totalorder %v4299_v24, 7 }
   0xf   :  { %502 = vmatpush.bf16.msra.mxu2 %v4182_v1  ;;  %vm89_vm3 = vcmp.eq.s32.totalorder %v4299_v24, 6  ;;  %v400_v27 = vld [vmem:[%s6119_s4 + $0x1a] sm:$0x1]  ;;  %vm94_vm5 = vcmp.eq.s32.totalorder %v4299_v24, 11  ;;  %vm6127_vm6 = vcmp.eq.s32.totalorder %v4299_v24, 10  ;;  %vm6123_vm7 = vcmp.eq.s32.totalorder %v4299_v24, 9 }
  0x10   :  { %582 = vmatpush.bf16.msra.mxu3 %v4182_v1  ;;  %vm6126_vm8 = vcmp.eq.s32.totalorder %v4299_v24, 12  ;;  %vm6125_vm9 = vcmp.eq.s32.totalorder %v4299_v24, 13  ;;  %vm6129_vm10 = vcmp.eq.s32.totalorder %v4299_v24, 0  ;;  %vm85_vm11 = vcmp.eq.s32.totalorder %v4299_v24, 2  ;;  %v401_v47 = vld [vmem:[%s6119_s4 + $0x1b] sm:$0x1] }
  0x11   :  { %598 = vmatpush.bf16.msra.mxu0 %v4182_v1  ;;  %vm84_vm12 = vcmp.eq.s32.totalorder %v4299_v24, 1  ;;  %vm6130_vm13 = vcmp.eq.s32.totalorder %v4299_v24, 14  ;;  %vm102_vm14 = vcmp.eq.s32.totalorder %v4299_v24, 19  ;;  %vm88_vm15 = vcmp.eq.s32.totalorder %v4299_v24, 5  ;;  %s3497_s14 = sshll.u32 %s6122_s7, 4  ;;  %s4131_s3 = smov 128   ;;  %s3498_s14 = int_to_ptr.hbm [resolvable:$true] %s3497_s14 }
  0x12   :  { %550 = vmatpush.bf16.msra.mxu1 %v4182_v1  ;;  %s4132_s15 = smov 8  }
  0x1a   :  { %3524 = vmatmul.msk.bf16.vlgmr.msrb.gmra.mxu2 %vm6128_vm0, %v375_v6 }
  0x1b   :  { %3529 = vmatmul.msk.bf16.vlgmr.msrb.gmra.mxu3 %vm6128_vm0, %v380_v7  ;;  %566 = vmatpush.bf16.msrb.mxu2 %v4182_v1 }
  0x1c   :  { %3530 = vmatmul.msk.bf16.vlgmr.msrb.gmra.mxu0 %vm6128_vm0, %v381_v8  ;;  %646 = vmatpush.bf16.msrb.mxu3 %v4182_v1 }
  0x1d   :  { %3527 = vmatmul.msk.bf16.vlgmr.msrb.gmra.mxu1 %vm6128_vm0, %v378_v9  ;;  %662 = vmatpush.bf16.msrb.mxu0 %v4182_v1 }
  0x1e   :  { %614 = vmatpush.bf16.msrb.mxu1 %v4182_v1 }
  0x2a   :  { %3528 = vmatmul.msk.bf16.vlgmr.msra.gmra.mxu2 %vm6128_vm0, %v379_v10 }
  0x2b   :  { %3533 = vmatmul.msk.bf16.vlgmr.msra.gmra.mxu3 %vm6128_vm0, %v384_v11  ;;  %630 = vmatpush.bf16.msra.mxu2 %v4182_v1 }
  0x2c   :  { %3534 = vmatmul.msk.bf16.vlgmr.msra.gmra.mxu0 %vm6128_vm0, %v385_v12  ;;  %710 = vmatpush.bf16.msra.mxu3 %v4182_v1 }
  0x2d   :  { %3531 = vmatmul.msk.bf16.vlgmr.msra.gmra.mxu1 %vm6128_vm0, %v382_v13  ;;  %726 = vmatpush.bf16.msra.mxu0 %v4182_v1 }
  0x2e   :  { %678 = vmatpush.bf16.msra.mxu1 %v4182_v1 }
  0x3a   :  { %3532 = vmatmul.msk.bf16.vlgmr.msrb.gmra.mxu2 %vm6128_vm0, %v383_v14 }
  0x3b   :  { %3537 = vmatmul.msk.bf16.vlgmr.msrb.gmra.mxu3 %vm6128_vm0, %v388_v15  ;;  %694 = vmatpush.bf16.msrb.mxu2 %v4182_v1 }
  0x3c   :  { %3538 = vmatmul.msk.bf16.vlgmr.msrb.gmra.mxu0 %vm6128_vm0, %v389_v16  ;;  %774 = vmatpush.bf16.msrb.mxu3 %v4182_v1 }
  0x3d   :  { %790 = vmatpush.bf16.msrb.mxu0 %v4182_v1  ;;  %3535 = vmatmul.msk.bf16.vlgmr.msrb.gmra.mxu1 %vm6128_vm0, %v386_v19 }
  0x3e   :  { %742 = vmatpush.bf16.msrb.mxu1 %v4182_v1 }
  0x4a   :  { %3536 = vmatmul.msk.bf16.vlgmr.msra.gmra.mxu2 %vm6128_vm0, %v387_v17 }
  0x4b   :  { %3541 = vmatmul.msk.bf16.vlgmr.msra.gmra.mxu3 %vm6128_vm0, %v392_v18  ;;  %758 = vmatpush.bf16.msra.mxu2 %v4182_v1 }
  0x4c   :  { %838 = vmatpush.bf16.msra.mxu3 %v4182_v1  ;;  %3542 = vmatmul.msk.bf16.vlgmr.msra.gmra.mxu0 %vm6128_vm0, %v393_v20 }
  0x4d   :  { %854 = vmatpush.bf16.msra.mxu0 %v4182_v1  ;;  %3539 = vmatmul.msk.bf16.vlgmr.msra.gmra.mxu1 %vm6128_vm0, %v390_v25 }
  0x4e   :  { %806 = vmatpush.bf16.msra.mxu1 %v4182_v1 }
  0x5a   :  { %3540 = vmatmul.msk.bf16.vlgmr.msrb.gmra.mxu2 %vm6128_vm0, %v391_v22 }
  0x5b   :  { %3545 = vmatmul.msk.bf16.vlgmr.msrb.gmra.mxu3 %vm6128_vm0, %v396_v21  ;;  %822 = vmatpush.bf16.msrb.mxu2 %v4182_v1 }
  0x5c   :  { %902 = vmatpush.bf16.msrb.mxu3 %v4182_v1  ;;  %3546 = vmatmul.msk.bf16.vlgmr.msrb.gmra.mxu0 %vm6128_vm0, %v397_v26 }
  0x5d   :  { %918 = vmatpush.bf16.msrb.mxu0 %v4182_v1 }
  0x6b   :  { %3549 = vmatmul.msk.bf16.vlgmr.msra.gmra.mxu3 %vm6128_vm0, %v400_v27 }
  0x6c   :  { %3791 = vmatpush.bf16.msra.mxu3 %v4187_v2  ;;  %3550 = vmatmul.msk.bf16.vlgmr.msra.gmra.mxu0 %vm6128_vm0, %v401_v47  ;;  %vm112_vm0 = vcmp.eq.s32.totalorder %v4299_v24, 29 }
  0x6d   :  { %2116 = vmatpush.bf16.msra.mxu0 %v4187_v2 }
  0x8d   :  { %v4317_v28 = vpop.f32.mrf.mxu2 }
  0x8e   :  { %v131_v29 = vsel %vm91_vm1, %v4317_v28, 0.0  ;;  %v129_v30 = vsel %vm6124_vm2, %v4317_v28, 0.0  ;;  %v127_v31 = vsel %vm89_vm3, %v4317_v28, 0.0  ;;  %v137_v35 = vsel %vm94_vm5, %v4317_v28, 0.0 }
  0x8f   :  { %v228_v32 = vsel %vm179_vm4, %v131_v29, 0.0  ;;  %v222_v33 = vsel %vm179_vm4, %v129_v30, 0.0  ;;  %v216_v34 = vsel %vm179_vm4, %v127_v31, 0.0  ;;  %v135_v36 = vsel %vm6127_vm6, %v4317_v28, 0.0 }
  0x90   :  { %229 = vadd.xlane.f32.xlu2 %v228_v32  ;;  %223 = vadd.xlane.f32.xlu1 %v222_v33  ;;  %v133_v37 = vsel %vm6123_vm7, %v4317_v28, 0.0  ;;  %v139_v38 = vsel %vm6126_vm8, %v4317_v28, 0.0  ;;  %v141_v39 = vsel %vm6125_vm9, %v4317_v28, 0.0  ;;  %v246_v41 = vsel %vm179_vm4, %v137_v35, 0.0 }
  0x91   :  { %217 = vadd.xlane.f32.xlu0 %v216_v34  ;;  %v240_v42 = vsel %vm179_vm4, %v135_v36, 0.0  ;;  %v234_v43 = vsel %vm179_vm4, %v133_v37, 0.0  ;;  %v252_v44 = vsel %vm179_vm4, %v139_v38, 0.0  ;;  %v258_v45 = vsel %vm179_vm4, %v141_v39, 0.0 }
  0x92   :  { %v115_v46 = vsel %vm6129_vm10, %v4317_v28, 0.0  ;;  %vm100_vm9 = vcmp.eq.s32.totalorder %v4299_v24, 17  ;;  %vm101_vm7 = vcmp.eq.s32.totalorder %v4299_v24, 18  ;;  %vm111_vm2 = vcmp.eq.s32.totalorder %v4299_v24, 28 }
  0x93   :  { %vm103_vm8 = vcmp.eq.s32.totalorder %v4299_v24, 20  ;;  %vm106_vm6 = vcmp.eq.s32.totalorder %v4299_v24, 23  ;;  %v119_v48 = vsel %vm85_vm11, %v4317_v28, 0.0  ;;  %v153_v49 = vsel %vm102_vm14, %v4317_v28, 0.0 }
  0x94   :  { %v117_v52 = vsel %vm84_vm12, %v4317_v28, 0.0  ;;  %v4397_v53 = vsel %vm179_vm4, %v153_v49, 0.0  ;;  %v143_v56 = vsel %vm6130_vm13, %v4317_v28, 0.0  ;;  %vm6178_vm10 = vcmp.eq.s32.totalorder %v4299_v24, 12 }
  0x95   :  { %v4356_v40 = vpop.f32.mrf.mxu2  ;;  %v180_v60 = vsel %vm179_vm4, %v115_v46, 0.0  ;;  %v192_v0 = vsel %vm179_vm4, %v119_v48, 0.0  ;;  %v186_v3 = vsel %vm179_vm4, %v117_v52, 0.0  ;;  %v264_v6 = vsel %vm179_vm4, %v143_v56, 0.0 }
  0x96   :  { %v128_v50 = vsel %vm89_vm3, %v4356_v40, 0.0  ;;  %v132_v51 = vsel %vm91_vm1, %v4356_v40, 0.0  ;;  %vm104_vm3 = vcmp.eq.s32.totalorder %v4299_v24, 21  ;;  %v138_v57 = vsel %vm94_vm5, %v4356_v40, 0.0 }
  0x97   :  { %v4400_v54 = vsel %vm179_vm4, %v128_v50, 0.0  ;;  %v4403_v55 = vsel %vm179_vm4, %v132_v51, 0.0  ;;  %vm6177_vm1 = vcmp.eq.s32.totalorder %v4299_v24, 10  ;;  %v140_v59 = vsel %vm6178_vm10, %v4356_v40, 0.0 }
  0x98   :  { %247 = vadd.xlane.f32.xlu2 %v246_v41  ;;  %241 = vadd.xlane.f32.xlu1 %v240_v42  ;;  %v136_v58 = vsel %vm6177_vm1, %v4356_v40, 0.0  ;;  %v4422_v61 = vsel %vm179_vm4, %v138_v57, 0.0  ;;  %v4428_v63 = vsel %vm179_vm4, %v140_v59, 0.0  ;;  %vm6179_vm10 = vcmp.eq.s32.totalorder %v4299_v24, 13 }
  0x99   :  { %235 = vadd.xlane.f32.xlu0 %v234_v43  ;;  %v4425_v62 = vsel %vm179_vm4, %v136_v58, 0.0  ;;  %v142_v4 = vsel %vm6179_vm10, %v4356_v40, 0.0  ;;  %v118_v5 = vsel %vm84_vm12, %v4356_v40, 0.0  ;;  %vm6180_vm1 = vcmp.eq.s32.totalorder %v4299_v24, 4 }
  0x9a   :  { %v4443_v7 = vsel %vm6180_vm1, %v4317_v28, 0.0  ;;  %v4446_v8 = vsel %vm179_vm4, %v142_v4, 0.0  ;;  %v4449_v9 = vsel %vm179_vm4, %v118_v5, 0.0  ;;  %vm105_vm10 = vcmp.eq.s32.totalorder %v4299_v24, 22 }
  0x9b   :  { %vm6181_vm12 = vcmp.eq.s32.totalorder %v4299_v24, 15  ;;  %v120_v11 = vsel %vm85_vm11, %v4356_v40, 0.0  ;;  %vm6183_vm13 = vcmp.eq.s32.totalorder %v4299_v24, 4  ;;  %vm6184_vm5 = vcmp.eq.s32.totalorder %v4299_v24, 3 }
  0x9c   :  { %v145_v10 = vsel %vm6181_vm12, %v4317_v28, 0.0  ;;  %vm6182_vm1 = vmmov %vm6181_vm12  ;;  %v124_v13 = vsel %vm6183_vm13, %v4356_v40, 0.0  ;;  %v121_v14 = vsel %vm6184_vm5, %v4317_v28, 0.0  ;;  %v4470_v15 = vsel %vm179_vm4, %v120_v11, 0.0 }
  0x9d   :  { %v146_v12 = vsel %vm6182_vm1, %v4356_v40, 0.0  ;;  %v4476_v17 = vsel %vm179_vm4, %v124_v13, 0.0  ;;  %vm108_vm11 = vcmp.eq.s32.totalorder %v4299_v24, 25  ;;  %v150_v18 = vsel %vm100_vm9, %v4356_v40, 0.0 }
  0x9e   :  { %v4473_v16 = vsel %vm179_vm4, %v146_v12, 0.0  ;;  %v126_v19 = vsel %vm88_vm15, %v4356_v40, 0.0  ;;  %v152_v20 = vsel %vm101_vm7, %v4356_v40, 0.0  ;;  %v154_v21 = vsel %vm102_vm14, %v4356_v40, 0.0 }
  0x9f   :  { %v4492_v22 = vsel %vm179_vm4, %v150_v18, 0.0  ;;  %v4495_v23 = vsel %vm179_vm4, %v126_v19, 0.0  ;;  %v4498_v25 = vsel %vm179_vm4, %v152_v20, 0.0  ;;  %v4501_v26 = vsel %vm179_vm4, %v154_v21, 0.0 }
  0xa0   :  { %253 = vadd.xlane.f32.xlu2 %v252_v44  ;;  %259 = vadd.xlane.f32.xlu1 %v258_v45  ;;  %v171_v27 = vsel %vm111_vm2, %v4317_v28, 0.0  ;;  %v156_v29 = vsel %vm103_vm8, %v4356_v40, 0.0  ;;  %v161_v30 = vsel %vm106_vm6, %v4317_v28, 0.0  ;;  %v155_v31 = vsel %vm103_vm8, %v4317_v28, 0.0 }
  0xa1   :  { %181 = vadd.xlane.f32.xlu0 %v180_v60  ;;  %v4516_v32 = vsel %vm179_vm4, %v171_v27, 0.0  ;;  %v4519_v33 = vsel %vm179_vm4, %v156_v29, 0.0  ;;  %v4522_v34 = vsel %vm179_vm4, %v161_v30, 0.0  ;;  %v4525_v35 = vsel %vm179_vm4, %v155_v31, 0.0  ;;  %v4627_v30 = vpop.f32.mrf.mxu3 }
  0xa2   :  { %v174_v36 = vsel %vm112_vm0, %v4356_v40, 0.0  ;;  %v173_v37 = vsel %vm112_vm0, %v4317_v28, 0.0  ;;  %v172_v38 = vsel %vm111_vm2, %v4356_v40, 0.0  ;;  %v157_v39 = vsel %vm104_vm3, %v4317_v28, 0.0 }
  0xa3   :  { %v4540_v41 = vsel %vm179_vm4, %v174_v36, 0.0  ;;  %v4543_v42 = vsel %vm179_vm4, %v173_v37, 0.0  ;;  %v4546_v43 = vsel %vm179_vm4, %v172_v38, 0.0  ;;  %v4549_v44 = vsel %vm179_vm4, %v157_v39, 0.0  ;;  %v4642_v39 = vpop.f32.mrf.mxu0 }
  0xa4   :  { %vm6185_vm0 = vcmp.eq.s32.totalorder %v4299_v24, 24  ;;  %v162_v46 = vsel %vm106_vm6, %v4356_v40, 0.0  ;;  %vm6187_vm8 = vcmp.eq.s32.totalorder %v4299_v24, 30  ;;  %v159_v56 = vsel %vm105_vm10, %v4317_v28, 0.0 }
  0xa5   :  { %v163_v45 = vsel %vm6185_vm0, %v4317_v28, 0.0  ;;  %vm6186_vm2 = vmmov %vm6185_vm0  ;;  %v176_v48 = vsel %vm6187_vm8, %v4356_v40, 0.0  ;;  %v4567_v50 = vsel %vm179_vm4, %v162_v46, 0.0  ;;  %v158_v57 = vsel %vm104_vm3, %v4356_v40, 0.0 }
  0xa6   :  { %v164_v47 = vsel %vm6186_vm2, %v4356_v40, 0.0  ;;  %v4564_v49 = vsel %vm179_vm4, %v163_v45, 0.0  ;;  %6189 = vst [vmem:[#allocation9_spill] sm:$0xff] %v4567_v50  ;;  %v4573_v52 = vsel %vm179_vm4, %v176_v48, 0.0  ;;  %v160_v58 = vsel %vm105_vm10, %v4356_v40, 0.0  ;;  %vm6197_vm13 = vmmov %vm6187_vm8 }
  0xa7   :  { %6188 = vst [vmem:[#allocation8_spill] sm:$0xff] %v4564_v49  ;;  %v4570_v51 = vsel %vm179_vm4, %v164_v47, 0.0  ;;  %vm6192_vm6 = vcmp.eq.s32.totalorder %v4299_v24, 31  ;;  %v4588_v60 = vsel %vm179_vm4, %v159_v56, 0.0  ;;  %v175_v5 = vsel %vm6197_vm13, %v4317_v28, 0.0 }
  0xa8   :  { %193 = vadd.xlane.f32.xlu1 %v192_v0  ;;  %187 = vadd.xlane.f32.xlu2 %v186_v3  ;;  %6190 = vst [vmem:[#allocation10_spill] sm:$0xff] %v4570_v51  ;;  %v177_v59 = vsel %vm6192_vm6, %v4317_v28, 0.0  ;;  %v4591_v0 = vsel %vm179_vm4, %v158_v57, 0.0  ;;  %v4594_v3 = vsel %vm179_vm4, %v160_v58, 0.0  ;;  %v165_v11 = vsel %vm108_vm11, %v4317_v28, 0.0  ;;  %vm6198_vm14 = vmmov %vm6192_vm6  ;;  %v4657_v58 = vpop.f32.mrf.mxu1 }
  0xa9   :  { %265 = vadd.xlane.f32.xlu0 %v264_v6  ;;  %6191 = vst [vmem:[#allocation11_spill] sm:$0xff] %v4573_v52  ;;  %v4597_v4 = vsel %vm179_vm4, %v177_v59, 0.0  ;;  %v166_v6 = vsel %vm108_vm11, %v4356_v40, 0.0  ;;  %v178_v12 = vsel %vm6198_vm14, %v4356_v40, 0.0  ;;  %v4612_v13 = vsel %vm179_vm4, %v175_v5, 0.0  ;;  %v458_v38 = vpop.f32.mrf.mxu3  ;;  %v4659_v59 = vpop.f32.mrf.mxu2 }
  0xaa   :  { %6193 = vst [vmem:[#allocation12_spill] sm:$0xff] %v4588_v60  ;;  %v4615_v18 = vsel %vm179_vm4, %v166_v6, 0.0  ;;  %v4618_v19 = vsel %vm179_vm4, %v165_v11, 0.0  ;;  %v4621_v20 = vsel %vm179_vm4, %v178_v12, 0.0  ;;  %v204_v21 = vsel %vm179_vm4, %v4443_v7, 0.0 }
  0xab   :  { %6194 = vst [vmem:[#allocation13_spill] sm:$0xff] %v4591_v0  ;;  %v270_v27 = vsel %vm179_vm4, %v145_v10, 0.0  ;;  %v198_v29 = vsel %vm179_vm4, %v121_v14, 0.0  ;;  %vm99_vm3 = vcmp.eq.s32.totalorder %v4299_v24, 16  ;;  %v149_v31 = vsel %vm100_vm9, %v4317_v28, 0.0  ;;  %v474_v5 = vpop.f32.mrf.mxu0 }
  0xac   :  { %6195 = vst [vmem:[#allocation14_spill] sm:$0xff] %v4594_v3  ;;  %vm6203_vm5 = vcmp.eq.s32.totalorder %v4299_v24, 7  ;;  %v147_v7 = vsel %vm99_vm3, %v4317_v28, 0.0  ;;  %v282_v10 = vsel %vm179_vm4, %v149_v31, 0.0  ;;  %vm109_vm9 = vcmp.eq.s32.totalorder %v4299_v24, 26 }
  0xad   :  { %6196 = vst [vmem:[#allocation15_spill] sm:$0xff] %v4597_v4  ;;  %v130_v36 = vsel %vm6203_vm5, %v4356_v40, 0.0  ;;  %v276_v37 = vsel %vm179_vm4, %v147_v7, 0.0  ;;  %v125_v45 = vsel %vm88_vm15, %v4317_v28, 0.0  ;;  %vm6204_vm10 = vcmp.eq.s32.totalorder %v4299_v24, 9 }
  0xae   :  { %6199 = vst [vmem:[#allocation16_spill] sm:$0xff] %v4612_v13  ;;  %v225_v14 = vsel %vm179_vm4, %v130_v36, 0.0  ;;  %v134_v46 = vsel %vm6204_vm10, %v4356_v40, 0.0  ;;  %v167_v47 = vsel %vm109_vm9, %v4317_v28, 0.0  ;;  %v210_v48 = vsel %vm179_vm4, %v125_v45, 0.0 }
  0xaf   :  { %6200 = vst [vmem:[#allocation17_spill] sm:$0xff] %v4615_v18  ;;  %v237_v56 = vsel %vm179_vm4, %v134_v46, 0.0  ;;  %v336_v57 = vsel %vm179_vm4, %v167_v47, 0.0  ;;  %vm110_vm15 = vcmp.eq.s32.totalorder %v4299_v24, 27  ;;  %v151_v11 = vsel %vm101_vm7, %v4317_v28, 0.0 }
  0xb0   :  { %6201 = vst [vmem:[#allocation18_spill] sm:$0xff] %v4618_v19  ;;  %205 = vadd.xlane.f32.xlu1 %v204_v21  ;;  %271 = vadd.xlane.f32.xlu2 %v270_v27  ;;  %vm6205_vm12 = vcmp.eq.s32.totalorder %v4299_v24, 0  ;;  %v169_v21 = vsel %vm110_vm15, %v4317_v28, 0.0  ;;  %v288_v27 = vsel %vm179_vm4, %v151_v11, 0.0  ;;  %v426_v36 = vpop.f32.mrf.mxu1  ;;  %vm6206_vm7 = vcmp.eq.s32.totalorder %v4299_v24, 14 }
  0xb1   :  { %6202 = vst [vmem:[#allocation19_spill] sm:$0xff] %v4621_v20  ;;  %199 = vadd.xlane.f32.xlu0 %v198_v29  ;;  %v4662_v6 = vpop.f32.mrf.mxu3  ;;  %v116_v12 = vsel %vm6205_vm12, %v4356_v40, 0.0  ;;  %v342_v31 = vsel %vm179_vm4, %v169_v21, 0.0  ;;  %v442_v7 = vpop.f32.mrf.mxu2  ;;  %vm6207_vm1 = vcmp.eq.s32.totalorder %v4299_v24, 3  ;;  %v148_v11 = vsel %vm99_vm3, %v4356_v40, 0.0 }
  0xb2   :  { %v183_v29 = vsel %vm179_vm4, %v116_v12, 0.0  ;;  %v279_v12 = vsel %vm179_vm4, %v148_v11, 0.0  ;;  %vm6210_vm0 = vcmask 130048  }
  0xb3   :  { %vm6212_vm2 = vmmov %vm6210_vm0 }
  0xb4   :  { %vm6213_vm8 = vmmov %vm6210_vm0 }
  0xb5   :  { %vm6214_vm3 = vmmov %vm6210_vm0 }
  0xb6   :  { %vm6215_vm5 = vmmov %vm6210_vm0 }
  0xb7   :  { %vm6218_vm12 = vmmov %vm6210_vm0 }
  0xb8   :  { %283 = vadd.xlane.f32.xlu2 %v282_v10  ;;  %226 = vadd.xlane.f32.xlu1 %v225_v14  ;;  %v4676_v14 = vpop.f32.mrf.mxu0  ;;  %v4684_v38 = vpop.f32.mrf.mxu1 }
  0xb9   :  { %277 = vadd.xlane.f32.xlu0 %v276_v37  ;;  %v522_v10 = vpop.f32.mrf.mxu3  ;;  %v144_v37 = vsel %vm6206_vm7, %v4356_v40, 0.0  ;;  %v4686_v45 = vpop.f32.mrf.mxu2 }
  0xba   :  { %v267_v28 = vsel %vm179_vm4, %v144_v37, 0.0  ;;  %v170_v10 = vsel %vm110_vm15, %v4356_v40, 0.0  ;;  %vm6217_vm15 = vmmov %vm6210_vm0 }
  0xbb   :  { %v345_v37 = vsel %vm179_vm4, %v170_v10, 0.0 }
  0xc0   :  { %211 = vadd.xlane.f32.xlu2 %v210_v48  ;;  %238 = vadd.xlane.f32.xlu1 %v237_v56  ;;  %v538_v46 = vpop.f32.mrf.mxu0  ;;  %v122_v48 = vsel %vm6207_vm1, %v4356_v40, 0.0  ;;  %vm6219_vm1 = vmmov %vm6210_vm0 }
  0xc1   :  { %337 = vadd.xlane.f32.xlu0 %v336_v57  ;;  %v4688_v47 = vpop.f32.mrf.mxu3  ;;  %v201_v56 = vsel %vm179_vm4, %v122_v48, 0.0 }
  0xc8   :  { %289 = vadd.xlane.f32.xlu2 %v288_v27  ;;  %184 = vadd.xlane.f32.xlu1 %v183_v29  ;;  %v4696_v5 = vpop.f32.mrf.mxu0  ;;  %v168_v29 = vsel %vm109_vm9, %v4356_v40, 0.0 }
  0xc9   :  { %343 = vadd.xlane.f32.xlu0 %v342_v31  ;;  %v586_v57 = vpop.f32.mrf.mxu3  ;;  %v339_v31 = vsel %vm179_vm4, %v168_v29, 0.0 }
  0xd0   :  { %295 = vadd.xlane.f32.xlu2 %v4397_v53  ;;  %268 = vadd.xlane.f32.xlu1 %v267_v28  ;;  %v490_v53 = vpop.f32.mrf.mxu1 }
  0xd1   :  { %220 = vadd.xlane.f32.xlu0 %v4400_v54  ;;  %v506_v54 = vpop.f32.mrf.mxu2  ;;  %v4708_v27 = vpop.f32.mrf.mxu3  ;;  %v4740_v53 = vld [vmem:[%s6117_s2] sm:$0xff]  }
  0xd8   :  { %232 = vadd.xlane.f32.xlu2 %v4403_v55  ;;  %202 = vadd.xlane.f32.xlu1 %v201_v56  ;;  %v4704_v55 = vpop.f32.mrf.mxu1 }
  0xd9   :  { %250 = vadd.xlane.f32.xlu0 %v4422_v61  ;;  %v4706_v21 = vpop.f32.mrf.mxu2  ;;  %v602_v61 = vpop.f32.mrf.mxu0 }
  0xda   :  { %v650_v36 = vpop.f32.mrf.mxu3  ;;  %v6134_v61 = vperm.slane %v4676_v14, 0 }
  0xdb   :  { %v6133_v36 = vperm.slane %v4696_v5, 0 }
  0xe0   :  { %244 = vadd.xlane.f32.xlu2 %v4425_v62  ;;  %280 = vadd.xlane.f32.xlu1 %v279_v12  ;;  %v554_v62 = vpop.f32.mrf.mxu1 }
  0xe1   :  { %256 = vadd.xlane.f32.xlu0 %v4428_v63  ;;  %v570_v63 = vpop.f32.mrf.mxu2  ;;  %v4716_v7 = vpop.f32.mrf.mxu0 }
  0xe2   :  { %v4728_v46 = vpop.f32.mrf.mxu3  ;;  %v394_v63 = vld [vmem:[%s6119_s4 + $0x14] sm:$0x1] }
  0xe3   :  { %3543 = vmatmul.msk.bf16.vlgmr.msrb.gmra.mxu1 %vm6210_vm0, %v394_v63 }
  0xe4   :  { %870 = vmatpush.bf16.msrb.mxu1 %v4182_v1  ;;  %v6137_v1 = vperm.slane %v4688_v47, 0 }
  0xe8   :  { %262 = vadd.xlane.f32.xlu2 %v4446_v8  ;;  %340 = vadd.xlane.f32.xlu1 %v339_v31  ;;  %v4724_v8 = vpop.f32.mrf.mxu1 }
  0xe9   :  { %190 = vadd.xlane.f32.xlu0 %v4449_v9  ;;  %v4726_v28 = vpop.f32.mrf.mxu2  ;;  %v666_v9 = vpop.f32.mrf.mxu0 }
  0xea   :  { %v714_v48 = vpop.f32.mrf.mxu3 }
  0xf0   :  { %196 = vadd.xlane.f32.xlu2 %v4470_v15  ;;  %346 = vadd.xlane.f32.xlu1 %v345_v37  ;;  %v618_v24 = vpop.f32.mrf.mxu1  ;;  %v6131_v15 = vperm.slane %v4704_v55, 0  ;;  %v6135_v37 = vperm.slane %v4706_v21, 0 }
  0xf1   :  { %274 = vadd.xlane.f32.xlu0 %v4473_v16  ;;  %v634_v40 = vpop.f32.mrf.mxu2  ;;  %v4732_v56 = vpop.f32.mrf.mxu0  ;;  %v6132_v16 = vperm.slane %v4662_v6, 0 }
  0xf2   :  { %6208 = vst [vmem:[#allocation20_spill] sm:$0xff] %v4732_v56 }
  0xf8   :  { %208 = vadd.xlane.f32.xlu2 %v4476_v17  ;;  %v4742_v17 = vpop.f32.mrf.mxu3  ;;  %v4764_v48 = vpop.f32.mrf.mxu1 }
  0xf9   :  { %286 = vadd.xlane.f32.xlu0 %v4492_v22  ;;  %v730_v54 = vpop.f32.mrf.mxu0  ;;  %6209 = vst [vmem:[#allocation21_spill] sm:$0xff] %v4742_v17 }
  0xfa   :  { %v4766_v54 = vpop.f32.mrf.mxu2 }
 0x101   :  { %214 = vadd.xlane.f32.xlu0 %v4495_v23  ;;  %v4750_v23 = vunpack.c.l.bf16 %v4740_v53 }
 0x103   :  { %v230_v22 = vpop.xlane.xlu2 %229  ;;  %v224_v57 = vpop.xlane.xlu1 %223 }
 0x104   :  { %v972_v11 = vadd.f32 %v6131_v15, %v230_v22  ;;  %v218_v12 = vpop.xlane.xlu0 %217  ;;  %v970_v9 = vadd.f32 %v6134_v61, %v224_v57 }
 0x105   :  { %v968_v29 = vadd.f32 %v6132_v16, %v218_v12  ;;  %v4772_v12 = vpop.f32.mrf.mxu0 }
 0x106   :  { %v1100_v31 = vmul.f32 0.2, %v972_v11  ;;  %vm1036_vm4 = vcmp.ge.f32.partialorder %v972_v11, 0.0  ;;  %6211 = vst [vmem:[#allocation22_spill] sm:$0xff] %v4772_v12  ;;  %vm1034_vm13 = vcmp.ge.f32.partialorder %v970_v9, 0.0 }
 0x107   :  { %v1096_v62 = vmul.f32 0.2, %v968_v29  ;;  %vm1032_vm11 = vcmp.ge.f32.partialorder %v968_v29, 0.0 }
 0x108   :  { %v1164_v10 = vsel %vm1036_vm4, %v972_v11, %v1100_v31  ;;  %v778_v11 = vpop.f32.mrf.mxu3 }
 0x109   :  { %292 = vadd.xlane.f32.xlu0 %v4498_v25  ;;  %v1160_v24 = vsel %vm1032_vm11, %v968_v29, %v1096_v62  ;;  %v4762_v40 = vadd.f32 %v4750_v23, %v1164_v10  ;;  %v1098_v10 = vmul.f32 0.2, %v970_v9 }
 0x10a   :  { %v4770_v22 = vadd.f32 %v4750_v23, %v1160_v24 }
 0x10b   :  { %v248_v31 = vpop.xlane.xlu2 %247  ;;  %v242_v57 = vpop.xlane.xlu1 %241  ;;  %v1324_v25 = vsel %vm6212_vm2, %v4762_v40, -inf  ;;  %v1162_v17 = vsel %vm1034_vm13, %v970_v9, %v1098_v10 }
 0x10c   :  { %v978_v29 = vadd.f32 %v6133_v36, %v248_v31  ;;  %v236_v62 = vpop.xlane.xlu0 %235  ;;  %v1312_v63 = vsel %vm6213_vm8, %v4770_v22, -inf  ;;  %1325 = vmax.xlane.f32.xlu1 %v1324_v25  ;;  %v976_v36 = vadd.f32 %v6137_v1, %v242_v57  ;;  %v4801_v9 = vadd.f32 %v4750_v23, %v1162_v17  ;;  %vm6220_vm8 = vmmov %vm6210_vm0 }
 0x10d   :  { %v974_v24 = vadd.f32 %v6135_v37, %v236_v62  ;;  %1313 = vmax.xlane.f32.xlu2 %v1312_v63  ;;  %v682_v62 = vpop.f32.mrf.mxu1  ;;  %v698_v63 = vpop.f32.mrf.mxu2 }
 0x10e   :  { %v1106_v11 = vmul.f32 0.2, %v978_v29  ;;  %vm1042_vm6 = vcmp.ge.f32.partialorder %v978_v29, 0.0  ;;  %v794_v20 = vpop.f32.mrf.mxu0  ;;  %v1104_v10 = vmul.f32 0.2, %v976_v36  ;;  %vm1040_vm9 = vcmp.ge.f32.partialorder %v976_v36, 0.0 }
 0x10f   :  { %v1102_v15 = vmul.f32 0.2, %v974_v24  ;;  %vm1038_vm14 = vcmp.ge.f32.partialorder %v974_v24, 0.0  ;;  %v6216_v20 = vperm.slane %v4726_v28, 0  ;;  %v398_v63 = vld [vmem:[%s6119_s4 + $0x18] sm:$0x1] }
 0x110   :  { %v1170_v31 = vsel %vm1042_vm6, %v978_v29, %v1106_v11  ;;  %v4793_v12 = vpop.f32.mrf.mxu3  ;;  %v6138_v29 = vperm.slane %v4657_v58, 0  ;;  %v1318_v17 = vsel %vm6217_vm15, %v4801_v9, -inf  ;;  %3547 = vmatmul.msk.bf16.vlgmr.msra.gmra.mxu1 %vm6218_vm12, %v398_v63  ;;  %v6141_v63 = vperm.slane %v4627_v30, 0  ;;  %vm6221_vm6 = vmmov %vm6210_vm0 }
 0x111   :  { %298 = vadd.xlane.f32.xlu0 %v4501_v26  ;;  %v4788_v25 = vadd.f32 %v4750_v23, %v1170_v31  ;;  %v1166_v61 = vsel %vm1038_vm14, %v974_v24, %v1102_v15  ;;  %3789 = vmatpush.bf16.msra.mxu1 %v4187_v2  ;;  %vm6222_vm14 = vmmov %vm6210_vm0 }
 0x112   :  { %v4791_v37 = vadd.f32 %v4750_v23, %v1166_v61  ;;  %v6140_v61 = vperm.slane %v4724_v8, 0  ;;  %vm6225_vm15 = vmmov %vm6210_vm0 }
 0x113   :  { %v254_v11 = vpop.xlane.xlu2 %253  ;;  %v260_v16 = vpop.xlane.xlu1 %259  ;;  %v1342_v26 = vsel %vm6214_vm3, %v4788_v25, -inf  ;;  %vm6223_vm3 = vmmov %vm6210_vm0 }
 0x114   :  { %v182_v57 = vpop.xlane.xlu0 %181  ;;  %v1330_v15 = vsel %vm6215_vm5, %v4791_v37, -inf  ;;  %v982_v24 = vadd.f32 %v6216_v20, %v260_v16  ;;  %v980_v16 = vadd.f32 %v6140_v61, %v254_v11 }
 0x115   :  { %v956_v31 = vadd.f32 %v6138_v29, %v182_v57  ;;  %1343 = vmax.xlane.f32.xlu2 %v1342_v26  ;;  %1331 = vmax.xlane.f32.xlu1 %v1330_v15  ;;  %v1168_v26 = vsel %vm1040_vm9, %v976_v36, %v1104_v10  ;;  %v6139_v15 = vperm.slane %v4659_v59, 0  ;;  %v6142_v10 = vperm.slane %v4708_v27, 0  ;;  %vm6224_vm9 = vmmov %vm6210_vm0 }
 0x116   :  { %v1110_v20 = vmul.f32 0.2, %v982_v24  ;;  %vm1046_vm7 = vcmp.ge.f32.partialorder %v982_v24, 0.0  ;;  %v4821_v29 = vpop.f32.mrf.mxu0  ;;  %v4829_v36 = vadd.f32 %v4750_v23, %v1168_v26  ;;  %vm1044_vm11 = vcmp.ge.f32.partialorder %v980_v16, 0.0 }
 0x117   :  { %v1084_v62 = vmul.f32 0.2, %v956_v31  ;;  %vm1020_vm10 = vcmp.ge.f32.partialorder %v956_v31, 0.0 }
 0x118   :  { %v842_v19 = vpop.f32.mrf.mxu3 }
 0x119   :  { %1319 = vmax.xlane.f32.xlu0 %v1318_v17  ;;  %v1148_v57 = vsel %vm1020_vm10, %v956_v31, %v1084_v62  ;;  %v1108_v62 = vmul.f32 0.2, %v980_v16  ;;  %v1174_v17 = vsel %vm1046_vm7, %v982_v24, %v1110_v20  ;;  %v6143_v20 = vperm.slane %v4642_v39, 0  ;;  %vm6228_vm7 = vmmov %vm6210_vm0 }
 0x11a   :  { %v4819_v1 = vadd.f32 %v4750_v23, %v1148_v57  ;;  %v4837_v61 = vadd.f32 %v4750_v23, %v1174_v17 }
 0x11b   :  { %v194_v18 = vpop.xlane.xlu1 %193  ;;  %v188_v13 = vpop.xlane.xlu2 %187 }
 0x11c   :  { %v958_v11 = vadd.f32 %v6139_v15, %v188_v13  ;;  %v266_v31 = vpop.xlane.xlu0 %265  ;;  %v1276_v2 = vsel %vm6219_vm1, %v4819_v1, -inf  ;;  %v960_v19 = vadd.f32 %v6141_v63, %v194_v18  ;;  %v1336_v13 = vsel %vm6210_vm0, %v4829_v36, -inf }
 0x11d   :  { %1277 = vmax.xlane.f32.xlu1 %v1276_v2  ;;  %v984_v4 = vadd.f32 %v6142_v10, %v266_v31  ;;  %v1172_v18 = vsel %vm1044_vm11, %v980_v16, %v1108_v62  ;;  %v1354_v17 = vsel %vm6221_vm6, %v4837_v61, -inf }
 0x11e   :  { %v1086_v57 = vmul.f32 0.2, %v958_v11  ;;  %vm1022_vm4 = vcmp.ge.f32.partialorder %v958_v11, 0.0  ;;  %v1088_v26 = vmul.f32 0.2, %v960_v19  ;;  %vm1024_vm2 = vcmp.ge.f32.partialorder %v960_v19, 0.0  ;;  %v858_v24 = vpop.f32.mrf.mxu0 }
 0x11f   :  { %v4850_v31 = vadd.f32 %v4750_v23, %v1172_v18  ;;  %vm1048_vm13 = vcmp.ge.f32.partialorder %v984_v4, 0.0 }
 0x120   :  { %v1150_v15 = vsel %vm1022_vm4, %v958_v11, %v1086_v57  ;;  %v1152_v62 = vsel %vm1024_vm2, %v960_v19, %v1088_v26  ;;  %v6146_v26 = vperm.slane %v4684_v38, 0  ;;  %vm6230_vm4 = vmmov %vm6210_vm0 }
 0x121   :  { %1337 = vmax.xlane.f32.xlu0 %v1336_v13  ;;  %v4842_v3 = vadd.f32 %v4750_v23, %v1150_v15  ;;  %v6144_v15 = vperm.slane %v4716_v7, 0  ;;  %v1112_v13 = vmul.f32 0.2, %v984_v4  ;;  %v1348_v63 = vsel %vm6222_vm14, %v4850_v31, -inf  ;;  %vm6234_vm2 = vmmov %vm6210_vm0 }
 0x122   :  { %v4861_v18 = vadd.f32 %v4750_v23, %v1152_v62 }
 0x123   :  { %v272_v2 = vpop.xlane.xlu2 %271  ;;  %v1282_v11 = vsel %vm6220_vm8, %v4842_v3, -inf  ;;  %v206_v24 = vpop.xlane.xlu1 %205  ;;  %v1176_v19 = vsel %vm1048_vm13, %v984_v4, %v1112_v13  ;;  %vm6236_vm8 = vmmov %vm6210_vm0 }
 0x124   :  { %v200_v57 = vpop.xlane.xlu0 %199  ;;  %1283 = vmax.xlane.f32.xlu2 %v1282_v11  ;;  %v402_v11 = vld [vmem:[%s6119_s4 + $0x1c] sm:$0x1]  ;;  %v986_v10 = vadd.f32 %v6144_v15, %v272_v2  ;;  %v1288_v0 = vsel %vm6224_vm9, %v4861_v18, -inf  ;;  %v4872_v62 = vadd.f32 %v4750_v23, %v1176_v19  ;;  %v6147_v2 = vperm.slane %v4764_v48, 0  ;;  %vm6240_vm13 = vmmov %vm6210_vm0 }
 0x125   :  { %v962_v16 = vadd.f32 %v6143_v20, %v200_v57  ;;  %1355 = vmax.xlane.f32.xlu1 %v1354_v17  ;;  %3551 = vmatmul.msk.bf16.vlgmr.msrb.gmra.mxu1 %vm6223_vm3, %v402_v11  ;;  %v964_v11 = vadd.f32 %v6146_v26, %v206_v24  ;;  %vm6243_vm9 = vmmov %vm6210_vm0 }
 0x126   :  { %v1114_v60 = vmul.f32 0.2, %v986_v10  ;;  %vm1050_vm10 = vcmp.ge.f32.partialorder %v986_v10, 0.0 }
 0x127   :  { %v1090_v57 = vmul.f32 0.2, %v962_v16  ;;  %vm1026_vm5 = vcmp.ge.f32.partialorder %v962_v16, 0.0  ;;  %v1092_v15 = vmul.f32 0.2, %v964_v11  ;;  %vm1028_vm12 = vcmp.ge.f32.partialorder %v964_v11, 0.0 }
 0x128   :  { %v1178_v56 = vsel %vm1050_vm10, %v986_v10, %v1114_v60 }
 0x129   :  { %1349 = vmax.xlane.f32.xlu0 %v1348_v63  ;;  %v1154_v4 = vsel %vm1026_vm5, %v962_v16, %v1090_v57  ;;  %v1360_v63 = vsel %vm6225_vm15, %v4872_v62, -inf  ;;  %v4891_v16 = vadd.f32 %v4750_v23, %v1178_v56 }
 0x12a   :  { %v4880_v13 = vadd.f32 %v4750_v23, %v1154_v4  ;;  %v6229_v4 = vperm.slane %v4676_v14, 0 }
 0x12b   :  { %v4867_v17 = vpop.xlane.xlu2 %283  ;;  %v227_v52 = vpop.xlane.xlu1 %226  ;;  %v1366_v60 = vsel %vm6230_vm4, %v4891_v16, -inf  ;;  %vm6250_vm4 = vmmov %vm6210_vm0 }
 0x12c   :  { %v278_v20 = vpop.xlane.xlu0 %277  ;;  %6226 = vst [vmem:[#allocation23_spill] sm:$0xff] %v4880_v13  ;;  %v971_v51 = vadd.f32 %v6229_v4, %v227_v52 }
 0x12d   :  { %1289 = vmax.xlane.f32.xlu1 %v1288_v0  ;;  %v988_v19 = vadd.f32 %v6147_v2, %v278_v20  ;;  %v1294_v0 = vsel %vm6228_vm7, %v4880_v13, -inf  ;;  %v1156_v20 = vsel %vm1028_vm12, %v964_v11, %v1092_v15  ;;  %v4910_v15 = vunpack.c.h.bf16 %v4740_v53  ;;  %vm6246_vm7 = vmmov %vm6210_vm0 }
 0x12e   :  { %v4898_v10 = vadd.f32 %v4750_v23, %v1156_v20  ;;  %vm1035_vm11 = vcmp.ge.f32.partialorder %v971_v51, 0.0 }
 0x12f   :  { %v1116_v57 = vmul.f32 0.2, %v988_v19  ;;  %vm1052_vm1 = vcmp.ge.f32.partialorder %v988_v19, 0.0 }
 0x130   :  { %6231 = vst [vmem:[#allocation25_spill] sm:$0xff] %v4898_v10  ;;  %v1300_v52 = vsel %vm6210_vm0, %v4898_v10, -inf }
 0x131   :  { %1361 = vmax.xlane.f32.xlu0 %v1360_v63  ;;  %v1099_v63 = vmul.f32 0.2, %v971_v51  ;;  %v1180_v2 = vsel %vm1052_vm1, %v988_v19, %v1116_v57  ;;  %vm6247_vm1 = vmmov %vm6210_vm0 }
 0x132   :  { %v4907_v14 = vadd.f32 %v4750_v23, %v1180_v2 }
 0x133   :  { %v4884_v24 = vpop.xlane.xlu2 %211  ;;  %v239_v13 = vpop.xlane.xlu1 %238  ;;  %v1163_v11 = vsel %vm1035_vm11, %v971_v51, %v1099_v63 }
 0x134   :  { %v4886_v26 = vpop.xlane.xlu0 %337  ;;  %6233 = vst [vmem:[#allocation27_spill] sm:$0xff] %v4907_v14  ;;  %v1372_v19 = vsel %vm6234_vm2, %v4907_v14, -inf }
 0x135   :  { %6227 = vst [vmem:[#allocation24_spill] sm:$0xff] %v4886_v26  ;;  %1295 = vmax.xlane.f32.xlu1 %v1294_v0  ;;  %v4915_v0 = vadd.f32 %v4910_v15, %v1163_v11 }
 0x137   :  { %v1321_v20 = vsel %vm6236_vm8, %v4915_v0, -inf  ;;  %vm6252_vm8 = vmmov %vm6247_vm1 }
 0x139   :  { %1367 = vmax.xlane.f32.xlu0 %v1366_v60  ;;  %v6237_v60 = vperm.slane %v4662_v6, 0  ;;  %v6241_v6 = vperm.slane %v4696_v5, 0 }
 0x13b   :  { %v4900_v56 = vpop.xlane.xlu2 %289  ;;  %v185_v2 = vpop.xlane.xlu1 %184 }
 0x13c   :  { %v4902_v50 = vpop.xlane.xlu0 %343 }
 0x13d   :  { %6232 = vst [vmem:[#allocation26_spill] sm:$0xff] %v4902_v50  ;;  %1301 = vmax.xlane.f32.xlu1 %v1300_v52 }
 0x141   :  { %1373 = vmax.xlane.f32.xlu0 %v1372_v19  ;;  %v6238_v19 = vperm.slane %v4706_v21, 0 }
 0x143   :  { %v4917_v57 = vpop.xlane.xlu2 %295  ;;  %v975_v14 = vadd.f32 %v6238_v19, %v239_v13 }
 0x144   :  { %6235 = vst [vmem:[#allocation28_spill] sm:$0xff] %v4917_v57  ;;  %v221_v4 = vpop.xlane.xlu0 %220  ;;  %v6239_v57 = vperm.slane %v4704_v55, 0  ;;  %v6242_v55 = vperm.slane %v4657_v58, 0 }
 0x145   :  { %v969_v53 = vadd.f32 %v6237_v60, %v221_v4  ;;  %1322 = vmax.xlane.f32.xlu1 %v1321_v20  ;;  %v269_v60 = vpop.xlane.xlu1 %268  ;;  %vm1039_vm3 = vcmp.ge.f32.partialorder %v975_v14, 0.0 }
 0x146   :  { %v957_v13 = vadd.f32 %v6242_v55, %v185_v2 }
 0x147   :  { %v1097_v52 = vmul.f32 0.2, %v969_v53  ;;  %vm1033_vm6 = vcmp.ge.f32.partialorder %v969_v53, 0.0 }
 0x148   :  { %v1085_v58 = vmul.f32 0.2, %v957_v13  ;;  %vm1021_vm15 = vcmp.ge.f32.partialorder %v957_v13, 0.0 }
 0x149   :  { %v1161_v51 = vsel %vm1033_vm6, %v969_v53, %v1097_v52  ;;  %v1103_v53 = vmul.f32 0.2, %v975_v14  ;;  %vm6253_vm6 = vmmov %vm6247_vm1 }
 0x14a   :  { %v4924_v63 = vadd.f32 %v4910_v15, %v1161_v51 }
 0x14b   :  { %v233_v11 = vpop.xlane.xlu2 %232  ;;  %v1167_v19 = vsel %vm1039_vm3, %v975_v14, %v1103_v53  ;;  %v1149_v53 = vsel %vm1021_vm15, %v957_v13, %v1085_v58 }
 0x14c   :  { %v973_v10 = vadd.f32 %v6239_v57, %v233_v11  ;;  %v251_v49 = vpop.xlane.xlu0 %250  ;;  %v1315_v50 = vsel %vm6240_vm13, %v4924_v63, -inf  ;;  %v4947_v2 = vadd.f32 %v4910_v15, %v1167_v19  ;;  %vm6255_vm13 = vmmov %vm6247_vm1 }
 0x14d   :  { %v979_v4 = vadd.f32 %v6241_v6, %v251_v49  ;;  %1316 = vmax.xlane.f32.xlu0 %v1315_v50  ;;  %v6244_v49 = vperm.slane %v4688_v47, 0 }
 0x14e   :  { %v1101_v20 = vmul.f32 0.2, %v973_v10  ;;  %vm1037_vm14 = vcmp.ge.f32.partialorder %v973_v10, 0.0 }
 0x14f   :  { %v1107_v51 = vmul.f32 0.2, %v979_v4  ;;  %vm1043_vm5 = vcmp.ge.f32.partialorder %v979_v4, 0.0 }
 0x150   :  { %v1165_v52 = vsel %vm1037_vm14, %v973_v10, %v1101_v20  ;;  %v6245_v10 = vperm.slane %v4724_v8, 0 }
 0x151   :  { %v4935_v21 = vadd.f32 %v4910_v15, %v1165_v52  ;;  %v1171_v20 = vsel %vm1043_vm5, %v979_v4, %v1107_v51  ;;  %v6248_v51 = vperm.slane %v4708_v27, 0  ;;  %v4971_v27 = vadd.f32 %v4910_v15, %v1149_v53  ;;  %vm6258_vm5 = vmmov %vm6247_vm1 }
 0x152   :  { %v4950_v26 = vadd.f32 %v4910_v15, %v1171_v20  ;;  %v6251_v20 = vperm.slane %v4659_v59, 0 }
 0x153   :  { %v245_v57 = vpop.xlane.xlu2 %244  ;;  %v1327_v5 = vsel %vm6243_vm9, %v4935_v21, -inf  ;;  %vm6259_vm9 = vmmov %vm6247_vm1 }
 0x154   :  { %v977_v50 = vadd.f32 %v6244_v49, %v245_v57  ;;  %v257_v11 = vpop.xlane.xlu0 %256  ;;  %1328 = vmax.xlane.f32.xlu2 %v1327_v5  ;;  %v203_v57 = vpop.xlane.xlu1 %202  ;;  %v985_v5 = vadd.f32 %v6248_v51, %v269_v60  ;;  %v6249_v49 = vperm.slane %v4726_v28, 0  ;;  %v1345_v19 = vsel %vm6250_vm4, %v4950_v26, -inf }
 0x155   :  { %v981_v6 = vadd.f32 %v6245_v10, %v257_v11  ;;  %349 = vadd.xlane.f32.xlu0 %v4516_v32  ;;  %v1333_v32 = vsel %vm6246_vm7, %v4947_v2, -inf  ;;  %vm6262_vm7 = vmmov %vm6247_vm1 }
 0x156   :  { %v1105_v52 = vmul.f32 0.2, %v977_v50  ;;  %vm1041_vm10 = vcmp.ge.f32.partialorder %v977_v50, 0.0  ;;  %v1113_v28 = vmul.f32 0.2, %v985_v5  ;;  %vm1049_vm2 = vcmp.ge.f32.partialorder %v985_v5, 0.0 }
 0x157   :  { %v1109_v55 = vmul.f32 0.2, %v981_v6  ;;  %vm1045_vm12 = vcmp.ge.f32.partialorder %v981_v6, 0.0 }
 0x158   :  { %v1169_v47 = vsel %vm1041_vm10, %v977_v50, %v1105_v52 }
 0x159   :  { %v4953_v14 = vadd.f32 %v4910_v15, %v1169_v47  ;;  %v1173_v10 = vsel %vm1045_vm12, %v981_v6, %v1109_v55  ;;  %vm6261_vm12 = vmmov %vm6247_vm1 }
 0x15a   :  { %v4968_v13 = vadd.f32 %v4910_v15, %v1173_v10  ;;  %v6256_v10 = vperm.slane %v4716_v7, 0 }
 0x15b   :  { %v263_v8 = vpop.xlane.xlu2 %262  ;;  %v1339_v4 = vsel %vm6247_vm1, %v4953_v14, -inf }
 0x15c   :  { %v983_v50 = vadd.f32 %v6249_v49, %v263_v8  ;;  %v191_v11 = vpop.xlane.xlu0 %190  ;;  %1334 = vmax.xlane.f32.xlu2 %v1333_v32  ;;  %1340 = vmax.xlane.f32.xlu1 %v1339_v4  ;;  %v281_v6 = vpop.xlane.xlu1 %280  ;;  %v1351_v55 = vsel %vm6252_vm8, %v4968_v13, -inf  ;;  %v1279_v32 = vsel %vm6253_vm6, %v4971_v27, -inf  ;;  %v6254_v4 = vperm.slane %v4627_v30, 0 }
 0x15d   :  { %v959_v52 = vadd.f32 %v6251_v20, %v191_v11  ;;  %1346 = vmax.xlane.f32.xlu0 %v1345_v19  ;;  %v1177_v19 = vsel %vm1049_vm2, %v985_v5, %v1113_v28 }
 0x15e   :  { %v1111_v60 = vmul.f32 0.2, %v983_v50  ;;  %vm1047_vm0 = vcmp.ge.f32.partialorder %v983_v50, 0.0 }
 0x15f   :  { %v1087_v47 = vmul.f32 0.2, %v959_v52  ;;  %vm1023_vm11 = vcmp.ge.f32.partialorder %v959_v52, 0.0 }
 0x160   :  { %v1175_v11 = vsel %vm1047_vm0, %v983_v50, %v1111_v60  ;;  %v6260_v50 = vperm.slane %v4764_v48, 0  ;;  %vm6265_vm0 = vmmov %vm6250_vm4 }
 0x161   :  { %v1151_v58 = vsel %vm1023_vm11, %v959_v52, %v1087_v47  ;;  %v4987_v52 = vadd.f32 %v4910_v15, %v1175_v11  ;;  %v4990_v47 = vadd.f32 %v4910_v15, %v1177_v19  ;;  %vm6264_vm11 = vmmov %vm6250_vm4 }
 0x162   :  { %v4974_v8 = vadd.f32 %v4910_v15, %v1151_v58  ;;  %v989_v28 = vadd.f32 %v6260_v50, %v281_v6  ;;  %vm6266_vm2 = vmmov %vm6265_vm0 }
 0x163   :  { %v197_v59 = vpop.xlane.xlu2 %196  ;;  %v1357_v5 = vsel %vm6258_vm5, %v4987_v52, -inf  ;;  %v1363_v7 = vsel %vm6259_vm9, %v4990_v47, -inf  ;;  %vm6267_vm8 = vmmov %vm6265_vm0 }
 0x164   :  { %v961_v53 = vadd.f32 %v6254_v4, %v197_v59  ;;  %v275_v51 = vpop.xlane.xlu0 %274  ;;  %v1285_v49 = vsel %vm6255_vm13, %v4974_v8, -inf  ;;  %1352 = vmax.xlane.f32.xlu1 %v1351_v55  ;;  %1280 = vmax.xlane.f32.xlu2 %v1279_v32  ;;  %v6257_v59 = vperm.slane %v4642_v39, 0  ;;  %v1117_v11 = vmul.f32 0.2, %v989_v28  ;;  %vm6268_vm6 = vmmov %vm6265_vm0 }
 0x165   :  { %v987_v20 = vadd.f32 %v6256_v10, %v275_v51  ;;  %1286 = vmax.xlane.f32.xlu0 %v1285_v49  ;;  %v5002_v51 = vpop.xlane.xlu1 %340  ;;  %vm1053_vm15 = vcmp.ge.f32.partialorder %v989_v28, 0.0  ;;  %vm6269_vm13 = vmmov %vm6265_vm0 }
 0x166   :  { %v1089_v30 = vmul.f32 0.2, %v961_v53  ;;  %vm1025_vm14 = vcmp.ge.f32.partialorder %v961_v53, 0.0  ;;  %v963_v55 = vadd.f32 %v6257_v59, %v203_v57  ;;  %vm6274_vm5 = vmmov %vm6265_vm0 }
 0x167   :  { %v1115_v58 = vmul.f32 0.2, %v987_v20  ;;  %vm1051_vm3 = vcmp.ge.f32.partialorder %v987_v20, 0.0  ;;  %vm6276_vm9 = vmmov %vm6265_vm0 }
 0x168   :  { %v1153_v32 = vsel %vm1025_vm14, %v961_v53, %v1089_v30  ;;  %v1091_v49 = vmul.f32 0.2, %v963_v55  ;;  %vm1027_vm10 = vcmp.ge.f32.partialorder %v963_v55, 0.0  ;;  %v6263_v53 = vperm.slane %v4684_v38, 0  ;;  %vm6271_vm14 = vmmov %vm6265_vm0 }
 0x169   :  { %v1179_v4 = vsel %vm1051_vm3, %v987_v20, %v1115_v58  ;;  %v5005_v39 = vadd.f32 %v4910_v15, %v1153_v32  ;;  %v1181_v58 = vsel %vm1053_vm15, %v989_v28, %v1117_v11  ;;  %v395_v28 = vld [vmem:[%s6119_s4 + $0x15] sm:$0x1]  ;;  %vm6272_vm3 = vmmov %vm6265_vm0 }
 0x16a   :  { %v5008_v57 = vadd.f32 %v4910_v15, %v1179_v4  ;;  %v1155_v30 = vsel %vm1027_vm10, %v963_v55, %v1091_v49  ;;  %3544 = vmatmul.msk.bf16.vlgmr.msra.gmra.mxu2 %vm6265_vm0, %v395_v28  ;;  %v5049_v28 = vpop.f32.mrf.mxu1  ;;  %vm6277_vm10 = vmmov %vm6265_vm0 }
 0x16b   :  { %v209_v19 = vpop.xlane.xlu2 %208  ;;  %v1291_v48 = vsel %vm6261_vm12, %v5005_v39, -inf  ;;  %vm6280_vm12 = vmmov %vm6265_vm0 }
 0x16c   :  { %v5000_v60 = vpop.xlane.xlu0 %286  ;;  %1358 = vmax.xlane.f32.xlu2 %v1357_v5  ;;  %1364 = vmax.xlane.f32.xlu1 %v1363_v7  ;;  %v1369_v6 = vsel %vm6262_vm7, %v5008_v57, -inf  ;;  %v965_v10 = vadd.f32 %v6263_v53, %v209_v19  ;;  %v5021_v5 = vadd.f32 %v4910_v15, %v1155_v30  ;;  %v5024_v7 = vadd.f32 %v4910_v15, %v1181_v58  ;;  %v4073_v19 = vld [vmem:[%s6116_s1] sm:$0xff]  ;;  %vm6281_vm7 = vmmov %vm6265_vm0 }
 0x16d   :  { %v5018_v59 = vpop.xlane.xlu1 %346  ;;  %886 = vmatpush.bf16.msra.mxu2 %v4073_v19 }
 0x16e   :  { %v1093_v50 = vmul.f32 0.2, %v965_v10  ;;  %vm1029_vm1 = vcmp.ge.f32.partialorder %v965_v10, 0.0  ;;  %v1297_v38 = vsel %vm6250_vm4, %v5021_v5, -inf  ;;  %v1375_v32 = vsel %vm6264_vm11, %v5024_v7, -inf  ;;  %vm6285_vm4 = vmmov %vm6265_vm0 }
 0x16f   :  { %vm6286_vm11 = vmmov %vm6265_vm0 }
 0x170   :  { %v1157_v55 = vsel %vm1029_vm1, %v965_v10, %v1093_v50  ;;  %vm6284_vm1 = vmmov %vm6265_vm0 }
 0x171   :  { %v5037_v11 = vadd.f32 %v4910_v15, %v1157_v55 }
 0x173   :  { %v1303_v58 = vsel %vm6266_vm2, %v5037_v11, -inf  ;;  %vm6287_vm2 = vmmov %vm6284_vm1 }
 0x174   :  { %v5016_v20 = vpop.xlane.xlu0 %214  ;;  %1292 = vmax.xlane.f32.xlu2 %v1291_v48  ;;  %1370 = vmax.xlane.f32.xlu1 %v1369_v6 }
 0x17c   :  { %v5030_v4 = vpop.xlane.xlu0 %292  ;;  %1298 = vmax.xlane.f32.xlu2 %v1297_v38  ;;  %1376 = vmax.xlane.f32.xlu1 %v1375_v32 }
 0x17f   :  { %v1326_v49 = vpop.xlane.xlu1 %1325 }
 0x180   :  { %v1314_v48 = vpop.xlane.xlu2 %1313  ;;  %v1484_v6 = vsub.f32 %v4762_v40, %v1326_v49 }
 0x181   :  { %v1480_v53 = vsub.f32 %v4770_v22, %v1314_v48 }
 0x182   :  { %v1564_v10 = vmul.f32 1.442695, %v1484_v6 }
 0x183   :  { %v1556_v30 = vmul.f32 1.442695, %v1480_v53 }
 0x184   :  { %3801 = vpow2.f32 %v1564_v10  ;;  %v5046_v50 = vpop.xlane.xlu0 %298  ;;  %1304 = vmax.xlane.f32.xlu2 %v1303_v58  ;;  %v4074_v58 = vld [vmem:[%s6115_s0] sm:$0xff] }
 0x185   :  { %3803 = vpow2.f32 %v1556_v30 }
 0x188   :  { %v1344_v38 = vpop.xlane.xlu2 %1343  ;;  %v1332_v32 = vpop.xlane.xlu1 %1331 }
 0x189   :  { %v1490_v55 = vsub.f32 %v4788_v25, %v1344_v38  ;;  %v399_v25 = vld [vmem:[%s6119_s4 + $0x19] sm:$0x1]  ;;  %v1486_v10 = vsub.f32 %v4791_v37, %v1332_v32 }
 0x18a   :  { %v5051_v19 = vpop.eup %3801  ;;  %3548 = vmatmul.msk.bf16.vlgmr.msrb.gmra.mxu2 %vm6269_vm13, %v399_v25  ;;  %vm6291_vm13 = vmmov %vm6284_vm1 }
 0x18b   :  { %v5053_v40 = vpop.eup %3803  ;;  %v1576_v22 = vmul.f32 1.442695, %v1490_v55  ;;  %v1708_v49 = vsel %vm6267_vm8, %v5051_v19, 0.0  ;;  %3790 = vmatpush.bf16.msrb.mxu2 %v4074_v58  ;;  %v746_v55 = vpop.f32.mrf.mxu1  ;;  %vm6288_vm8 = vmmov %vm6284_vm1 }
 0x18c   :  { %v1320_v48 = vpop.xlane.xlu0 %1319  ;;  %v1696_v6 = vsel %vm6268_vm6, %v5053_v40, 0.0  ;;  %1709 = vadd.xlane.f32.xlu1 %v1708_v49  ;;  %vm6290_vm6 = vmmov %vm6284_vm1 }
 0x18d   :  { %3805 = vpow2.f32 %v1576_v22  ;;  %v1482_v53 = vsub.f32 %v4801_v9, %v1320_v48  ;;  %1697 = vadd.xlane.f32.xlu0 %v1696_v6  ;;  %v1568_v9 = vmul.f32 1.442695, %v1486_v10 }
 0x18f   :  { %v1560_v30 = vmul.f32 1.442695, %v1482_v53 }
 0x190   :  { %v1278_v38 = vpop.xlane.xlu1 %1277 }
 0x191   :  { %3807 = vpow2.f32 %v1560_v30  ;;  %v1468_v53 = vsub.f32 %v4819_v1, %v1278_v38  ;;  %v6153_v38 = vperm.slane %v4686_v45, 0 }
 0x192   :  { %3809 = vpow2.f32 %v1568_v9  ;;  %v403_v9 = vld [vmem:[%s6119_s4 + $0x1d] sm:$0x1] }
 0x193   :  { %v5068_v22 = vpop.eup %3805  ;;  %v5078_v10 = vpop.f32.mrf.mxu1  ;;  %v1532_v58 = vmul.f32 1.442695, %v1468_v53 }
 0x194   :  { %6270 = vst [vmem:[#allocation29_spill] sm:$0xff] %v5068_v22  ;;  %v1338_v49 = vpop.xlane.xlu0 %1337  ;;  %v1726_v48 = vsel %vm6271_vm14, %v5068_v22, 0.0  ;;  %vm6292_vm14 = vmmov %vm6284_vm1 }
 0x195   :  { %v1488_v6 = vsub.f32 %v4829_v36, %v1338_v49  ;;  %1727 = vadd.xlane.f32.xlu1 %v1726_v48 }
 0x197   :  { %v5073_v37 = vpop.eup %3807  ;;  %v1572_v32 = vmul.f32 1.442695, %v1488_v6  ;;  %v1284_v36 = vpop.xlane.xlu2 %1283 }
 0x198   :  { %v1356_v25 = vpop.xlane.xlu1 %1355  ;;  %v1702_v30 = vsel %vm6272_vm3, %v5073_v37, 0.0  ;;  %v5080_v22 = vpop.eup %3809 }
 0x199   :  { %3811 = vpow2.f32 %v1572_v32  ;;  %1703 = vadd.xlane.f32.xlu2 %v1702_v30  ;;  %6273 = vst [vmem:[#allocation30_spill] sm:$0xff] %v5080_v22  ;;  %v1494_v48 = vsub.f32 %v4837_v61, %v1356_v25  ;;  %v1470_v32 = vsub.f32 %v4842_v3, %v1284_v36  ;;  %v1714_v30 = vsel %vm6277_vm10, %v5080_v22, 0.0  ;;  %vm6294_vm10 = vmmov %vm6284_vm1 }
 0x19a   :  { %3552 = vmatmul.msk.bf16.vlgmr.msra.gmra.mxu2 %vm6274_vm5, %v403_v9  ;;  %3813 = vpow2.f32 %v1532_v58 }
 0x19b   :  { %v810_v9 = vpop.f32.mrf.mxu1  ;;  %v1584_v61 = vmul.f32 1.442695, %v1494_v48  ;;  %v1536_v25 = vmul.f32 1.442695, %v1470_v32 }
 0x19c   :  { %v1350_v55 = vpop.xlane.xlu0 %1349 }
 0x19d   :  { %v1492_v49 = vsub.f32 %v4850_v31, %v1350_v55  ;;  %v966_v55 = vadd.f32 %v6153_v38, %v4884_v24 }
 0x19f   :  { %v5087_v1 = vpop.eup %3811  ;;  %v1580_v6 = vmul.f32 1.442695, %v1492_v49  ;;  %v1094_v3 = vmul.f32 0.2, %v966_v55  ;;  %vm1030_vm15 = vcmp.ge.f32.partialorder %v966_v55, 0.0 }
 0x1a0   :  { %6275 = vst [vmem:[#allocation31_spill] sm:$0xff] %v5087_v1  ;;  %v1290_v53 = vpop.xlane.xlu1 %1289  ;;  %v1720_v31 = vsel %vm6276_vm9, %v5087_v1, 0.0  ;;  %v5101_v36 = vpop.eup %3813 }
 0x1a1   :  { %3815 = vpow2.f32 %v1580_v6  ;;  %1721 = vadd.xlane.f32.xlu0 %v1720_v31  ;;  %1715 = vadd.xlane.f32.xlu2 %v1714_v30  ;;  %6278 = vst [vmem:[#allocation32_spill] sm:$0xff] %v5101_v36  ;;  %v1660_v48 = vsel %vm6281_vm7, %v5101_v36, 0.0  ;;  %v1158_v6 = vsel %vm1030_vm15, %v966_v55, %v1094_v3  ;;  %vm6296_vm7 = vmmov %vm6284_vm1 }
 0x1a2   :  { %3817 = vpow2.f32 %v1584_v61  ;;  %v5115_v31 = vadd.f32 %v4750_v23, %v1158_v6 }
 0x1a3   :  { %3819 = vpow2.f32 %v1536_v25  ;;  %v5112_v32 = vpop.f32.mrf.mxu1  ;;  %v941_v25 = vperm.slane %v4766_v54, 0  ;;  %v1472_v54 = vsub.f32 %v4861_v18, %v1290_v53 }
 0x1a4   :  { %v5099_v58 = vpop.xlane.xlu0 %1361 }
 0x1a5   :  { %v991_v6 = vadd.f32 %v941_v25, %v5000_v60 }
 0x1a7   :  { %v5103_v49 = vpop.eup %3815  ;;  %v1119_v38 = vmul.f32 0.2, %v991_v6  ;;  %vm1055_vm0 = vcmp.ge.f32.partialorder %v991_v6, 0.0 }
 0x1a8   :  { %6279 = vst [vmem:[#allocation33_spill] sm:$0xff] %v5103_v49  ;;  %v5105_v1 = vpop.xlane.xlu1 %1295  ;;  %v1732_v24 = vsel %vm6280_vm12, %v5103_v49, 0.0  ;;  %v5117_v30 = vpop.eup %3817  ;;  %vm6295_vm12 = vmmov %vm6284_vm1 }
 0x1a9   :  { %304 = vadd.xlane.f32.xlu0 %v4519_v33  ;;  %1733 = vadd.xlane.f32.xlu1 %v1732_v24  ;;  %6282 = vst [vmem:[#allocation34_spill] sm:$0xff] %v5117_v30  ;;  %v5119_v9 = vpop.eup %3819  ;;  %v1306_v24 = vsel %vm6284_vm1, %v5115_v31, -inf  ;;  %v1738_v55 = vsel %vm6285_vm4, %v5117_v30, 0.0  ;;  %vm6297_vm4 = vmmov %vm6287_vm2 }
 0x1aa   :  { %1661 = vadd.xlane.f32.xlu2 %v1660_v48  ;;  %6283 = vst [vmem:[#allocation35_spill] sm:$0xff] %v5119_v9  ;;  %v1666_v3 = vsel %vm6286_vm11, %v5119_v9, 0.0  ;;  %vm6298_vm11 = vmmov %vm6287_vm2  ;;  %v6348_v9 = vld [vmem:[#allocation18_spill] sm:$0xff] }
 0x1ab   :  { %v874_v48 = vpop.f32.mrf.mxu1 }
 0x1ac   :  { %v5121_v61 = vpop.xlane.xlu0 %1367 }
 0x1b0   :  { %v5124_v33 = vpop.xlane.xlu1 %1301 }
 0x1b1   :  { %1307 = vmax.xlane.f32.xlu0 %v1306_v24  ;;  %1739 = vadd.xlane.f32.xlu1 %v1738_v55  ;;  %v1183_v24 = vsel %vm1055_vm0, %v991_v6, %v1119_v38  ;;  %v1540_v55 = vmul.f32 1.442695, %v1472_v54  ;;  %v942_v54 = vperm.slane %v4728_v46, 0  ;;  %vm6299_vm0 = vmmov %vm6287_vm2 }
 0x1b2   :  { %1667 = vadd.xlane.f32.xlu2 %v1666_v3  ;;  %v5140_v60 = vadd.f32 %v4910_v15, %v1183_v24  ;;  %v990_v24 = vadd.f32 %v941_v25, %v4867_v17 }
 0x1b4   :  { %v5134_v49 = vpop.xlane.xlu0 %1373  ;;  %v1381_v53 = vsel %vm6287_vm2, %v5140_v60, -inf  ;;  %vm1054_vm5 = vcmp.ge.f32.partialorder %v990_v24, 0.0  ;;  %vm6302_vm2 = vmmov %vm6299_vm0 }
 0x1b8   :  { %v1323_v36 = vpop.xlane.xlu1 %1322 }
 0x1b9   :  { %v1483_v22 = vsub.f32 %v4915_v0, %v1323_v36  ;;  %319 = vadd.xlane.f32.xlu0 %v4522_v34  ;;  %v950_v36 = vperm.slane %v4793_v12, 0  ;;  %v6308_v12 = vld [vmem:[#allocation8_spill] sm:$0xff] }
 0x1ba   :  { %301 = vadd.xlane.f32.xlu2 %v4525_v35 }
 0x1bb   :  { %v1562_v30 = vmul.f32 1.442695, %v1483_v22  ;;  %v404_v22 = vld [vmem:[%s6119_s4 + $0x1e] sm:$0x1]  ;;  %v1009_v48 = vadd.f32 %v950_v36, %v5002_v51 }
 0x1bc   :  { %3553 = vmatmul.msk.bf16.vlgmr.msrb.gmra.mxu3 %vm6290_vm6, %v404_v22  ;;  %vm6304_vm6 = vmmov %vm6299_vm0 }
 0x1bd   :  { %3821 = vpow2.f32 %v1562_v30  ;;  %vm1073_vm3 = vcmp.ge.f32.partialorder %v1009_v48, 0.0 }
 0x1be   :  { %3823 = vpow2.f32 %v1540_v55 }
 0x1c0   :  { %v1317_v3 = vpop.xlane.xlu0 %1316 }
 0x1c1   :  { %v1481_v18 = vsub.f32 %v4924_v63, %v1317_v3  ;;  %v993_v3 = vadd.f32 %v942_v54, %v5030_v4  ;;  %v6293_v4 = vperm.slane %v4686_v45, 0 }
 0x1c2   :  { %1382 = vmax.xlane.f32.xlu2 %v1381_v53  ;;  %v1118_v53 = vmul.f32 0.2, %v990_v24 }
 0x1c3   :  { %v5145_v0 = vpop.eup %3821  ;;  %v1558_v34 = vmul.f32 1.442695, %v1481_v18  ;;  %v1137_v18 = vmul.f32 0.2, %v1009_v48  ;;  %vm1057_vm9 = vcmp.ge.f32.partialorder %v993_v3, 0.0 }
 0x1c4   :  { %v1705_v35 = vsel %vm6288_vm8, %v5145_v0, 0.0  ;;  %v5152_v38 = vpop.eup %3823  ;;  %v1182_v22 = vsel %vm1054_vm5, %v990_v24, %v1118_v53  ;;  %vm6303_vm8 = vmmov %vm6299_vm0 }
 0x1c5   :  { %3825 = vpow2.f32 %v1558_v34  ;;  %1706 = vadd.xlane.f32.xlu0 %v1705_v35  ;;  %6289 = vst [vmem:[#allocation36_spill] sm:$0xff] %v5152_v38  ;;  %v1672_v30 = vsel %vm6291_vm13, %v5152_v38, 0.0  ;;  %v1121_v35 = vmul.f32 0.2, %v993_v3  ;;  %v1201_v46 = vsel %vm1073_vm3, %v1009_v48, %v1137_v18  ;;  %vm6307_vm13 = vmmov %vm6299_vm0 }
 0x1c6   :  { %vm6314_vm5 = vmmov %vm6299_vm0 }
 0x1c7   :  { %v1329_v63 = vpop.xlane.xlu2 %1328 }
 0x1c8   :  { %v1485_v51 = vsub.f32 %v4935_v21, %v1329_v63  ;;  %v5178_v21 = vadd.f32 %v4910_v15, %v1201_v46  ;;  %v1185_v63 = vsel %vm1057_vm9, %v993_v3, %v1121_v35  ;;  %vm6315_vm9 = vmmov %vm6299_vm0 }
 0x1ca   :  { %1673 = vadd.xlane.f32.xlu2 %v1672_v30  ;;  %v1566_v25 = vmul.f32 1.442695, %v1485_v51  ;;  %v1435_v45 = vsel %vm6294_vm10, %v5178_v21, -inf }
 0x1cb   :  { %v5161_v6 = vpop.eup %3825 }
 0x1cc   :  { %v1699_v55 = vsel %vm6292_vm14, %v5161_v6, 0.0  ;;  %3827 = vpow2.f32 %v1566_v25 }
 0x1cd   :  { %1700 = vadd.xlane.f32.xlu1 %v1699_v55  ;;  %358 = vadd.xlane.f32.xlu0 %v4540_v41  ;;  %v967_v41 = vadd.f32 %v6293_v4, %v5016_v20  ;;  %v1498_v20 = vsub.f32 %v4891_v16, %v5121_v61  ;;  %v6159_v4 = vperm.slane %v4821_v29, 0 }
 0x1cf   :  { %v1335_v34 = vpop.xlane.xlu2 %1334  ;;  %v1095_v48 = vmul.f32 0.2, %v967_v41  ;;  %vm1031_vm15 = vcmp.ge.f32.partialorder %v967_v41, 0.0  ;;  %v1592_v18 = vmul.f32 1.442695, %v1498_v20 }
 0x1d0   :  { %v1487_v17 = vsub.f32 %v4947_v2, %v1335_v34  ;;  %v5184_v2 = vadd.f32 %v4910_v15, %v1185_v63  ;;  %v1341_v63 = vpop.xlane.xlu1 %1340 }
 0x1d2   :  { %355 = vadd.xlane.f32.xlu2 %v4543_v42  ;;  %v1570_v30 = vmul.f32 1.442695, %v1487_v17  ;;  %v5181_v42 = vadd.f32 %v4750_v23, %v1182_v22  ;;  %v1387_v3 = vsel %vm6296_vm7, %v5184_v2, -inf  ;;  %vm6324_vm7 = vmmov %vm6299_vm0 }
 0x1d4   :  { %3829 = vpow2.f32 %v1570_v30  ;;  %v1378_v55 = vsel %vm6295_vm12, %v5181_v42, -inf  ;;  %vm6323_vm12 = vmmov %vm6299_vm0 }
 0x1d5   :  { %352 = vadd.xlane.f32.xlu1 %v4546_v43  ;;  %307 = vadd.xlane.f32.xlu0 %v4549_v44  ;;  %v992_v43 = vadd.f32 %v942_v54, %v4900_v56  ;;  %v1496_v44 = vsub.f32 %v4872_v62, %v5099_v58  ;;  %v1159_v56 = vsel %vm1031_vm15, %v967_v41, %v1095_v48  ;;  %v5199_v54 = vpop.eup %3827  ;;  %vm6322_vm15 = vmmov %vm6299_vm0 }
 0x1d6   :  { %v5202_v16 = vadd.f32 %v4910_v15, %v1159_v56  ;;  %v1711_v53 = vsel %vm6297_vm4, %v5199_v54, 0.0  ;;  %v405_v56 = vld [vmem:[%s6119_s4 + $0x1f] sm:$0x1]  ;;  %vm6327_vm4 = vmmov %vm6299_vm0 }
 0x1d7   :  { %v5193_v24 = vpop.xlane.xlu2 %1280  ;;  %v1120_v62 = vmul.f32 0.2, %v992_v43  ;;  %v1588_v58 = vmul.f32 1.442695, %v1496_v44  ;;  %vm1056_vm1 = vcmp.ge.f32.partialorder %v992_v43, 0.0  ;;  %v6306_v44 = vld [vmem:[#allocation26_spill] sm:$0xff]  ;;  %3554 = vmatmul.msk.bf16.vlgmr.msrb.gmra.mxu0 %vm6307_vm13, %v405_v56  ;;  %vm6340_vm13 = vmmov %vm6299_vm0 }
 0x1d8   :  { %v1309_v34 = vsel %vm6298_vm11, %v5202_v16, -inf  ;;  %v1010_v20 = vadd.f32 %v6159_v4, %v6306_v44  ;;  %v6312_v44 = vld [vmem:[#allocation25_spill] sm:$0xff]  ;;  %v6319_v4 = vld [vmem:[#allocation14_spill] sm:$0xff]  ;;  %vm6328_vm11 = vmmov %vm6299_vm0 }
 0x1d9   :  { %3831 = vpow2.f32 %v1588_v58  ;;  %v1184_v51 = vsel %vm1056_vm1, %v992_v43, %v1120_v62  ;;  %v1476_v56 = vsub.f32 %v6312_v44, %v5124_v33  ;;  %v6316_v44 = vld [vmem:[#allocation23_spill] sm:$0xff]  ;;  %vm6326_vm1 = vmmov %vm6299_vm0 }
 0x1da   :  { %1436 = vmax.xlane.f32.xlu2 %v1435_v45  ;;  %v5204_v61 = vpop.eup %3829  ;;  %3833 = vpow2.f32 %v1592_v18  ;;  %v5213_v46 = vadd.f32 %v4750_v23, %v1184_v51  ;;  %v6305_v45 = vld [vmem:[#allocation24_spill] sm:$0xff]  ;;  %v1138_v58 = vmul.f32 0.2, %v1010_v20  ;;  %vm1074_vm3 = vcmp.ge.f32.partialorder %v1010_v20, 0.0  ;;  %v6309_v18 = vld [vmem:[#allocation9_spill] sm:$0xff] }
 0x1db   :  { %v1717_v35 = vsel %vm6299_vm0, %v5204_v61, 0.0  ;;  %v1008_v43 = vadd.f32 %v950_v36, %v6305_v45  ;;  %v5243_v36 = vpop.xlane.xlu1 %1352 }
 0x1dc   :  { %v1384_v41 = vsel %vm6302_vm2, %v5213_v46, -inf }
 0x1dd   :  { %1379 = vmax.xlane.f32.xlu1 %v1378_v55  ;;  %1388 = vmax.xlane.f32.xlu0 %v1387_v3  ;;  %v5234_v55 = vpop.xlane.xlu0 %349  ;;  %v1136_v62 = vmul.f32 0.2, %v1008_v43  ;;  %vm1072_vm14 = vcmp.ge.f32.partialorder %v1008_v43, 0.0 }
 0x1df   :  { %v5215_v17 = vpop.xlane.xlu2 %1358  ;;  %v5217_v25 = vpop.eup %3831  ;;  %v1200_v51 = vsel %vm1072_vm14, %v1008_v43, %v1136_v62  ;;  %v6313_v43 = vld [vmem:[#allocation11_spill] sm:$0xff]  ;;  %vm6341_vm14 = vmmov %vm6299_vm0 }
 0x1e0   :  { %6300 = vst [vmem:[#allocation37_spill] sm:$0xff] %v5217_v25  ;;  %v5219_v22 = vpop.eup %3833  ;;  %v1744_v30 = vsel %vm6303_vm8, %v5217_v25, 0.0  ;;  %vm6339_vm8 = vmmov %vm6299_vm0 }
 0x1e1   :  { %6301 = vst [vmem:[#allocation38_spill] sm:$0xff] %v5219_v22  ;;  %v1750_v48 = vsel %vm6304_vm6, %v5219_v22, 0.0 }
 0x1e2   :  { %1712 = vadd.xlane.f32.xlu2 %v1711_v53  ;;  %v6310_v53 = vld [vmem:[#allocation10_spill] sm:$0xff] }
 0x1e5   :  { %1310 = vmax.xlane.f32.xlu1 %v1309_v34  ;;  %1718 = vadd.xlane.f32.xlu0 %v1717_v35  ;;  %v1202_v34 = vsel %vm1074_vm3, %v1010_v20, %v1138_v58  ;;  %v6311_v35 = vld [vmem:[#allocation20_spill] sm:$0xff]  ;;  %v1489_v20 = vsub.f32 %v4953_v14, %v1341_v63  ;;  %vm6344_vm3 = vmmov %vm6299_vm0 }
 0x1e6   :  { %v6317_v14 = vld [vmem:[#allocation12_spill] sm:$0xff] }
 0x1e7   :  { %v5236_v3 = vpop.xlane.xlu2 %1292 }
 0x1ea   :  { %1385 = vmax.xlane.f32.xlu2 %v1384_v41  ;;  %v6158_v41 = vperm.slane %v6311_v35, 0 }
 0x1ec   :  { %v995_v45 = vadd.f32 %v6158_v41, %v5046_v50  ;;  %v1548_v50 = vmul.f32 1.442695, %v1476_v56 }
 0x1ed   :  { %1745 = vadd.xlane.f32.xlu1 %v1744_v30  ;;  %1751 = vadd.xlane.f32.xlu0 %v1750_v48  ;;  %v5249_v30 = vadd.f32 %v4750_v23, %v1200_v51  ;;  %v5252_v48 = vadd.f32 %v4750_v23, %v1202_v34  ;;  %v1574_v51 = vmul.f32 1.442695, %v1489_v20  ;;  %v5267_v34 = vpop.xlane.xlu1 %1364  ;;  %v6318_v20 = vld [vmem:[#allocation13_spill] sm:$0xff] }
 0x1ee   :  { %vm1059_vm10 = vcmp.ge.f32.partialorder %v995_v45, 0.0  ;;  %3835 = vpow2.f32 %v1548_v50 }
 0x1ef   :  { %v1432_v62 = vsel %vm6314_vm5, %v5249_v30, -inf  ;;  %v1438_v58 = vsel %vm6315_vm9, %v5252_v48, -inf  ;;  %3837 = vpow2.f32 %v1574_v51  ;;  %vm6347_vm9 = vmmov %vm6299_vm0 }
 0x1f2   :  { %325 = vadd.xlane.f32.xlu2 %v6308_v12  ;;  %v1347_v12 = vpop.xlane.xlu0 %1346 }
 0x1f3   :  { %v1491_v33 = vsub.f32 %v4950_v26, %v1347_v12 }
 0x1f5   :  { %322 = vadd.xlane.f32.xlu1 %v6309_v18  ;;  %328 = vadd.xlane.f32.xlu0 %v6310_v53  ;;  %v5259_v18 = vpop.xlane.xlu2 %1298  ;;  %v1123_v53 = vmul.f32 0.2, %v995_v45  ;;  %v5290_v51 = vpop.xlane.xlu1 %1370 }
 0x1f7   :  { %v1187_v63 = vsel %vm1059_vm10, %v995_v45, %v1123_v53  ;;  %v5284_v45 = vpop.eup %3835  ;;  %v6321_v53 = vld [vmem:[#allocation27_spill] sm:$0xff]  ;;  %vm6350_vm10 = vmmov %vm6299_vm0 }
 0x1f8   :  { %v5280_v26 = vadd.f32 %v4910_v15, %v1187_v63  ;;  %6320 = vst [vmem:[#allocation24_spill] sm:$0xff] %v5284_v45 }
 0x1fa   :  { %364 = vadd.xlane.f32.xlu2 %v6313_v43  ;;  %v1474_v43 = vsub.f32 %v6316_v44, %v5105_v1  ;;  %v1287_v41 = vpop.xlane.xlu0 %1286  ;;  %v5282_v1 = vpop.f32.mrf.mxu2 }
 0x1fc   :  { %v1544_v12 = vmul.f32 1.442695, %v1474_v43 }
 0x1fd   :  { %1433 = vmax.xlane.f32.xlu1 %v1432_v62  ;;  %1439 = vmax.xlane.f32.xlu0 %v1438_v58  ;;  %v1469_v62 = vsub.f32 %v4971_v27, %v5193_v24  ;;  %v1578_v58 = vmul.f32 1.442695, %v1491_v33  ;;  %v5275_v56 = vpop.xlane.xlu2 %1304  ;;  %v1500_v27 = vsub.f32 %v6321_v53, %v5134_v49  ;;  %v5288_v24 = vpop.eup %3837  ;;  %v1471_v53 = vsub.f32 %v4974_v8, %v1287_v41 }
 0x1fe   :  { %v1723_v49 = vsel %vm6324_vm7, %v5288_v24, 0.0  ;;  %vm6355_vm7 = vmmov %vm6299_vm0 }
 0x1ff   :  { %v1534_v50 = vmul.f32 1.442695, %v1469_v62  ;;  %3839 = vpow2.f32 %v1578_v58  ;;  %v1596_v33 = vmul.f32 1.442695, %v1500_v27  ;;  %v5313_v27 = vpop.xlane.xlu1 %1376 }
 0x200   :  { %3841 = vpow2.f32 %v1544_v12 }
 0x201   :  { %3843 = vpow2.f32 %v1534_v50 }
 0x202   :  { %313 = vadd.xlane.f32.xlu2 %v6317_v14  ;;  %v5294_v44 = vpop.xlane.xlu0 %1697  ;;  %v1684_v14 = vsel %vm6323_vm12, %v5284_v45, 0.0  ;;  %v762_v63 = vpop.f32.mrf.mxu2  ;;  %3845 = vpow2.f32 %v1596_v33 }
 0x205   :  { %310 = vadd.xlane.f32.xlu1 %v6318_v20  ;;  %316 = vadd.xlane.f32.xlu0 %v6319_v4  ;;  %v1393_v4 = vsel %vm6322_vm15, %v5280_v26, -inf  ;;  %v5302_v62 = vpop.eup %3839  ;;  %v1493_v20 = vsub.f32 %v4968_v13, %v5243_v36  ;;  %v6329_v36 = vperm.slane %v4821_v29, 0  ;;  %v6332_v29 = vld [vmem:[#allocation28_spill] sm:$0xff] }
 0x206   :  { %v5304_v58 = vpop.eup %3841  ;;  %v1729_v50 = vsel %vm6326_vm1, %v5302_v62, 0.0 }
 0x207   :  { %6325 = vst [vmem:[#allocation26_spill] sm:$0xff] %v5304_v58  ;;  %v5308_v12 = vpop.eup %3843  ;;  %v1678_v13 = vsel %vm6328_vm11, %v5304_v58, 0.0  ;;  %v1011_v63 = vadd.f32 %v6329_v36, %v5018_v59  ;;  %v5332_v58 = vpop.xlane.xlu1 %1709  ;;  %v6333_v59 = vperm.slane %v6311_v35, 0  ;;  %v6334_v36 = vld [vmem:[#allocation15_spill] sm:$0xff]  ;;  %vm6358_vm11 = vmmov %vm6299_vm0 }
 0x208   :  { %v1663_v33 = vsel %vm6327_vm4, %v5308_v12, 0.0  ;;  %v5328_v41 = vpop.eup %3845  ;;  %vm6356_vm4 = vmmov %vm6299_vm0 }
 0x209   :  { %6331 = vst [vmem:[#allocation9_spill] sm:$0xff] %v5328_v41  ;;  %v1756_v45 = vsel %vm6299_vm0, %v5328_v41, 0.0  ;;  %vm1075_vm2 = vcmp.ge.f32.partialorder %v1011_v63, 0.0 }
 0x20a   :  { %1394 = vmax.xlane.f32.xlu2 %v1393_v4  ;;  %v1582_v4 = vmul.f32 1.442695, %v1493_v20  ;;  %v1538_v20 = vmul.f32 1.442695, %v1471_v53  ;;  %v6335_v53 = vld [vmem:[#allocation16_spill] sm:$0xff] }
 0x20c   :  { %v5296_v43 = vpop.xlane.xlu2 %1703  ;;  %3847 = vpow2.f32 %v1582_v4 }
 0x20d   :  { %1685 = vadd.xlane.f32.xlu0 %v1684_v14  ;;  %1724 = vadd.xlane.f32.xlu1 %v1723_v49  ;;  %v5326_v8 = vpop.f32.mrf.mxu2  ;;  %3849 = vpow2.f32 %v1538_v20 }
 0x20e   :  { %6330 = vst [vmem:[#allocation8_spill] sm:$0xff] %v5326_v8 }
 0x212   :  { %1730 = vadd.xlane.f32.xlu2 %v1729_v50  ;;  %v1139_v50 = vmul.f32 0.2, %v1011_v63  ;;  %v5341_v25 = vpop.eup %3847 }
 0x213   :  { %6336 = vst [vmem:[#allocation10_spill] sm:$0xff] %v5341_v25  ;;  %v5348_v41 = vpop.eup %3849 }
 0x214   :  { %v5315_v14 = vpop.xlane.xlu0 %1721  ;;  %v5317_v49 = vpop.xlane.xlu2 %1715  ;;  %v1203_v4 = vsel %vm1075_vm2, %v1011_v63, %v1139_v50  ;;  %6338 = vst [vmem:[#allocation25_spill] sm:$0xff] %v5348_v41 }
 0x215   :  { %1664 = vadd.xlane.f32.xlu0 %v1663_v33  ;;  %1679 = vadd.xlane.f32.xlu1 %v1678_v13  ;;  %v994_v33 = vadd.f32 %v6333_v59, %v6332_v29  ;;  %v826_v38 = vpop.f32.mrf.mxu2  ;;  %v5346_v20 = vadd.f32 %v4910_v15, %v1203_v4  ;;  %v1735_v29 = vsel %vm6339_vm8, %v5341_v25, 0.0  ;;  %v6343_v25 = vld [vmem:[#allocation17_spill] sm:$0xff]  ;;  %vm6359_vm8 = vmmov %vm6344_vm3 }
 0x216   :  { %v1669_v38 = vsel %vm6340_vm13, %v5348_v41, 0.0  ;;  %vm6361_vm13 = vmmov %vm6344_vm3 }
 0x217   :  { %6337 = vst [vmem:[#allocation20_spill] sm:$0xff] %v5346_v20  ;;  %v1122_v35 = vmul.f32 0.2, %v994_v33  ;;  %vm1058_vm6 = vcmp.ge.f32.partialorder %v994_v33, 0.0  ;;  %v1441_v63 = vsel %vm6341_vm14, %v5346_v20, -inf  ;;  %vm6362_vm14 = vmmov %vm6344_vm3 }
 0x21a   :  { %1757 = vadd.xlane.f32.xlu2 %v1756_v45  ;;  %v1495_v45 = vsub.f32 %v4987_v52, %v5215_v17  ;;  %v1186_v52 = vsel %vm1058_vm6, %v994_v33, %v1122_v35  ;;  %vm6360_vm6 = vmmov %vm6344_vm3 }
 0x21c   :  { %v305_v22 = vpop.xlane.xlu0 %304  ;;  %v1586_v59 = vmul.f32 1.442695, %v1495_v45  ;;  %v5366_v45 = vadd.f32 %v4750_v23, %v1186_v52 }
 0x21d   :  { %v5337_v13 = vpop.xlane.xlu2 %1661  ;;  %367 = vadd.xlane.f32.xlu0 %v6334_v36  ;;  %361 = vadd.xlane.f32.xlu1 %v6335_v53  ;;  %v5358_v17 = vpop.f32.mrf.mxu2  ;;  %v6168_v36 = vperm.slane %v5112_v32, 0 }
 0x21e   :  { %v5361_v53 = vpop.xlane.xlu1 %1727  ;;  %3851 = vpow2.f32 %v1586_v59  ;;  %6342 = vst [vmem:[#allocation11_spill] sm:$0xff] %v5366_v45  ;;  %v1390_v33 = vsel %vm6344_vm3, %v5366_v45, -inf  ;;  %v1497_v59 = vsub.f32 %v4990_v47, %v5267_v34 }
 0x220   :  { %v1590_v45 = vmul.f32 1.442695, %v1497_v59  ;;  %v6353_v59 = vld [vmem:[#allocation19_spill] sm:$0xff] }
 0x222   :  { %1736 = vadd.xlane.f32.xlu2 %v1735_v29  ;;  %v1012_v29 = vadd.f32 %v6168_v36, %v5234_v55  ;;  %v944_v36 = vperm.slane %v5049_v28, 0  ;;  %3853 = vpow2.f32 %v1590_v45  ;;  %v6351_v28 = vld [vmem:[#allocation22_spill] sm:$0xff] }
 0x223   :  { %3855 = vrcp.f32 %v5294_v44 }
 0x224   :  { %v5363_v4 = vpop.xlane.xlu0 %1307  ;;  %v1140_v8 = vmul.f32 0.2, %v1012_v29  ;;  %vm1076_vm5 = vcmp.ge.f32.partialorder %v1012_v29, 0.0 }
 0x225   :  { %v5356_v50 = vpop.xlane.xlu2 %1667  ;;  %1670 = vadd.xlane.f32.xlu0 %v1669_v38  ;;  %1442 = vmax.xlane.f32.xlu1 %v1441_v63  ;;  %v890_v38 = vpop.f32.mrf.mxu2 }
 0x226   :  { %v5374_v63 = vpop.eup %3851  ;;  %v5376_v41 = vpop.xlane.xlu1 %1733 }
 0x227   :  { %6345 = vst [vmem:[#allocation23_spill] sm:$0xff] %v5374_v63  ;;  %v1741_v55 = vsel %vm6347_vm9, %v5374_v63, 0.0  ;;  %vm6365_vm9 = vmmov %vm6344_vm3 }
 0x228   :  { %6346 = vst [vmem:[#allocation12_spill] sm:$0xff] %v5376_v41 }
 0x22a   :  { %334 = vadd.xlane.f32.xlu2 %v6343_v25  ;;  %v1204_v25 = vsel %vm1076_vm5, %v1012_v29, %v1140_v8  ;;  %v997_v8 = vadd.f32 %v944_v36, %v305_v22  ;;  %v6173_v29 = vperm.slane %v6351_v28, 0  ;;  %vm6363_vm5 = vmmov %vm6344_vm3 }
 0x22b   :  { %v5387_v41 = vadd.f32 %v4750_v23, %v1204_v25  ;;  %v5399_v25 = vpop.eup %3853 }
 0x22c   :  { %v320_v52 = vpop.xlane.xlu0 %319  ;;  %6354 = vst [vmem:[#allocation27_spill] sm:$0xff] %v5399_v25  ;;  %v1125_v63 = vmul.f32 0.2, %v997_v8  ;;  %vm1061_vm12 = vcmp.ge.f32.partialorder %v997_v8, 0.0 }
 0x22d   :  { %v302_v35 = vpop.xlane.xlu2 %301  ;;  %1391 = vmax.xlane.f32.xlu1 %v1390_v33 }
 0x22e   :  { %v996_v33 = vadd.f32 %v944_v36, %v302_v35  ;;  %v5389_v20 = vpop.xlane.xlu1 %1739  ;;  %v1002_v35 = vadd.f32 %v6173_v29, %v320_v52  ;;  %v6175_v29 = vperm.slane %v5358_v17, 0 }
 0x22f   :  { %6349 = vst [vmem:[#allocation13_spill] sm:$0xff] %v5389_v20  ;;  %v1475_v20 = vsub.f32 %v5021_v5, %v5259_v18  ;;  %v3856_v18 = vpop.eup %3855 }
 0x230   :  { %v1124_v34 = vmul.f32 0.2, %v996_v33  ;;  %vm1060_vm15 = vcmp.ge.f32.partialorder %v996_v33, 0.0  ;;  %v1130_v52 = vmul.f32 0.2, %v1002_v35  ;;  %vm1066_vm1 = vcmp.ge.f32.partialorder %v1002_v35, 0.0 }
 0x232   :  { %1742 = vadd.xlane.f32.xlu2 %v1741_v55  ;;  %v1444_v55 = vsel %vm6350_vm10, %v5387_v41, -inf  ;;  %v1188_v45 = vsel %vm1060_vm15, %v996_v33, %v1124_v34  ;;  %v1747_v33 = vsel %vm6355_vm7, %v5399_v25, 0.0  ;;  %v1189_v34 = vsel %vm1061_vm12, %v997_v8, %v1125_v63  ;;  %vm6366_vm10 = vmmov %vm6344_vm3 }
 0x233   :  { %v1473_v25 = vsub.f32 %v5005_v39, %v5236_v3  ;;  %v1478_v63 = vsub.f32 %v5115_v31, %v5363_v4  ;;  %v1499_v31 = vsub.f32 %v5008_v57, %v5290_v51  ;;  %vm6367_vm15 = vmmov %vm6344_vm3 }
 0x234   :  { %vm6368_vm7 = vmmov %vm6344_vm3 }
 0x235   :  { %v5383_v38 = vpop.xlane.xlu2 %1382  ;;  %331 = vadd.xlane.f32.xlu1 %v6348_v9  ;;  %v1542_v3 = vmul.f32 1.442695, %v1473_v25  ;;  %v1594_v51 = vmul.f32 1.442695, %v1499_v31 }
 0x238   :  { %v1707_v47 = vpop.xlane.xlu0 %1706 }
 0x23a   :  { %1445 = vmax.xlane.f32.xlu2 %v1444_v55  ;;  %v5405_v55 = vadd.f32 %v4750_v23, %v1188_v45 }
 0x23c   :  { %v1396_v5 = vsel %vm6356_vm4, %v5405_v55, -inf }
 0x23d   :  { %v5396_v9 = vpop.xlane.xlu2 %1673  ;;  %370 = vadd.xlane.f32.xlu1 %v6353_v59  ;;  %v1546_v59 = vmul.f32 1.442695, %v1475_v20  ;;  %v1928_v20 = vmul.f32 %v3856_v18, %v5053_v40 }
 0x23e   :  { %6352 = vst [vmem:[#allocation14_spill] sm:$0xff] %v5396_v9  ;;  %v5417_v9 = vadd.f32 %v4910_v15, %v1189_v34 }
 0x23f   :  { %v5436_v4 = vpop.f32.mrf.mxu3 }
 0x240   :  { %v359_v22 = vpop.xlane.xlu0 %358  ;;  %v1701_v36 = vpop.xlane.xlu1 %1700  ;;  %v1399_v39 = vsel %vm6358_vm11, %v5417_v9, -inf }
 0x241   :  { %3857 = vrcp.f32 %v1701_v36  ;;  %v1015_v44 = vadd.f32 %v6175_v29, %v359_v22  ;;  %v1194_v36 = vsel %vm1066_vm1, %v1002_v35, %v1130_v52  ;;  %v6357_v35 = vperm.slane %v5112_v32, 0  ;;  %vm6369_vm1 = vmmov %vm6344_vm3 }
 0x242   :  { %1748 = vadd.xlane.f32.xlu2 %v1747_v33  ;;  %3859 = vpow2.f32 %v1546_v59  ;;  %v1552_v59 = vmul.f32 1.442695, %v1478_v63  ;;  %vm6370_vm4 = vmmov %vm6369_vm1 }
 0x243   :  { %v1143_v34 = vmul.f32 0.2, %v1015_v44  ;;  %vm1079_vm0 = vcmp.ge.f32.partialorder %v1015_v44, 0.0  ;;  %3861 = vrcp.f32 %v1707_v47 }
 0x244   :  { %3863 = vpow2.f32 %v1542_v3 }
 0x245   :  { %v5414_v45 = vpop.xlane.xlu2 %355  ;;  %1397 = vmax.xlane.f32.xlu1 %v1396_v5  ;;  %v5428_v5 = vadd.f32 %v4750_v23, %v1194_v36  ;;  %v1207_v36 = vsel %vm1079_vm0, %v1015_v44, %v1143_v34  ;;  %3865 = vrcp.f32 %v5296_v43  ;;  %v1477_v43 = vsub.f32 %v5037_v11, %v5275_v56  ;;  %vm6372_vm0 = vmmov %vm6369_vm1 }
 0x246   :  { %3867 = vpow2.f32 %v1552_v59  ;;  %v5454_v47 = vadd.f32 %v4910_v15, %v1207_v36 }
 0x247   :  { %v3858_v33 = vpop.eup %3857  ;;  %v1414_v32 = vsel %vm6360_vm6, %v5428_v5, -inf  ;;  %3869 = vpow2.f32 %v1594_v51  ;;  %v1550_v59 = vmul.f32 1.442695, %v1477_v43  ;;  %v6364_v51 = vperm.slane %v5358_v17, 0  ;;  %vm6374_vm6 = vmmov %vm6372_vm0 }
 0x248   :  { %v1929_v8 = vmul.f32 %v3858_v33, %v5161_v6  ;;  %v5425_v22 = vpop.xlane.xlu0 %307  ;;  %v353_v29 = vpop.xlane.xlu1 %352  ;;  %v1453_v3 = vsel %vm6344_vm3, %v5454_v47, -inf  ;;  %vm6377_vm3 = vmmov %vm6372_vm0 }
 0x249   :  { %v1013_v52 = vadd.f32 %v6357_v35, %v353_v29  ;;  %v5441_v29 = vpop.eup %3859 }
 0x24a   :  { %v1986_v40 = vpack.c.bf16 %v1929_v8, %v1928_v20  ;;  %1400 = vmax.xlane.f32.xlu2 %v1399_v39  ;;  %v1681_v44 = vsel %vm6362_vm14, %v5441_v29, 0.0  ;;  %v3862_v34 = vpop.eup %3861  ;;  %vm6376_vm14 = vmmov %vm6372_vm0 }
 0x24b   :  { %vm1077_vm2 = vcmp.ge.f32.partialorder %v1013_v52, 0.0  ;;  %v1141_v6 = vmul.f32 0.2, %v1013_v52  ;;  %v5461_v39 = vpop.eup %3863 }
 0x24c   :  { %3561 = vmatmul.msk.bf16.vlgmr.msra.gmra.mxu1 %vm6359_vm8, %v1986_v40  ;;  %v3866_v40 = vpop.eup %3865  ;;  %v1675_v11 = vsel %vm6363_vm5, %v5461_v39, 0.0 }
 0x24d   :  { %v5443_v25 = vpop.xlane.xlu2 %1436  ;;  %1415 = vmax.xlane.f32.xlu1 %v1414_v32  ;;  %v1205_v18 = vsel %vm1077_vm2, %v1013_v52, %v1141_v6  ;;  %v906_v52 = vpop.f32.mrf.mxu3  ;;  %v1931_v6 = vmul.f32 %v3862_v34, %v5145_v0  ;;  %v1930_v56 = vmul.f32 %v3866_v40, %v5073_v37  ;;  %vm6373_vm2 = vmmov %vm6372_vm0 }
 0x24e   :  { %v5446_v57 = vadd.f32 %v4910_v15, %v1205_v18 }
 0x24f   :  { %v1987_v0 = vpack.c.bf16 %v1931_v6, %v1930_v56 }
 0x250   :  { %v5449_v33 = vpop.xlane.xlu0 %1388  ;;  %v1380_v20 = vpop.xlane.xlu1 %1379  ;;  %v1447_v63 = vsel %vm6361_vm13, %v5446_v57, -inf  ;;  %vm6375_vm13 = vmmov %vm6372_vm0 }
 0x251   :  { %v1502_v8 = vsub.f32 %v5181_v42, %v1380_v20  ;;  %1448 = vmax.xlane.f32.xlu0 %v1447_v63  ;;  %v5465_v42 = vpop.eup %3867  ;;  %v1014_v20 = vadd.f32 %v6364_v51, %v5414_v45  ;;  %v1501_v45 = vsub.f32 %v5024_v7, %v5313_v27 }
 0x252   :  { %1682 = vadd.xlane.f32.xlu2 %v1681_v44  ;;  %v5471_v36 = vpop.eup %3869  ;;  %v1690_v63 = vsel %vm6365_vm9, %v5465_v42, 0.0  ;;  %vm6379_vm9 = vmmov %vm6372_vm0 }
 0x253   :  { %v1600_v35 = vmul.f32 1.442695, %v1502_v8  ;;  %v1503_v8 = vsub.f32 %v5140_v60, %v5383_v38  ;;  %v1753_v37 = vsel %vm6367_vm15, %v5471_v36, 0.0  ;;  %v1142_v34 = vmul.f32 0.2, %v1014_v20 }
 0x254   :  { %vm1078_vm12 = vcmp.ge.f32.partialorder %v1014_v20, 0.0 }
 0x255   :  { %v1713_v31 = vpop.xlane.xlu2 %1712  ;;  %1454 = vmax.xlane.f32.xlu1 %v1453_v3  ;;  %3871 = vpow2.f32 %v1600_v35  ;;  %v1602_v43 = vmul.f32 1.442695, %v1503_v8  ;;  %v1206_v3 = vsel %vm1078_vm12, %v1014_v20, %v1142_v34  ;;  %v6371_v34 = vperm.slane %v6351_v28, 0  ;;  %vm6381_vm12 = vmmov %vm6372_vm0 }
 0x256   :  { %3873 = vpow2.f32 %v1550_v59 }
 0x257   :  { %3875 = vrcp.f32 %v1713_v31  ;;  %v1598_v31 = vmul.f32 1.442695, %v1501_v45 }
 0x258   :  { %v1719_v32 = vpop.xlane.xlu0 %1718  ;;  %v1311_v18 = vpop.xlane.xlu1 %1310  ;;  %3877 = vrcp.f32 %v5332_v58  ;;  %v5501_v58 = vadd.f32 %v4750_v23, %v1206_v3  ;;  %v1521_v3 = vsub.f32 %v5178_v21, %v5443_v25  ;;  %v1505_v21 = vsub.f32 %v5184_v2, %v5449_v33 }
 0x259   :  { %1676 = vadd.xlane.f32.xlu0 %v1675_v11  ;;  %3879 = vpow2.f32 %v1602_v43  ;;  %v945_v11 = vperm.slane %v5282_v1, 0  ;;  %v1479_v56 = vsub.f32 %v5202_v16, %v1311_v18 }
 0x25a   :  { %1691 = vadd.xlane.f32.xlu2 %v1690_v63  ;;  %3881 = vpow2.f32 %v1598_v31  ;;  %v1450_v63 = vsel %vm6370_vm4, %v5501_v58, -inf }
 0x25b   :  { %v5483_v44 = vpop.eup %3871  ;;  %v1554_v1 = vmul.f32 1.442695, %v1479_v56  ;;  %3883 = vrcp.f32 %v1719_v32  ;;  %v1638_v56 = vmul.f32 1.442695, %v1521_v3 }
 0x25c   :  { %3562 = vmatmul.msk.bf16.gmra.mxu1 %vm6366_vm10, %v1987_v0  ;;  %v1762_v35 = vsel %vm6368_vm7, %v5483_v44, 0.0  ;;  %v5496_v52 = vpop.eup %3873  ;;  %3885 = vrcp.f32 %v5317_v49  ;;  %vm6380_vm10 = vmmov %vm6372_vm0 }
 0x25d   :  { %v5485_v17 = vpop.xlane.xlu2 %1385  ;;  %1754 = vadd.xlane.f32.xlu1 %v1753_v37  ;;  %v3876_v40 = vpop.eup %3875  ;;  %v1687_v7 = vsel %vm6369_vm1, %v5496_v52, 0.0  ;;  %v998_v37 = vadd.f32 %v945_v11, %v5425_v22  ;;  %3887 = vpow2.f32 %v1554_v1  ;;  %v1606_v1 = vmul.f32 1.442695, %v1505_v21  ;;  %vm6382_vm7 = vmmov %vm6372_vm0 }
 0x25e   :  { %v3878_v27 = vpop.eup %3877  ;;  %v1933_v59 = vmul.f32 %v3876_v40, %v5199_v54  ;;  %vm6383_vm1 = vmmov %vm6372_vm0 }
 0x25f   :  { %v1932_v0 = vmul.f32 %v3878_v27, %v5051_v19  ;;  %v5511_v8 = vpop.eup %3879  ;;  %v1126_v19 = vmul.f32 0.2, %v998_v37  ;;  %vm1062_vm8 = vcmp.ge.f32.partialorder %v998_v37, 0.0 }
 0x260   :  { %v5490_v60 = vpop.xlane.xlu0 %1751  ;;  %v5492_v38 = vpop.xlane.xlu1 %1745  ;;  %v1765_v18 = vsel %vm6373_vm2, %v5511_v8, 0.0  ;;  %vm6385_vm2 = vmmov %vm6372_vm0 }
 0x261   :  { %1763 = vadd.xlane.f32.xlu0 %v1762_v35  ;;  %v1988_v45 = vpack.c.bf16 %v1933_v59, %v1932_v0  ;;  %v5519_v43 = vpop.eup %3881  ;;  %v1190_v49 = vsel %vm1062_vm8, %v998_v37, %v1126_v19  ;;  %v948_v37 = vperm.slane %v5078_v10, 0  ;;  %v6378_v19 = vld [vmem:[#allocation30_spill] sm:$0xff] }
 0x262   :  { %v1759_v32 = vsel %vm6374_vm6, %v5519_v43, 0.0  ;;  %v3884_v59 = vpop.eup %3883  ;;  %v5539_v25 = vadd.f32 %v4750_v23, %v1190_v49  ;;  %vm6387_vm6 = vmmov %vm6372_vm0 }
 0x265   :  { %v326_v6 = vpop.xlane.xlu2 %325  ;;  %1688 = vadd.xlane.f32.xlu1 %v1687_v7 }
 0x266   :  { %v1004_v3 = vadd.f32 %v948_v37, %v326_v6 }
 0x268   :  { %v5506_v51 = vpop.xlane.xlu0 %328  ;;  %v323_v20 = vpop.xlane.xlu1 %322  ;;  %vm1068_vm15 = vcmp.ge.f32.partialorder %v1004_v3, 0.0 }
 0x269   :  { %v1003_v54 = vadd.f32 %v6371_v34, %v323_v20  ;;  %1451 = vmax.xlane.f32.xlu0 %v1450_v63  ;;  %v3886_v63 = vpop.eup %3885 }
 0x26a   :  { %v5541_v0 = vpop.eup %3887 }
 0x26b   :  { %vm1067_vm11 = vcmp.ge.f32.partialorder %v1003_v54, 0.0  ;;  %v1131_v16 = vmul.f32 0.2, %v1003_v54 }
 0x26c   :  { %3563 = vmatmul.msk.bf16.gmra.mxu1 %vm6372_vm0, %v1988_v45  ;;  %v1504_v45 = vsub.f32 %v5213_v46, %v5485_v17 }
 0x26d   :  { %v5521_v35 = vpop.xlane.xlu2 %364  ;;  %1766 = vadd.xlane.f32.xlu1 %v1765_v18  ;;  %v1195_v22 = vsel %vm1067_vm11, %v1003_v54, %v1131_v16  ;;  %v5545_v54 = vpop.f32.mrf.mxu0  ;;  %v1693_v16 = vsel %vm6376_vm14, %v5541_v0, 0.0  ;;  %v1402_v18 = vsel %vm6377_vm3, %v5539_v25, -inf  ;;  %vm6390_vm14 = vmmov %vm6372_vm0 }
 0x26e   :  { %v5525_v28 = vadd.f32 %v4910_v15, %v1195_v22  ;;  %v1934_v22 = vmul.f32 %v3886_v63, %v6378_v19 }
 0x270   :  { %v5529_v40 = vpop.xlane.xlu0 %1439  ;;  %v1434_v31 = vpop.xlane.xlu1 %1433  ;;  %v1417_v7 = vsel %vm6375_vm13, %v5525_v28, -inf  ;;  %vm6389_vm13 = vmmov %vm6372_vm0 }
 0x271   :  { %v1520_v27 = vsub.f32 %v5249_v30, %v1434_v31  ;;  %1760 = vadd.xlane.f32.xlu0 %v1759_v32  ;;  %1418 = vmax.xlane.f32.xlu2 %v1417_v7  ;;  %v1935_v30 = vmul.f32 %v3884_v59, %v5204_v61  ;;  %v1604_v31 = vmul.f32 1.442695, %v1504_v45  ;;  %v1132_v7 = vmul.f32 0.2, %v1004_v3 }
 0x272   :  { %v1005_v45 = vadd.f32 %v948_v37, %v5506_v51 }
 0x273   :  { %v1636_v20 = vmul.f32 1.442695, %v1520_v27  ;;  %v1989_v10 = vpack.c.bf16 %v1935_v30, %v1934_v22  ;;  %v6176_v27 = vperm.slane %v5436_v4, 0 }
 0x274   :  { %v1133_v22 = vmul.f32 0.2, %v1005_v45  ;;  %vm1069_vm4 = vcmp.ge.f32.partialorder %v1005_v45, 0.0 }
 0x275   :  { %v5543_v34 = vpop.xlane.xlu2 %313  ;;  %3889 = vpow2.f32 %v1636_v20  ;;  %v922_v59 = vpop.f32.mrf.mxu0 }
 0x276   :  { %3891 = vpow2.f32 %v1638_v56 }
 0x277   :  { %3893 = vpow2.f32 %v1606_v1  ;;  %v1017_v1 = vadd.f32 %v6176_v27, %v5521_v35  ;;  %v1522_v35 = vsub.f32 %v5252_v48, %v5529_v40  ;;  %v1197_v40 = vsel %vm1069_vm4, %v1005_v45, %v1133_v22  ;;  %vm6399_vm4 = vmmov %vm6372_vm0 }
 0x278   :  { %v5551_v2 = vpop.xlane.xlu0 %316  ;;  %v311_v33 = vpop.xlane.xlu1 %310  ;;  %3895 = vpow2.f32 %v1604_v31 }
 0x279   :  { %v999_v61 = vadd.f32 %v945_v11, %v311_v33  ;;  %1694 = vadd.xlane.f32.xlu0 %v1693_v16  ;;  %1403 = vmax.xlane.f32.xlu2 %v1402_v18  ;;  %3897 = vrcp.f32 %v5315_v14  ;;  %v1196_v33 = vsel %vm1068_vm15, %v1004_v3, %v1132_v7  ;;  %vm1081_vm11 = vcmp.ge.f32.partialorder %v1017_v1, 0.0  ;;  %v6384_v3 = vld [vmem:[#allocation21_spill] sm:$0xff]  ;;  %vm6394_vm15 = vmmov %vm6372_vm0 }
 0x27a   :  { %v5585_v18 = vadd.f32 %v4750_v23, %v1196_v33 }
 0x27b   :  { %vm1063_vm5 = vcmp.ge.f32.partialorder %v999_v61, 0.0  ;;  %v1127_v46 = vmul.f32 0.2, %v999_v61  ;;  %v5558_v17 = vpop.eup %3889 }
 0x27c   :  { %3564 = vmatmul.msk.bf16.gmra.mxu1 %vm6379_vm9, %v1989_v10  ;;  %v5561_v32 = vpop.eup %3891  ;;  %v1816_v6 = vsel %vm6380_vm10, %v5558_v17, 0.0  ;;  %v946_v10 = vperm.slane %v6384_v3, 0  ;;  %v1420_v7 = vsel %vm6372_vm0, %v5585_v18, -inf  ;;  %v5609_v3 = vadd.f32 %v4910_v15, %v1197_v40  ;;  %vm6393_vm10 = vmmov %vm6372_vm0 }
 0x27d   :  { %v5564_v49 = vpop.xlane.xlu2 %1394  ;;  %v1191_v11 = vsel %vm1063_vm5, %v999_v61, %v1127_v46  ;;  %1817 = vadd.xlane.f32.xlu1 %v1816_v6  ;;  %v1819_v21 = vsel %vm6381_vm12, %v5561_v32, 0.0  ;;  %v5582_v16 = vpop.eup %3893  ;;  %v1145_v61 = vmul.f32 0.2, %v1017_v1  ;;  %vm6392_vm5 = vmmov %vm6372_vm0 }
 0x27e   :  { %v5569_v56 = vadd.f32 %v4910_v15, %v1191_v11  ;;  %v5587_v19 = vpop.eup %3895  ;;  %v1771_v51 = vsel %vm6383_vm1, %v5582_v16, 0.0  ;;  %v1000_v59 = vadd.f32 %v946_v10, %v5543_v34  ;;  %vm6395_vm12 = vmmov %vm6372_vm0 }
 0x27f   :  { %v3898_v37 = vpop.eup %3897  ;;  %v1768_v6 = vsel %vm6385_vm2, %v5587_v19, 0.0  ;;  %v1209_v48 = vsel %vm1081_vm11, %v1017_v1, %v1145_v61  ;;  %v1507_v1 = vsub.f32 %v5280_v26, %v5564_v49  ;;  %vm6398_vm1 = vmmov %vm6372_vm0 }
 0x280   :  { %v5571_v20 = vpop.xlane.xlu0 %1685  ;;  %v1725_v63 = vpop.xlane.xlu1 %1724  ;;  %v1405_v30 = vsel %vm6382_vm7, %v5569_v56, -inf  ;;  %v1128_v34 = vmul.f32 0.2, %v1000_v59  ;;  %vm1064_vm8 = vcmp.ge.f32.partialorder %v1000_v59, 0.0  ;;  %vm6404_vm11 = vmmov %vm6372_vm0 }
 0x281   :  { %1820 = vadd.xlane.f32.xlu2 %v1819_v21  ;;  %1406 = vmax.xlane.f32.xlu0 %v1405_v30  ;;  %3899 = vrcp.f32 %v1725_v63  ;;  %v6386_v63 = vld [vmem:[#allocation31_spill] sm:$0xff]  ;;  %v1640_v21 = vmul.f32 1.442695, %v1522_v35  ;;  %vm6406_vm2 = vmmov %vm6372_vm0 }
 0x282   :  { %3901 = vrcp.f32 %v5337_v13  ;;  %v1936_v13 = vmul.f32 %v3898_v37, %v6386_v63  ;;  %v1192_v26 = vsel %vm1064_vm8, %v1000_v59, %v1128_v34  ;;  %vm6408_vm8 = vmmov %vm6372_vm0 }
 0x283   :  { %v5630_v63 = vadd.f32 %v4750_v23, %v1192_v26 }
 0x285   :  { %v1731_v14 = vpop.xlane.xlu2 %1730  ;;  %1772 = vadd.xlane.f32.xlu1 %v1771_v51  ;;  %v5606_v51 = vadd.f32 %v4910_v15, %v1209_v48 }
 0x287   :  { %v3900_v11 = vpop.eup %3899 }
 0x288   :  { %v1665_v31 = vpop.xlane.xlu0 %1664  ;;  %v5595_v46 = vpop.xlane.xlu1 %1679  ;;  %v1937_v30 = vmul.f32 %v3900_v11, %v5288_v24  ;;  %v6388_v24 = vld [vmem:[#allocation32_spill] sm:$0xff]  ;;  %v6391_v11 = vperm.slane %v5436_v4, 0  ;;  %v955_v4 = vperm.slane %v5545_v54, 0 }
 0x289   :  { %3903 = vrcp.f32 %v1665_v31  ;;  %1421 = vmax.xlane.f32.xlu2 %v1420_v7  ;;  %1769 = vadd.xlane.f32.xlu0 %v1768_v6  ;;  %v3902_v27 = vpop.eup %3901  ;;  %v1459_v7 = vsel %vm6389_vm13, %v5606_v51, -inf  ;;  %v1423_v6 = vsel %vm6390_vm14, %v5609_v3, -inf  ;;  %vm6410_vm14 = vmmov %vm6372_vm0 }
 0x28a   :  { %v1990_v33 = vpack.c.bf16 %v1937_v30, %v1936_v13  ;;  %3905 = vpow2.f32 %v1640_v21  ;;  %v1916_v22 = vmul.f32 %v3902_v27, %v6388_v24  ;;  %v1001_v27 = vadd.f32 %v946_v10, %v5551_v2 }
 0x28b   :  { %3907 = vrcp.f32 %v1731_v14 }
 0x28c   :  { %3565 = vmatmul.msk.bf16.gmra.mxu1 %vm6387_vm6, %v1990_v33  ;;  %3909 = vrcp.f32 %v5361_v53  ;;  %v1129_v59 = vmul.f32 0.2, %v1001_v27  ;;  %vm1065_vm9 = vcmp.ge.f32.partialorder %v1001_v27, 0.0 }
 0x28d   :  { %v5611_v31 = vpop.xlane.xlu2 %1757  ;;  %3911 = vrcp.f32 %v5356_v50 }
 0x28f   :  { %v3904_v45 = vpop.eup %3903 }
 0x290   :  { %v1917_v61 = vmul.f32 %v3904_v45, %v5308_v12  ;;  %v368_v35 = vpop.xlane.xlu0 %367  ;;  %v362_v37 = vpop.xlane.xlu1 %361  ;;  %v1610_v12 = vmul.f32 1.442695, %v1507_v1  ;;  %v1408_v1 = vsel %vm6394_vm15, %v5630_v63, -inf  ;;  %vm6416_vm15 = vmmov %vm6372_vm0 }
 0x291   :  { %v1016_v48 = vadd.f32 %v6391_v11, %v362_v37  ;;  %1460 = vmax.xlane.f32.xlu2 %v1459_v7  ;;  %1424 = vmax.xlane.f32.xlu0 %v1423_v6  ;;  %v5626_v40 = vpop.eup %3905  ;;  %v1018_v24 = vadd.f32 %v955_v4, %v368_v35  ;;  %v1193_v7 = vsel %vm1065_vm9, %v1001_v27, %v1129_v59 }
 0x292   :  { %v1980_v49 = vpack.c.bf16 %v1917_v61, %v1916_v22  ;;  %v3908_v53 = vpop.eup %3907  ;;  %3913 = vpow2.f32 %v1610_v12  ;;  %v1822_v45 = vsel %vm6393_vm10, %v5626_v40, 0.0  ;;  %v6396_v22 = vld [vmem:[#allocation20_spill] sm:$0xff]  ;;  %vm6414_vm10 = vmmov %vm6372_vm0 }
 0x293   :  { %vm1080_vm3 = vcmp.ge.f32.partialorder %v1016_v48, 0.0  ;;  %v1144_v14 = vmul.f32 0.2, %v1016_v48  ;;  %v3910_v10 = vpop.eup %3909  ;;  %v1939_v30 = vmul.f32 %v3908_v53, %v5302_v62  ;;  %v6397_v62 = vld [vmem:[#allocation29_spill] sm:$0xff]  ;;  %vm1082_vm7 = vcmp.ge.f32.partialorder %v1018_v24, 0.0 }
 0x294   :  { %3555 = vmatmul.msk.bf16.vlgmr.msra.gmra.mxu0 %vm6392_vm5, %v1980_v49  ;;  %v1938_v37 = vmul.f32 %v3910_v10, %v6397_v62  ;;  %v3912_v11 = vpop.eup %3911  ;;  %v1146_v49 = vmul.f32 0.2, %v1018_v24  ;;  %v6401_v10 = vld [vmem:[#allocation25_spill] sm:$0xff]  ;;  %vm6412_vm5 = vmmov %vm6372_vm0 }
 0x295   :  { %v1737_v13 = vpop.xlane.xlu2 %1736  ;;  %v1208_v21 = vsel %vm1080_vm3, %v1016_v48, %v1144_v14  ;;  %v5651_v14 = vadd.f32 %v4910_v15, %v1193_v7  ;;  %vm6411_vm3 = vmmov %vm6372_vm0 }
 0x296   :  { %v5635_v2 = vadd.f32 %v4750_v23, %v1208_v21  ;;  %v1991_v48 = vpack.c.bf16 %v1939_v30, %v1938_v37  ;;  %v6400_v21 = vld [vmem:[#allocation35_spill] sm:$0xff] }
 0x297   :  { %v1918_v59 = vmul.f32 %v3912_v11, %v6400_v21 }
 0x298   :  { %v1671_v33 = vpop.xlane.xlu0 %1670  ;;  %v1443_v34 = vpop.xlane.xlu1 %1442  ;;  %v1456_v50 = vsel %vm6395_vm12, %v5635_v2, -inf  ;;  %vm6418_vm12 = vmmov %vm6372_vm0 }
 0x299   :  { %3915 = vrcp.f32 %v1671_v33  ;;  %v1523_v61 = vsub.f32 %v6396_v22, %v1443_v34  ;;  %1823 = vadd.xlane.f32.xlu2 %v1822_v45  ;;  %1409 = vmax.xlane.f32.xlu0 %v1408_v1  ;;  %v5648_v26 = vpop.eup %3913  ;;  %v6402_v33 = vld [vmem:[#allocation12_spill] sm:$0xff]  ;;  %v6403_v34 = vld [vmem:[#allocation11_spill] sm:$0xff]  ;;  %v1411_v1 = vsel %vm6404_vm11, %v5651_v14, -inf  ;;  %vm6425_vm11 = vmmov %vm6372_vm0 }
 0x29a   :  { %1457 = vmax.xlane.f32.xlu1 %v1456_v50  ;;  %v1777_v27 = vsel %vm6399_vm4, %v5648_v26, 0.0  ;;  %v1210_v50 = vsel %vm1082_vm7, %v1018_v24, %v1146_v49  ;;  %v6407_v49 = vld [vmem:[#allocation10_spill] sm:$0xff]  ;;  %vm6419_vm7 = vmmov %vm6372_vm0 }
 0x29b   :  { %v1642_v6 = vmul.f32 1.442695, %v1523_v61  ;;  %v6405_v61 = vld [vmem:[#allocation8_spill] sm:$0xff]  ;;  %vm6422_vm4 = vmmov %vm6372_vm0 }
 0x29c   :  { %3566 = vmatmul.msk.bf16.gmra.mxu1 %vm6398_vm1, %v1991_v48  ;;  %v949_v62 = vperm.slane %v6405_v61, 0  ;;  %vm6420_vm1 = vmmov %vm6372_vm0 }
 0x29d   :  { %3917 = vpow2.f32 %v1642_v6  ;;  %v335_v12 = vpop.xlane.xlu2 %334  ;;  %v5669_v6 = vadd.f32 %v4750_v23, %v1210_v50 }
 0x29e   :  { %3919 = vrcp.f32 %v1737_v13  ;;  %v1007_v48 = vadd.f32 %v949_v62, %v335_v12 }
 0x29f   :  { %v3916_v35 = vpop.eup %3915  ;;  %3921 = vrcp.f32 %v6402_v33  ;;  %v1462_v21 = vsel %vm6408_vm8, %v5669_v6, -inf  ;;  %vm6429_vm8 = vmmov %vm6372_vm0 }
 0x2a0   :  { %v1392_v53 = vpop.xlane.xlu1 %1391  ;;  %v1919_v30 = vmul.f32 %v3916_v35, %v6401_v10  ;;  %vm1071_vm6 = vcmp.ge.f32.partialorder %v1007_v48, 0.0 }
 0x2a1   :  { %v1506_v45 = vsub.f32 %v6403_v34, %v1392_v53  ;;  %1778 = vadd.xlane.f32.xlu2 %v1777_v27 }
 0x2a2   :  { %1412 = vmax.xlane.f32.xlu1 %v1411_v1  ;;  %v1981_v22 = vpack.c.bf16 %v1919_v30, %v1918_v59  ;;  %v1135_v59 = vmul.f32 0.2, %v1007_v48  ;;  %v6409_v30 = vld [vmem:[#allocation33_spill] sm:$0xff] }
 0x2a3   :  { %v5662_v13 = vpop.eup %3917  ;;  %v1608_v37 = vmul.f32 1.442695, %v1506_v45 }
 0x2a4   :  { %3556 = vmatmul.msk.bf16.gmra.mxu0 %vm6372_vm0, %v1981_v22  ;;  %v1825_v7 = vsel %vm6406_vm2, %v5662_v13, 0.0  ;;  %v3920_v11 = vpop.eup %3919  ;;  %v1199_v61 = vsel %vm1071_vm6, %v1007_v48, %v1135_v59  ;;  %vm6428_vm2 = vmmov %vm6372_vm0 }
 0x2a5   :  { %3923 = vpow2.f32 %v1608_v37  ;;  %v1743_v35 = vpop.xlane.xlu2 %1742  ;;  %1826 = vadd.xlane.f32.xlu0 %v1825_v7  ;;  %v3922_v24 = vpop.eup %3921  ;;  %v1941_v53 = vmul.f32 %v3920_v11, %v6407_v49  ;;  %v5687_v49 = vadd.f32 %v4910_v15, %v1199_v61  ;;  %vm6430_vm6 = vmmov %vm6372_vm0 }
 0x2a6   :  { %v1940_v33 = vmul.f32 %v3922_v24, %v6409_v30  ;;  %3925 = vrcp.f32 %v1743_v35 }
 0x2a7   :  { %v1429_v35 = vsel %vm6414_vm10, %v5687_v49, -inf  ;;  %vm6439_vm10 = vmmov %vm6372_vm0 }
 0x2a8   :  { %v332_v27 = vpop.xlane.xlu1 %331  ;;  %v1992_v45 = vpack.c.bf16 %v1941_v53, %v1940_v33  ;;  %v6413_v53 = vld [vmem:[#allocation13_spill] sm:$0xff]  ;;  %v6415_v33 = vld [vmem:[#allocation23_spill] sm:$0xff] }
 0x2a9   :  { %v1006_v10 = vadd.f32 %v949_v62, %v332_v27  ;;  %1463 = vmax.xlane.f32.xlu2 %v1462_v21  ;;  %3927 = vrcp.f32 %v6413_v53 }
 0x2ab   :  { %v5675_v34 = vpop.eup %3923  ;;  %vm1070_vm13 = vcmp.ge.f32.partialorder %v1006_v10, 0.0  ;;  %v1134_v12 = vmul.f32 0.2, %v1006_v10 }
 0x2ac   :  { %v1774_v1 = vsel %vm6410_vm14, %v5675_v34, 0.0  ;;  %3567 = vmatmul.msk.bf16.gmra.mxu1 %vm6411_vm3, %v1992_v45  ;;  %v3926_v27 = vpop.eup %3925  ;;  %vm6433_vm14 = vmmov %vm6372_vm0 }
 0x2ad   :  { %v1446_v50 = vpop.xlane.xlu2 %1445  ;;  %1775 = vadd.xlane.f32.xlu1 %v1774_v1  ;;  %v1198_v22 = vsel %vm1070_vm13, %v1006_v10, %v1134_v12  ;;  %v1943_v12 = vmul.f32 %v3926_v27, %v6415_v33  ;;  %vm6431_vm13 = vmmov %vm6372_vm0 }
 0x2ae   :  { %v1524_v37 = vsub.f32 %v5387_v41, %v1446_v50  ;;  %v5682_v62 = vadd.f32 %v4750_v23, %v1198_v22  ;;  %v6417_v50 = vld [vmem:[#allocation34_spill] sm:$0xff]  ;;  %vm6434_vm3 = vmmov %vm6372_vm0 }
 0x2af   :  { %v3928_v30 = vpop.eup %3927 }
 0x2b0   :  { %v1644_v7 = vmul.f32 1.442695, %v1524_v37  ;;  %v371_v11 = vpop.xlane.xlu1 %370  ;;  %v1426_v24 = vsel %vm6412_vm5, %v5682_v62, -inf  ;;  %v1942_v22 = vmul.f32 %v3928_v30, %v6417_v50  ;;  %v6423_v50 = vld [vmem:[#allocation37_spill] sm:$0xff]  ;;  %vm6436_vm5 = vmmov %vm6372_vm0 }
 0x2b1   :  { %v1019_v48 = vadd.f32 %v955_v4, %v371_v11  ;;  %1427 = vmax.xlane.f32.xlu0 %v1426_v24 }
 0x2b2   :  { %3929 = vpow2.f32 %v1644_v7  ;;  %v1993_v37 = vpack.c.bf16 %v1943_v12, %v1942_v22  ;;  %v6421_v12 = vld [vmem:[#allocation27_spill] sm:$0xff] }
 0x2b3   :  { %vm1083_vm9 = vcmp.ge.f32.partialorder %v1019_v48, 0.0  ;;  %v1147_v41 = vmul.f32 0.2, %v1019_v48 }
 0x2b5   :  { %v1749_v21 = vpop.xlane.xlu2 %1748  ;;  %1430 = vmax.xlane.f32.xlu1 %v1429_v35  ;;  %v1211_v59 = vsel %vm1083_vm9, %v1019_v48, %v1147_v41  ;;  %vm6437_vm9 = vmmov %vm6372_vm0 }
 0x2b6   :  { %v5695_v10 = vadd.f32 %v4910_v15, %v1211_v59 }
 0x2b8   :  { %v1398_v45 = vpop.xlane.xlu1 %1397  ;;  %v1465_v54 = vsel %vm6416_vm15, %v5695_v10, -inf  ;;  %v5700_v4 = vpop.eup %3929  ;;  %vm6440_vm15 = vmmov %vm6372_vm0 }
 0x2b9   :  { %v1508_v1 = vsub.f32 %v5405_v55, %v1398_v45  ;;  %1466 = vmax.xlane.f32.xlu0 %v1465_v54  ;;  %v1828_v7 = vsel %vm6418_vm12, %v5700_v4, 0.0  ;;  %vm6441_vm12 = vmmov %vm6372_vm0 }
 0x2bb   :  { %v1612_v61 = vmul.f32 1.442695, %v1508_v1 }
 0x2bc   :  { %3568 = vmatmul.msk.bf16.gmra.mxu1 %vm6419_vm7, %v1993_v37  ;;  %vm6442_vm7 = vmmov %vm6372_vm0 }
 0x2bd   :  { %3931 = vpow2.f32 %v1612_v61  ;;  %v1401_v11 = vpop.xlane.xlu2 %1400  ;;  %1829 = vadd.xlane.f32.xlu1 %v1828_v7 }
 0x2be   :  { %v1509_v24 = vsub.f32 %v5417_v9, %v1401_v11  ;;  %3933 = vrcp.f32 %v1749_v21 }
 0x2bf   :  { %3935 = vrcp.f32 %v5492_v38 }
 0x2c0   :  { %v1614_v53 = vmul.f32 1.442695, %v1509_v24  ;;  %v1416_v48 = vpop.xlane.xlu1 %1415 }
 0x2c1   :  { %v1514_v9 = vsub.f32 %v5428_v5, %v1416_v48 }
 0x2c2   :  { %3937 = vpow2.f32 %v1614_v53 }
 0x2c3   :  { %v5709_v55 = vpop.eup %3931  ;;  %v1624_v61 = vmul.f32 1.442695, %v1514_v9 }
 0x2c4   :  { %v1449_v41 = vpop.xlane.xlu0 %1448  ;;  %v1780_v35 = vsel %vm6420_vm1, %v5709_v55, 0.0  ;;  %v3934_v27 = vpop.eup %3933  ;;  %vm6443_vm1 = vmmov %vm6372_vm0 }
 0x2c5   :  { %v1525_v59 = vsub.f32 %v5446_v57, %v1449_v41  ;;  %1781 = vadd.xlane.f32.xlu0 %v1780_v35  ;;  %v3936_v30 = vpop.eup %3935  ;;  %v1945_v45 = vmul.f32 %v3934_v27, %v6421_v12  ;;  %v6424_v57 = vld [vmem:[#allocation14_spill] sm:$0xff]  ;;  %v1683_v27 = vpop.xlane.xlu2 %1682 }
 0x2c6   :  { %v1944_v22 = vmul.f32 %v3936_v30, %v6423_v50 }
 0x2c7   :  { %v1646_v33 = vmul.f32 1.442695, %v1525_v59 }
 0x2c8   :  { %v5715_v21 = vpop.eup %3937  ;;  %v1455_v38 = vpop.xlane.xlu1 %1454  ;;  %v1994_v5 = vpack.c.bf16 %v1945_v45, %v1944_v22 }
 0x2c9   :  { %3939 = vpow2.f32 %v1646_v33  ;;  %v2148_v54 = vpop.f32.mrf.mxu1  ;;  %v1783_v1 = vsel %vm6422_vm4, %v5715_v21, 0.0  ;;  %v1527_v11 = vsub.f32 %v5454_v47, %v1455_v38  ;;  %vm6444_vm4 = vmmov %vm6372_vm0 }
 0x2ca   :  { %1784 = vadd.xlane.f32.xlu1 %v1783_v1  ;;  %3941 = vrcp.f32 %v6424_v57  ;;  %v2290_v24 = vpack.c.bf16 %v2148_v54, %v2148_v54  ;;  %v6426_v54 = vld [vmem:[#allocation36_spill] sm:$0xff] }
 0x2cb   :  { %3943 = vrcp.f32 %v5490_v60  ;;  %v1650_v9 = vmul.f32 1.442695, %v1527_v11 }
 0x2cc   :  { %v1677_v37 = vpop.xlane.xlu0 %1676  ;;  %3945 = vpow2.f32 %v1624_v61  ;;  %3569 = vmatmul.msk.bf16.gmra.mxu1 %vm6425_vm11, %v1994_v5  ;;  %v5731_v33 = vunpack.c.l.b16 %v2290_v24  ;;  %v6427_v61 = vld [vmem:[#allocation38_spill] sm:$0xff]  ;;  %vm6445_vm11 = vmmov %vm6372_vm0 }
 0x2cd   :  { %3947 = vrcp.f32 %v1677_v37 }
 0x2cf   :  { %v5724_v7 = vpop.eup %3939 }
 0x2d0   :  { %v1755_v53 = vpop.xlane.xlu1 %1754  ;;  %v1831_v48 = vsel %vm6372_vm0, %v5724_v7, 0.0  ;;  %v3942_v35 = vpop.eup %3941 }
 0x2d1   :  { %3949 = vrcp.f32 %v1755_v53  ;;  %v2150_v41 = vpop.f32.mrf.mxu1  ;;  %1832 = vadd.xlane.f32.xlu2 %v1831_v48  ;;  %v3944_v60 = vpop.eup %3943  ;;  %v1920_v1 = vmul.f32 %v3942_v35, %v6426_v54 }
 0x2d2   :  { %v2291_v59 = vpack.c.bf16 %v2150_v41, %v2150_v41  ;;  %v5729_v30 = vpop.eup %3945  ;;  %3951 = vpow2.f32 %v1650_v9  ;;  %v1946_v57 = vmul.f32 %v3944_v60, %v6427_v61  ;;  %v5748_v48 = vpop.xlane.xlu2 %1691 }
 0x2d3   :  { %v3948_v45 = vpop.eup %3947  ;;  %v1798_v11 = vsel %vm6428_vm2, %v5729_v30, 0.0  ;;  %3953 = vrcp.f32 %v1683_v27  ;;  %vm6446_vm2 = vmmov %vm6372_vm0 }
 0x2d4   :  { %v5733_v12 = vunpack.c.l.b16 %v2291_v59  ;;  %v5735_v47 = vpop.xlane.xlu0 %1763  ;;  %v1921_v50 = vmul.f32 %v3948_v45, %v5461_v39  ;;  %3955 = vrcp.f32 %v5595_v46 }
 0x2d6   :  { %v1982_v5 = vpack.c.bf16 %v1921_v50, %v1920_v1  ;;  %v6432_v50 = vld [vmem:[#allocation26_spill] sm:$0xff] }
 0x2d7   :  { %v3950_v22 = vpop.eup %3949 }
 0x2d8   :  { %v1947_v37 = vmul.f32 %v3950_v22, %v5471_v36  ;;  %3557 = vmatmul.msk.bf16.gmra.mxu0 %vm6429_vm8, %v1982_v5  ;;  %v5750_v41 = vpop.eup %3951  ;;  %v1689_v35 = vpop.xlane.xlu1 %1688  ;;  %vm6447_vm8 = vmmov %vm6372_vm0 }
 0x2d9   :  { %v5745_v24 = vpop.f32.mrf.mxu1  ;;  %1799 = vadd.xlane.f32.xlu2 %v1798_v11  ;;  %v1837_v60 = vsel %vm6431_vm13, %v5750_v41, 0.0  ;;  %v3954_v9 = vpop.eup %3953  ;;  %vm6449_vm13 = vmmov %vm6372_vm0 }
 0x2da   :  { %v1995_v53 = vpack.c.bf16 %v1947_v37, %v1946_v57  ;;  %v3956_v27 = vpop.eup %3955  ;;  %v1923_v46 = vmul.f32 %v3954_v9, %v5441_v29 }
 0x2db   :  { %v1922_v22 = vmul.f32 %v3956_v27, %v6432_v50 }
 0x2dc   :  { %v1452_v39 = vpop.xlane.xlu0 %1451  ;;  %3570 = vmatmul.msk.bf16.gmra.mxu1 %vm6430_vm6, %v1995_v53  ;;  %vm6448_vm6 = vmmov %vm6372_vm0 }
 0x2dd   :  { %v1526_v36 = vsub.f32 %v5501_v58, %v1452_v39  ;;  %v1983_v37 = vpack.c.bf16 %v1923_v46, %v1922_v22 }
 0x2df   :  { %v1648_v59 = vmul.f32 1.442695, %v1526_v36 }
 0x2e0   :  { %v1767_v53 = vpop.xlane.xlu1 %1766 }
 0x2e1   :  { %3957 = vpow2.f32 %v1648_v59  ;;  %v5757_v45 = vpop.f32.mrf.mxu1  ;;  %1838 = vadd.xlane.f32.xlu2 %v1837_v60 }
 0x2e2   :  { %3959 = vrcp.f32 %v5611_v31 }
 0x2e4   :  { %v1761_v54 = vpop.xlane.xlu0 %1760  ;;  %v1419_v1 = vpop.xlane.xlu2 %1418 }
 0x2e5   :  { %3961 = vrcp.f32 %v1761_v54  ;;  %v1515_v58 = vsub.f32 %v5525_v28, %v1419_v1  ;;  %v6435_v28 = vld [vmem:[#allocation9_spill] sm:$0xff] }
 0x2e7   :  { %v5763_v61 = vpop.eup %3957  ;;  %v1626_v57 = vmul.f32 1.442695, %v1515_v58 }
 0x2e8   :  { %v1834_v5 = vsel %vm6433_vm14, %v5763_v61, 0.0  ;;  %v3960_v11 = vpop.eup %3959  ;;  %3558 = vmatmul.msk.bf16.gmra.mxu0 %vm6434_vm3, %v1983_v37  ;;  %vm6450_vm14 = vmmov %vm6372_vm0 }
 0x2e9   :  { %3963 = vpow2.f32 %v1626_v57  ;;  %v5767_v31 = vpop.f32.mrf.mxu1  ;;  %1835 = vadd.xlane.f32.xlu1 %v1834_v5  ;;  %v1948_v39 = vmul.f32 %v3960_v11, %v6435_v28  ;;  %v6438_v5 = vld [vmem:[#allocation24_spill] sm:$0xff]  ;;  %vm6451_vm3 = vmmov %vm6372_vm0 }
 0x2ea   :  { %3965 = vrcp.f32 %v1689_v35 }
 0x2eb   :  { %v3962_v29 = vpop.eup %3961  ;;  %3967 = vrcp.f32 %v5571_v20 }
 0x2ec   :  { %v1949_v36 = vmul.f32 %v3962_v29, %v5519_v43  ;;  %v1695_v59 = vpop.xlane.xlu0 %1694  ;;  %v1404_v60 = vpop.xlane.xlu2 %1403  ;;  %3969 = vrcp.f32 %v1767_v53 }
 0x2ed   :  { %v1510_v9 = vsub.f32 %v5539_v25, %v1404_v60 }
 0x2ee   :  { %v1996_v27 = vpack.c.bf16 %v1949_v36, %v1948_v39 }
 0x2ef   :  { %v5774_v54 = vpop.eup %3963  ;;  %v1616_v1 = vmul.f32 1.442695, %v1510_v9 }
 0x2f0   :  { %3571 = vmatmul.msk.bf16.gmra.mxu1 %vm6436_vm5, %v1996_v27  ;;  %v1801_v35 = vsel %vm6437_vm9, %v5774_v54, 0.0  ;;  %v3966_v46 = vpop.eup %3965  ;;  %v1818_v58 = vpop.xlane.xlu1 %1817  ;;  %vm6452_vm5 = vmmov %vm6372_vm0 }
 0x2f1   :  { %3971 = vpow2.f32 %v1616_v1  ;;  %v5779_v43 = vpop.f32.mrf.mxu1  ;;  %1802 = vadd.xlane.f32.xlu0 %v1801_v35  ;;  %v3968_v20 = vpop.eup %3967  ;;  %v1925_v25 = vmul.f32 %v3966_v46, %v5496_v52  ;;  %vm6453_vm9 = vmmov %vm6372_vm0 }
 0x2f2   :  { %3973 = vrcp.f32 %v5735_v47  ;;  %v3970_v37 = vpop.eup %3969  ;;  %v1924_v11 = vmul.f32 %v3968_v20, %v6438_v5 }
 0x2f3   :  { %3975 = vrcp.f32 %v1818_v58  ;;  %v1951_v52 = vmul.f32 %v3970_v37, %v5511_v8 }
 0x2f4   :  { %v1821_v50 = vpop.xlane.xlu2 %1820  ;;  %v1407_v22 = vpop.xlane.xlu0 %1406  ;;  %v1984_v39 = vpack.c.bf16 %v1925_v25, %v1924_v11 }
 0x2f5   :  { %3977 = vrcp.f32 %v1821_v50  ;;  %v1511_v57 = vsub.f32 %v5569_v56, %v1407_v22 }
 0x2f7   :  { %v5785_v53 = vpop.eup %3971  ;;  %v1618_v29 = vmul.f32 1.442695, %v1511_v57 }
 0x2f8   :  { %v3974_v28 = vpop.eup %3973  ;;  %v1786_v47 = vsel %vm6439_vm10, %v5785_v53, 0.0  ;;  %3559 = vmatmul.msk.bf16.gmra.mxu0 %vm6440_vm15, %v1984_v39  ;;  %v1773_v22 = vpop.xlane.xlu1 %1772  ;;  %vm6454_vm10 = vmmov %vm6372_vm0 }
 0x2f9   :  { %v3976_v36 = vpop.eup %3975  ;;  %3979 = vpow2.f32 %v1618_v29  ;;  %v5789_v60 = vpop.f32.mrf.mxu1  ;;  %1787 = vadd.xlane.f32.xlu0 %v1786_v47  ;;  %v1950_v9 = vmul.f32 %v3974_v28, %v5483_v44  ;;  %vm6455_vm15 = vmmov %vm6372_vm0 }
 0x2fa   :  { %3981 = vrcp.f32 %v1695_v59  ;;  %v1968_v27 = vmul.f32 %v3976_v36, %v5558_v17 }
 0x2fb   :  { %v3978_v56 = vpop.eup %3977  ;;  %3983 = vrcp.f32 %v5748_v48  ;;  %v1997_v25 = vpack.c.bf16 %v1951_v52, %v1950_v9 }
 0x2fc   :  { %v1969_v1 = vmul.f32 %v3978_v56, %v5561_v32  ;;  %v1422_v35 = vpop.xlane.xlu2 %1421  ;;  %v1770_v46 = vpop.xlane.xlu0 %1769 }
 0x2fd   :  { %v1516_v58 = vsub.f32 %v5585_v18, %v1422_v35  ;;  %3985 = vrcp.f32 %v1770_v46 }
 0x2fe   :  { %v2006_v20 = vpack.c.bf16 %v1969_v1, %v1968_v27 }
 0x2ff   :  { %v5798_v50 = vpop.eup %3979  ;;  %v1628_v8 = vmul.f32 1.442695, %v1516_v58 }
 0x300   :  { %3572 = vmatmul.msk.bf16.gmra.mxu1 %vm6441_vm12, %v1997_v25  ;;  %3581 = vmatmul.msk.bf16.vlgmr.msra.gmra.mxu3 %vm6442_vm7, %v2006_v20  ;;  %v1789_v44 = vsel %vm6443_vm1, %v5798_v50, 0.0  ;;  %v3982_v17 = vpop.eup %3981  ;;  %vm6456_vm12 = vmmov %vm6372_vm0 }
 0x301   :  { %3987 = vpow2.f32 %v1628_v8  ;;  %v5804_v32 = vpop.f32.mrf.mxu1  ;;  %1790 = vadd.xlane.f32.xlu1 %v1789_v44  ;;  %v3984_v18 = vpop.eup %3983  ;;  %v1927_v48 = vmul.f32 %v3982_v17, %v5541_v0  ;;  %vm6457_vm7 = vmmov %vm6372_vm0 }
 0x302   :  { %3989 = vrcp.f32 %v1773_v22  ;;  %v1926_v29 = vmul.f32 %v3984_v18, %v5465_v42  ;;  %vm6458_vm1 = vmmov %vm6372_vm0 }
 0x303   :  { %v3986_v11 = vpop.eup %3985 }
 0x304   :  { %v1461_v59 = vpop.xlane.xlu2 %1460  ;;  %v1425_v57 = vpop.xlane.xlu0 %1424  ;;  %v1985_v36 = vpack.c.bf16 %v1927_v48, %v1926_v29  ;;  %v1952_v0 = vmul.f32 %v3986_v11, %v5587_v19 }
 0x305   :  { %v1529_v37 = vsub.f32 %v5606_v51, %v1461_v59  ;;  %v1517_v5 = vsub.f32 %v5609_v3, %v1425_v57 }
 0x307   :  { %v5810_v28 = vpop.eup %3987  ;;  %v1654_v39 = vmul.f32 1.442695, %v1529_v37  ;;  %v1630_v47 = vmul.f32 1.442695, %v1517_v5 }
 0x308   :  { %v1804_v52 = vsel %vm6444_vm4, %v5810_v28, 0.0  ;;  %v3990_v56 = vpop.eup %3989  ;;  %3560 = vmatmul.msk.bf16.gmra.mxu0 %vm6445_vm11, %v1985_v36  ;;  %vm6459_vm4 = vmmov %vm6372_vm0 }
 0x309   :  { %3991 = vpow2.f32 %v1654_v39  ;;  %1805 = vadd.xlane.f32.xlu2 %v1804_v52  ;;  %v5816_v51 = vpop.f32.mrf.mxu1  ;;  %v1953_v42 = vmul.f32 %v3990_v56, %v5582_v16  ;;  %vm6460_vm11 = vmmov %vm6372_vm0 }
 0x30a   :  { %3993 = vpow2.f32 %v1630_v47 }
 0x30b   :  { %v1998_v46 = vpack.c.bf16 %v1953_v42, %v1952_v0 }
 0x30c   :  { %v1824_v3 = vpop.xlane.xlu2 %1823  ;;  %v1410_v9 = vpop.xlane.xlu0 %1409 }
 0x30d   :  { %v1512_v27 = vsub.f32 %v5630_v63, %v1410_v9  ;;  %v1458_v1 = vpop.xlane.xlu1 %1457 }
 0x30e   :  { %v1528_v35 = vsub.f32 %v5635_v2, %v1458_v1 }
 0x30f   :  { %v5821_v58 = vpop.eup %3991  ;;  %v1620_v20 = vmul.f32 1.442695, %v1512_v27 }
 0x310   :  { %v5823_v25 = vpop.eup %3993  ;;  %v1652_v19 = vmul.f32 1.442695, %v1528_v35  ;;  %3573 = vmatmul.msk.bf16.gmra.mxu1 %vm6372_vm0, %v1998_v46  ;;  %v1843_v8 = vsel %vm6446_vm2, %v5821_v58, 0.0  ;;  %vm6461_vm2 = vmmov %vm6372_vm0 }
 0x311   :  { %3995 = vpow2.f32 %v1620_v20  ;;  %v1807_v16 = vsel %vm6447_vm8, %v5823_v25, 0.0  ;;  %1844 = vadd.xlane.f32.xlu2 %v1843_v8  ;;  %v5830_v63 = vpop.f32.mrf.mxu1  ;;  %vm6462_vm8 = vmmov %vm6372_vm0 }
 0x312   :  { %3997 = vpow2.f32 %v1652_v19  ;;  %1808 = vadd.xlane.f32.xlu0 %v1807_v16 }
 0x313   :  { %3999 = vrcp.f32 %v1824_v3 }
 0x314   :  { %v1779_v2 = vpop.xlane.xlu2 %1778 }
 0x315   :  { %v1413_v22 = vpop.xlane.xlu1 %1412 }
 0x316   :  { %v1513_v44 = vsub.f32 %v5651_v14, %v1413_v22 }
 0x317   :  { %v5833_v17 = vpop.eup %3995 }
 0x318   :  { %v5835_v18 = vpop.eup %3997  ;;  %v1622_v48 = vmul.f32 1.442695, %v1513_v44  ;;  %v1827_v59 = vpop.xlane.xlu0 %1826  ;;  %v1792_v57 = vsel %vm6448_vm6, %v5833_v17, 0.0  ;;  %vm6463_vm6 = vmmov %vm6372_vm0 }
 0x319   :  { %4001 = vrcp.f32 %v1827_v59  ;;  %v1840_v37 = vsel %vm6449_vm13, %v5835_v18, 0.0  ;;  %v2173_v5 = vpop.f32.mrf.mxu1  ;;  %v4000_v14 = vpop.eup %3999  ;;  %vm6464_vm13 = vmmov %vm6372_vm0 }
 0x31a   :  { %4003 = vpow2.f32 %v1622_v48  ;;  %1793 = vadd.xlane.f32.xlu0 %v1792_v57  ;;  %1841 = vadd.xlane.f32.xlu1 %v1840_v37  ;;  %v1970_v56 = vmul.f32 %v4000_v14, %v5626_v40  ;;  %v2300_v3 = vpack.c.bf16 %v2173_v5, %v2173_v5 }
 0x31b   :  { %4005 = vrcp.f32 %v1779_v2 }
 0x31c   :  { %v1464_v11 = vpop.xlane.xlu2 %1463  ;;  %v5850_v20 = vunpack.c.l.b16 %v2300_v3 }
 0x31d   :  { %v1530_v29 = vsub.f32 %v5669_v6, %v1464_v11 }
 0x31f   :  { %v4002_v39 = vpop.eup %4001  ;;  %v1656_v47 = vmul.f32 1.442695, %v1530_v29 }
 0x320   :  { %v5842_v36 = vpop.eup %4003  ;;  %v1776_v52 = vpop.xlane.xlu1 %1775  ;;  %v1971_v0 = vmul.f32 %v4002_v39, %v5662_v13 }
 0x321   :  { %4007 = vpow2.f32 %v1656_v47  ;;  %v1795_v42 = vsel %vm6450_vm14, %v5842_v36, 0.0  ;;  %v2175_v27 = vpop.f32.mrf.mxu1  ;;  %v4006_v46 = vpop.eup %4005  ;;  %vm6465_vm14 = vmmov %vm6372_vm0 }
 0x322   :  { %4009 = vrcp.f32 %v1776_v52  ;;  %1796 = vadd.xlane.f32.xlu1 %v1795_v42  ;;  %v2007_v9 = vpack.c.bf16 %v1971_v0, %v1970_v56  ;;  %v2301_v6 = vpack.c.bf16 %v2175_v27, %v2175_v27  ;;  %v1955_v44 = vmul.f32 %v4006_v46, %v5648_v26 }
 0x324   :  { %v1428_v1 = vpop.xlane.xlu0 %1427  ;;  %3582 = vmatmul.msk.bf16.gmra.mxu3 %vm6451_vm3, %v2007_v9  ;;  %v5852_v40 = vunpack.c.l.b16 %v2301_v6  ;;  %vm6466_vm3 = vmmov %vm6372_vm0 }
 0x325   :  { %v1518_v35 = vsub.f32 %v5682_v62, %v1428_v1 }
 0x326   :  { %v2718_v16 = vpack.c.b16 %v5852_v40, %v5850_v20 }
 0x327   :  { %v5854_v13 = vpop.eup %4007  ;;  %v1632_v19 = vmul.f32 1.442695, %v1518_v35 }
 0x328   :  { %v4010_v8 = vpop.eup %4009  ;;  %v1431_v2 = vpop.xlane.xlu1 %1430  ;;  %v1846_v22 = vsel %vm6452_vm5, %v5854_v13, 0.0  ;;  %vm6467_vm5 = vmmov %vm6372_vm0 }
 0x329   :  { %v1954_v62 = vmul.f32 %v4010_v8, %v5675_v34  ;;  %4011 = vpow2.f32 %v1632_v19  ;;  %v1519_v48 = vsub.f32 %v5687_v49, %v1431_v2  ;;  %v2178_v57 = vpop.f32.mrf.mxu1  ;;  %v5869_v34 = vpop.f32.mrf.mxu0 }
 0x32a   :  { %1847 = vadd.xlane.f32.xlu1 %v1846_v22  ;;  %v2302_v49 = vpack.c.bf16 %v2178_v57, %v2178_v57 }
 0x32b   :  { %v1634_v59 = vmul.f32 1.442695, %v1519_v48  ;;  %v1999_v37 = vpack.c.bf16 %v1955_v44, %v1954_v62 }
 0x32c   :  { %v1467_v5 = vpop.xlane.xlu0 %1466  ;;  %v5875_v0 = vunpack.c.l.b16 %v2302_v49 }
 0x32d   :  { %4013 = vpow2.f32 %v1634_v59  ;;  %v1531_v11 = vsub.f32 %v5695_v10, %v1467_v5  ;;  %3574 = vmatmul.msk.bf16.gmra.mxu1 %vm6453_vm9, %v1999_v37  ;;  %vm6468_vm9 = vmmov %vm6372_vm0 }
 0x32f   :  { %v5865_v14 = vpop.eup %4011  ;;  %v1658_v29 = vmul.f32 1.442695, %v1531_v11 }
 0x330   :  { %v1810_v26 = vsel %vm6454_vm10, %v5865_v14, 0.0  ;;  %v1830_v56 = vpop.xlane.xlu1 %1829  ;;  %vm6469_vm10 = vmmov %vm6372_vm0 }
 0x331   :  { %4015 = vpow2.f32 %v1658_v29  ;;  %1811 = vadd.xlane.f32.xlu2 %v1810_v26  ;;  %v2180_v47 = vpop.f32.mrf.mxu1  ;;  %v5885_v1 = vpop.f32.mrf.mxu0  ;;  %v3755_v26 = vld [vmem:[#allocation2 + $0x10] sm:$0xff] }
 0x332   :  { %v2303_v52 = vpack.c.bf16 %v2180_v47, %v2180_v47  ;;  %2483 = vmatpush.bf16.msrb.mxu0 %v3755_v26 }
 0x333   :  { %v5871_v39 = vpop.eup %4013 }
 0x334   :  { %v1813_v10 = vsel %vm6455_vm15, %v5871_v39, 0.0  ;;  %v5877_v42 = vunpack.c.l.b16 %v2303_v52  ;;  %vm6470_vm15 = vmmov %vm6372_vm0 }
 0x335   :  { %1814 = vadd.xlane.f32.xlu0 %v1813_v10 }
 0x337   :  { %v5879_v3 = vpop.eup %4015 }
 0x338   :  { %v1849_v27 = vsel %vm6456_vm12, %v5879_v3, 0.0  ;;  %v1782_v6 = vpop.xlane.xlu0 %1781  ;;  %vm6472_vm12 = vmmov %vm6372_vm0 }
 0x339   :  { %1850 = vadd.xlane.f32.xlu2 %v1849_v27  ;;  %v2183_v35 = vpop.f32.mrf.mxu1  ;;  %4017 = vrcp.f32 %v1782_v6  ;;  %v5887_v48 = vpop.f32.mrf.mxu0 }
 0x33a   :  { %v2304_v8 = vpack.c.bf16 %v2183_v35, %v2183_v35 }
 0x33c   :  { %v5891_v37 = vunpack.c.l.b16 %v2304_v8 }
 0x33d   :  { %v1785_v46 = vpop.xlane.xlu1 %1784 }
 0x33e   :  { %4019 = vrcp.f32 %v1785_v46 }
 0x33f   :  { %v4018_v19 = vpop.eup %4017  ;;  %4021 = vrcp.f32 %v1830_v56 }
 0x340   :  { %v1956_v59 = vmul.f32 %v4018_v19, %v5709_v55  ;;  %v3754_v19 = vld [vmem:[#allocation2 + $0x8] sm:$0xff] }
 0x341   :  { %v2185_v2 = vpop.f32.mrf.mxu1  ;;  %v5900_v27 = vpop.f32.mrf.mxu0  ;;  %2455 = vmatpush.bf16.msrb.mxu3 %v3754_v19 }
 0x342   :  { %v2305_v44 = vpack.c.bf16 %v2185_v2, %v2185_v2  ;;  %v2281_v20 = vpack.c.bf16 %v5900_v27, %v5900_v27 }
 0x344   :  { %v4020_v22 = vpop.eup %4019  ;;  %v1833_v62 = vpop.xlane.xlu2 %1832  ;;  %v5893_v5 = vunpack.c.l.b16 %v2305_v44 }
 0x345   :  { %v1957_v57 = vmul.f32 %v4020_v22, %v5715_v21  ;;  %4023 = vrcp.f32 %v1833_v62  ;;  %v4022_v49 = vpop.eup %4021 }
 0x346   :  { %v1972_v55 = vmul.f32 %v4022_v49, %v5700_v4 }
 0x347   :  { %v2000_v11 = vpack.c.bf16 %v1957_v57, %v1956_v59 }
 0x349   :  { %3575 = vmatmul.msk.bf16.gmra.mxu1 %vm6457_vm7, %v2000_v11  ;;  %v2188_v52 = vpop.f32.mrf.mxu1  ;;  %vm6473_vm7 = vmmov %vm6372_vm0 }
 0x34a   :  { %v2306_v6 = vpack.c.bf16 %v2188_v52, %v2188_v52 }
 0x34b   :  { %v4024_v47 = vpop.eup %4023 }
 0x34c   :  { %v1973_v21 = vmul.f32 %v4024_v47, %v5724_v7  ;;  %v1800_v10 = vpop.xlane.xlu2 %1799  ;;  %v5903_v8 = vunpack.c.l.b16 %v2306_v6 }
 0x34e   :  { %v2008_v56 = vpack.c.bf16 %v1973_v21, %v1972_v55 }
 0x350   :  { %3583 = vmatmul.msk.bf16.gmra.mxu3 %vm6458_vm1, %v2008_v56  ;;  %vm6474_vm1 = vmmov %vm6372_vm0 }
 0x351   :  { %v2190_v35 = vpop.f32.mrf.mxu1 }
 0x352   :  { %v2307_v46 = vpack.c.bf16 %v2190_v35, %v2190_v35 }
 0x354   :  { %v5905_v2 = vunpack.c.l.b16 %v2307_v46  ;;  %v1839_v7 = vpop.xlane.xlu2 %1838 }
 0x355   :  { %v2128_v22 = vpop.f32.mrf.mxu0  ;;  %4025 = vrcp.f32 %v1839_v7 }
 0x356   :  { %v2282_v59 = vpack.c.bf16 %v2128_v22, %v2128_v22 }
 0x358   :  { %v2464_v49 = vunpack.c.l.b16 %v2282_v59 }
 0x359   :  { %v2193_v44 = vpop.f32.mrf.mxu1 }
 0x35a   :  { %v2308_v47 = vpack.c.bf16 %v2193_v44, %v2193_v44 }
 0x35b   :  { %v4026_v26 = vpop.eup %4025 }
 0x35c   :  { %v1836_v62 = vpop.xlane.xlu1 %1835  ;;  %v1975_v19 = vmul.f32 %v4026_v26, %v5750_v41  ;;  %v5911_v7 = vunpack.c.l.b16 %v2308_v47 }
 0x35d   :  { %4027 = vrcp.f32 %v1836_v62  ;;  %v2130_v57 = vpop.f32.mrf.mxu0 }
 0x35e   :  { %v2283_v11 = vpack.c.bf16 %v2130_v57, %v2130_v57  ;;  %4029 = vrcp.f32 %v1800_v10 }
 0x360   :  { %v2465_v52 = vunpack.c.l.b16 %v2283_v11 }
 0x361   :  { %v2195_v21 = vpop.f32.mrf.mxu1 }
 0x362   :  { %v2466_v56 = vpack.c.b16 %v2465_v52, %v2464_v49  ;;  %v2309_v6 = vpack.c.bf16 %v2195_v21, %v2195_v21 }
 0x363   :  { %v4028_v55 = vpop.eup %4027 }
 0x364   :  { %v1803_v35 = vpop.xlane.xlu0 %1802  ;;  %v1974_v46 = vmul.f32 %v4028_v55, %v5763_v61  ;;  %v5913_v22 = vunpack.c.l.b16 %v2309_v6  ;;  %3601 = vmatmul.msk.bf16.vlgmr.msrb.gmra.mxu0 %vm6459_vm4, %v2466_v56  ;;  %v4030_v59 = vpop.eup %4029  ;;  %v3758_v6 = vld [vmem:[#allocation2 + $0x28] sm:$0xff]  ;;  %vm6475_vm4 = vmmov %vm6372_vm0 }
 0x365   :  { %4031 = vrcp.f32 %v1803_v35  ;;  %v5916_v44 = vpop.f32.mrf.mxu0  ;;  %v1962_v61 = vmul.f32 %v4030_v59, %v5729_v30  ;;  %2567 = vmatpush.bf16.msra.mxu0 %v3758_v6 }
 0x366   :  { %v2009_v62 = vpack.c.bf16 %v1975_v19, %v1974_v46 }
 0x368   :  { %3584 = vmatmul.msk.bf16.gmra.mxu3 %vm6460_vm11, %v2009_v62  ;;  %vm6476_vm11 = vmmov %vm6372_vm0 }
 0x36b   :  { %v4032_v57 = vpop.eup %4031 }
 0x36c   :  { %v1963_v41 = vmul.f32 %v4032_v57, %v5774_v54  ;;  %v1788_v47 = vpop.xlane.xlu0 %1787 }
 0x36d   :  { %v2198_v11 = vpop.f32.mrf.mxu1  ;;  %v5923_v49 = vpop.f32.mrf.mxu0  ;;  %4033 = vrcp.f32 %v1788_v47 }
 0x36e   :  { %v2003_v26 = vpack.c.bf16 %v1963_v41, %v1962_v61  ;;  %v2310_v52 = vpack.c.bf16 %v2198_v11, %v2198_v11 }
 0x370   :  { %3578 = vmatmul.msk.bf16.vlgmr.msrb.gmra.mxu2 %vm6372_vm0, %v2003_v26  ;;  %v5928_v46 = vunpack.c.l.b16 %v2310_v52 }
 0x373   :  { %v4034_v54 = vpop.eup %4033 }
 0x374   :  { %v1791_v55 = vpop.xlane.xlu1 %1790  ;;  %v1958_v59 = vmul.f32 %v4034_v54, %v5785_v53 }
 0x375   :  { %4035 = vrcp.f32 %v1791_v55  ;;  %v2200_v21 = vpop.f32.mrf.mxu1  ;;  %v5926_v35 = vpop.f32.mrf.mxu0  ;;  %v3753_v55 = vld [vmem:[#allocation2] sm:$0xff] }
 0x376   :  { %v2311_v56 = vpack.c.bf16 %v2200_v21, %v2200_v21  ;;  %v3761_v21 = vld [vmem:[#allocation2 + $0x40] sm:$0xff]  ;;  %2427 = vmatpush.bf16.msra.mxu2 %v3753_v55 }
 0x377   :  { %2651 = vmatpush.bf16.msrb.mxu0 %v3761_v21 }
 0x378   :  { %v5930_v30 = vunpack.c.l.b16 %v2311_v56 }
 0x37b   :  { %v4036_v62 = vpop.eup %4035 }
 0x37c   :  { %v1959_v57 = vmul.f32 %v4036_v62, %v5798_v50  ;;  %v1806_v26 = vpop.xlane.xlu2 %1805 }
 0x37d   :  { %v5936_v61 = vpop.f32.mrf.mxu1  ;;  %v5938_v11 = vpop.f32.mrf.mxu0  ;;  %4037 = vrcp.f32 %v1806_v26 }
 0x37e   :  { %v2001_v41 = vpack.c.bf16 %v1959_v57, %v1958_v59 }
 0x380   :  { %3576 = vmatmul.msk.bf16.gmra.mxu1 %vm6461_vm2, %v2001_v41  ;;  %vm6478_vm2 = vmmov %vm6372_vm0 }
 0x383   :  { %v4038_v53 = vpop.eup %4037 }
 0x384   :  { %v1845_v50 = vpop.xlane.xlu2 %1844  ;;  %v1964_v62 = vmul.f32 %v4038_v53, %v5810_v28 }
 0x385   :  { %v1809_v47 = vpop.xlane.xlu0 %1808  ;;  %v5941_v52 = vpop.f32.mrf.mxu1 }
 0x386   :  { %4039 = vrcp.f32 %v1809_v47  ;;  %v2143_v56 = vpop.f32.mrf.mxu0 }
 0x387   :  { %4041 = vrcp.f32 %v1845_v50  ;;  %v2288_v57 = vpack.c.bf16 %v2143_v56, %v2143_v56 }
 0x389   :  { %v2548_v47 = vunpack.c.l.b16 %v2288_v57 }
 0x38c   :  { %v4040_v6 = vpop.eup %4039 }
 0x38d   :  { %v1842_v54 = vpop.xlane.xlu1 %1841  ;;  %v1965_v59 = vmul.f32 %v4040_v6, %v5823_v25  ;;  %v2208_v41 = vpop.f32.mrf.mxu1  ;;  %v3764_v6 = vld [vmem:[#allocation2 + $0x58] sm:$0xff] }
 0x38e   :  { %4043 = vrcp.f32 %v1842_v54  ;;  %v2145_v26 = vpop.f32.mrf.mxu0  ;;  %v1794_v29 = vpop.xlane.xlu0 %1793  ;;  %v2314_v38 = vpack.c.bf16 %v2208_v41, %v2208_v41 }
 0x38f   :  { %v2004_v19 = vpack.c.bf16 %v1965_v59, %v1964_v62  ;;  %v2289_v10 = vpack.c.bf16 %v2145_v26, %v2145_v26  ;;  %v4042_v21 = vpop.eup %4041  ;;  %4045 = vrcp.f32 %v1794_v29  ;;  %v3767_v26 = vld [vmem:[#allocation2 + $0x70] sm:$0xff] }
 0x390   :  { %v1977_v28 = vmul.f32 %v4042_v21, %v5821_v58 }
 0x391   :  { %3579 = vmatmul.msk.bf16.gmra.mxu2 %vm6462_vm8, %v2004_v19  ;;  %v2549_v55 = vunpack.c.l.b16 %v2289_v10  ;;  %v5949_v19 = vunpack.c.l.b16 %v2314_v38  ;;  %v2294_v38 = vpack.c.bf16 %v5767_v31, %v5767_v31  ;;  %vm6479_vm8 = vmmov %vm6372_vm0 }
 0x393   :  { %v2550_v9 = vpack.c.b16 %v2549_v55, %v2548_v47  ;;  %v2632_v41 = vunpack.c.l.b16 %v2294_v38  ;;  %v3770_v38 = vld [vmem:[#allocation2 + $0x88] sm:$0xff] }
 0x394   :  { %v4044_v50 = vpop.eup %4043 }
 0x395   :  { %v1797_v4 = vpop.xlane.xlu1 %1796  ;;  %v1976_v25 = vmul.f32 %v4044_v50, %v5835_v18  ;;  %3616 = vmatmul.msk.bf16.vlgmr.msra.gmra.mxu0 %vm6463_vm6, %v2550_v9  ;;  %v2210_v56 = vpop.f32.mrf.mxu1  ;;  %v2295_v18 = vpack.c.bf16 %v5779_v43, %v5779_v43  ;;  %vm6480_vm6 = vmmov %vm6372_vm0 }
 0x396   :  { %4047 = vrcp.f32 %v1797_v4  ;;  %v2315_v53 = vpack.c.bf16 %v2210_v56, %v2210_v56  ;;  %2735 = vmatpush.bf16.msra.mxu0 %v3764_v6  ;;  %v4046_v29 = vpop.eup %4045 }
 0x397   :  { %v2010_v54 = vpack.c.bf16 %v1977_v28, %v1976_v25  ;;  %v1960_v9 = vmul.f32 %v4046_v29, %v5833_v17  ;;  %v2633_v57 = vunpack.c.l.b16 %v2295_v18  ;;  %v5964_v28 = vpop.f32.mrf.mxu3 }
 0x398   :  { %v5951_v10 = vunpack.c.l.b16 %v2315_v53 }
 0x399   :  { %3585 = vmatmul.msk.bf16.gmra.mxu3 %vm6464_vm13, %v2010_v54  ;;  %v2634_v47 = vpack.c.b16 %v2633_v57, %v2632_v41  ;;  %vm6481_vm13 = vmmov %vm6372_vm0 }
 0x39a   :  { %v2914_v58 = vpack.c.b16 %v5951_v10, %v5949_v19 }
 0x39c   :  { %v4048_v62 = vpop.eup %4047 }
 0x39d   :  { %v1961_v4 = vmul.f32 %v4048_v62, %v5842_v36  ;;  %v1848_v43 = vpop.xlane.xlu1 %1847 }
 0x39f   :  { %v2002_v59 = vpack.c.bf16 %v1961_v4, %v1960_v9  ;;  %v3756_v9 = vld [vmem:[#allocation2 + $0x18] sm:$0xff]  ;;  %v3757_v4 = vld [vmem:[#allocation2 + $0x20] sm:$0xff] }
 0x3a0   :  { %2511 = vmatpush.bf16.msrb.mxu2 %v3756_v9  ;;  %2539 = vmatpush.bf16.msra.mxu3 %v3757_v4 }
 0x3a1   :  { %3577 = vmatmul.msk.bf16.gmra.mxu1 %vm6465_vm14, %v2002_v59  ;;  %vm6482_vm14 = vmmov %vm6372_vm0 }
 0x3a4   :  { %v1812_v55 = vpop.xlane.xlu2 %1811 }
 0x3a5   :  { %3631 = vmatmul.msk.bf16.vlgmr.msrb.gmra.mxu0 %vm6466_vm3, %v2634_v47  ;;  %4049 = vrcp.f32 %v1812_v55  ;;  %v2278_v47 = vpack.c.bf16 %v5869_v34, %v5869_v34  ;;  %vm6484_vm3 = vmmov %vm6372_vm0 }
 0x3a6   :  { %2819 = vmatpush.bf16.msrb.mxu0 %v3767_v26 }
 0x3a7   :  { %v2408_v40 = vunpack.c.l.b16 %v2278_v47 }
 0x3a8   :  { %v1815_v21 = vpop.xlane.xlu0 %1814 }
 0x3a9   :  { %4051 = vrcp.f32 %v1815_v21  ;;  %v3759_v21 = vld [vmem:[#allocation2 + $0x30] sm:$0xff] }
 0x3aa   :  { %v2213_v17 = vpop.f32.mrf.mxu1  ;;  %4053 = vrcp.f32 %v1848_v43 }
 0x3ab   :  { %v4050_v50 = vpop.eup %4049  ;;  %v2316_v6 = vpack.c.bf16 %v2213_v17, %v2213_v17 }
 0x3ac   :  { %v1851_v36 = vpop.xlane.xlu2 %1850  ;;  %v1966_v25 = vmul.f32 %v4050_v50, %v5865_v14  ;;  %v3773_v50 = vld [vmem:[#allocation2 + $0xa0] sm:$0xff] }
 0x3ad   :  { %4055 = vrcp.f32 %v1851_v36  ;;  %v5971_v41 = vunpack.c.l.b16 %v2316_v6  ;;  %v2437_v36 = vunpack.c.l.b16 %v2281_v20 }
 0x3af   :  { %v4052_v31 = vpop.eup %4051 }
 0x3b0   :  { %v1967_v56 = vmul.f32 %v4052_v31, %v5871_v39  ;;  %v4054_v53 = vpop.eup %4053 }
 0x3b1   :  { %v1978_v59 = vmul.f32 %v4054_v53, %v5854_v13  ;;  %v5982_v13 = vpop.f32.mrf.mxu3  ;;  %v2313_v53 = vpack.c.bf16 %v5941_v52, %v5941_v52 }
 0x3b2   :  { %v2215_v54 = vpop.f32.mrf.mxu1  ;;  %v2005_v29 = vpack.c.bf16 %v1967_v56, %v1966_v25  ;;  %v6471_v25 = vpack.c.b16 %v5905_v2, %v5903_v8  ;;  %v2284_v56 = vpack.c.bf16 %v5916_v44, %v5916_v44  ;;  %v2287_v8 = vpack.c.bf16 %v5938_v11, %v5938_v11  ;;  %v3763_v11 = vld [vmem:[#allocation2 + $0x50] sm:$0xff] }
 0x3b3   :  { %v4056_v62 = vpop.eup %4055  ;;  %v2317_v18 = vpack.c.bf16 %v2215_v54, %v2215_v54  ;;  %v2312_v2 = vpack.c.bf16 %v5936_v61, %v5936_v61 }
 0x3b4   :  { %v1979_v57 = vmul.f32 %v4056_v62, %v5879_v3  ;;  %3580 = vmatmul.msk.bf16.gmra.mxu2 %vm6467_vm5, %v2005_v29  ;;  %v2279_v3 = vpack.c.bf16 %v5885_v1, %v5885_v1  ;;  %v3760_v1 = vld [vmem:[#allocation2 + $0x38] sm:$0xff]  ;;  %v2492_v29 = vunpack.c.l.b16 %v2284_v56  ;;  %v2885_v62 = vunpack.c.l.b16 %v2313_v53  ;;  %v3766_v56 = vld [vmem:[#allocation2 + $0x68] sm:$0xff]  ;;  %vm6486_vm5 = vmmov %vm6372_vm0 }
 0x3b5   :  { %v5973_v14 = vunpack.c.l.b16 %v2317_v18  ;;  %3646 = vmatmul.msk.bf16.vlgmr.msra.gmra.mxu0 %vm6468_vm9, %v2718_v16  ;;  %v2280_v16 = vpack.c.bf16 %v5887_v48, %v5887_v48  ;;  %v2285_v48 = vpack.c.bf16 %v5923_v49, %v5923_v49  ;;  %v2286_v49 = vpack.c.bf16 %v5926_v35, %v5926_v35  ;;  %v3762_v18 = vld [vmem:[#allocation2 + $0x48] sm:$0xff]  ;;  %vm6487_vm9 = vmmov %vm6372_vm0 }
 0x3b6   :  { %v2011_v39 = vpack.c.bf16 %v1979_v57, %v1978_v59  ;;  %2903 = vmatpush.bf16.msra.mxu0 %v3770_v38  ;;  %v2409_v55 = vunpack.c.l.b16 %v2279_v3  ;;  %v2521_v4 = vunpack.c.l.b16 %v2287_v8  ;;  %v2884_v44 = vunpack.c.l.b16 %v2312_v2 }
 0x3b7   :  { %v2942_v26 = vpack.c.b16 %v5973_v14, %v5971_v41  ;;  %v2436_v31 = vunpack.c.l.b16 %v2280_v16  ;;  %v2493_v6 = vunpack.c.l.b16 %v2285_v48  ;;  %v2520_v59 = vunpack.c.l.b16 %v2286_v49  ;;  %v3781_v14 = vld [vmem:[#allocation2 + $0xe0] sm:$0xff] }
 0x3b8   :  { %3586 = vmatmul.msk.bf16.gmra.mxu3 %vm6469_vm10, %v2011_v39  ;;  %v2410_v17 = vpack.c.b16 %v2409_v55, %v2408_v40  ;;  %v2886_v52 = vpack.c.b16 %v2885_v62, %v2884_v44  ;;  %v2293_v55 = vpack.c.bf16 %v5757_v45, %v5757_v45  ;;  %v6477_v45 = vpack.c.b16 %v5733_v12, %v5731_v33  ;;  %vm6489_vm10 = vmmov %vm6372_vm0 }
 0x3b9   :  { %v5992_v43 = vpop.f32.mrf.mxu3  ;;  %v2438_v34 = vpack.c.b16 %v2437_v36, %v2436_v31  ;;  %v2494_v9 = vpack.c.b16 %v2493_v6, %v2492_v29  ;;  %v2522_v57 = vpack.c.b16 %v2521_v4, %v2520_v59  ;;  %v3765_v31 = vld [vmem:[#allocation2 + $0x60] sm:$0xff]  ;;  %v3779_v6 = vld [vmem:[#allocation2 + $0xd0] sm:$0xff]  ;;  %v2296_v8 = vpack.c.bf16 %v5789_v60, %v5789_v60  ;;  %v3768_v29 = vld [vmem:[#allocation2 + $0x78] sm:$0xff] }
 0x3ba   :  { %v2299_v33 = vpack.c.bf16 %v5830_v63, %v5830_v63 }
 0x3bb   :  { %v2660_v12 = vunpack.c.l.b16 %v2296_v8  ;;  %v3780_v8 = vld [vmem:[#allocation2 + $0xd8] sm:$0xff] }
 0x3bc   :  { %v2689_v62 = vunpack.c.l.b16 %v2299_v33 }
 0x3c1   :  { %v6002_v27 = vpop.f32.mrf.mxu3 }
 0x3c4   :  { %3591 = vmatmul.msk.bf16.vlgmr.msra.gmra.mxu2 %vm6470_vm15, %v2410_v17  ;;  %vm6491_vm15 = vmmov %vm6372_vm0 }
 0x3c5   :  { %2595 = vmatpush.bf16.msra.mxu2 %v3759_v21  ;;  %3661 = vmatmul.msk.bf16.vlgmr.msrb.gmra.mxu0 %vm6472_vm12, %v6471_v25  ;;  %v2292_v21 = vpack.c.bf16 %v5745_v24, %v5745_v24  ;;  %v2297_v24 = vpack.c.bf16 %v5804_v32, %v5804_v32  ;;  %v3769_v32 = vld [vmem:[#allocation2 + $0x80] sm:$0xff]  ;;  %vm6492_vm12 = vmmov %vm6372_vm0 }
 0x3c6   :  { %2987 = vmatpush.bf16.msrb.mxu0 %v3773_v50  ;;  %v2218_v54 = vpop.f32.mrf.mxu1  ;;  %v3776_v50 = vld [vmem:[#allocation2 + $0xb8] sm:$0xff] }
 0x3c7   :  { %v2318_v20 = vpack.c.bf16 %v2218_v54, %v2218_v54  ;;  %v2604_v25 = vunpack.c.l.b16 %v2292_v21  ;;  %v2661_v2 = vunpack.c.l.b16 %v2297_v24  ;;  %v2298_v54 = vpack.c.bf16 %v5816_v51, %v5816_v51  ;;  %v3771_v51 = vld [vmem:[#allocation2 + $0x90] sm:$0xff]  ;;  %v3774_v21 = vld [vmem:[#allocation2 + $0xa8] sm:$0xff] }
 0x3c8   :  { %3596 = vmatmul.msk.bf16.vlgmr.msrb.gmra.mxu3 %vm6473_vm7, %v2438_v34  ;;  %vm6493_vm7 = vmmov %vm6372_vm0 }
 0x3c9   :  { %2623 = vmatpush.bf16.msrb.mxu3 %v3760_v1  ;;  %v2605_v1 = vunpack.c.l.b16 %v2293_v55  ;;  %v2968_v34 = vunpack.c.l.b16 %v2318_v20  ;;  %v2662_v49 = vpack.c.b16 %v2661_v2, %v2660_v12 }
 0x3cb   :  { %v2606_v53 = vpack.c.b16 %v2605_v1, %v2604_v25 }
 0x3ce   :  { %v2220_v61 = vpop.f32.mrf.mxu1 }
 0x3cf   :  { %v2319_v3 = vpack.c.bf16 %v2220_v61, %v2220_v61  ;;  %v3772_v61 = vld [vmem:[#allocation2 + $0x98] sm:$0xff] }
 0x3d1   :  { %v2969_v17 = vunpack.c.l.b16 %v2319_v3  ;;  %v2330_v3 = vpack.c.bf16 %v5964_v28, %v5964_v28  ;;  %v6490_v28 = vpack.c.b16 %v5930_v30, %v5928_v46 }
 0x3d3   :  { %v2258_v38 = vpop.f32.mrf.mxu3  ;;  %v2970_v48 = vpack.c.b16 %v2969_v17, %v2968_v34  ;;  %v3136_v20 = vunpack.c.l.b16 %v2330_v3  ;;  %v2333_v3 = vpack.c.bf16 %v6002_v27, %v6002_v27 }
 0x3d4   :  { %3606 = vmatmul.msk.bf16.vlgmr.msrb.gmra.mxu2 %vm6474_vm1, %v2494_v9  ;;  %v2334_v35 = vpack.c.bf16 %v2258_v38, %v2258_v38  ;;  %v2688_v9 = vunpack.c.l.b16 %v2298_v54  ;;  %vm6494_vm1 = vmmov %vm6372_vm0 }
 0x3d5   :  { %2679 = vmatpush.bf16.msrb.mxu2 %v3762_v18  ;;  %3676 = vmatmul.msk.bf16.vlgmr.msra.gmra.mxu0 %vm6475_vm4, %v2886_v52  ;;  %vm6495_vm4 = vmmov %vm6372_vm0 }
 0x3d6   :  { %v6019_v40 = vunpack.c.l.b16 %v2334_v35  ;;  %3071 = vmatpush.bf16.msra.mxu0 %v3776_v50  ;;  %v2690_v4 = vpack.c.b16 %v2689_v62, %v2688_v9  ;;  %v2331_v35 = vpack.c.bf16 %v5982_v13, %v5982_v13  ;;  %v6488_v13 = vpack.c.b16 %v5913_v22, %v5911_v7  ;;  %v3777_v7 = vld [vmem:[#allocation2 + $0xc0] sm:$0xff] }
 0x3d8   :  { %3611 = vmatmul.msk.bf16.vlgmr.msra.gmra.mxu3 %vm6476_vm11, %v2522_v57  ;;  %v6483_v57 = vpack.c.b16 %v5877_v42, %v5875_v0  ;;  %v3137_v55 = vunpack.c.l.b16 %v2331_v35  ;;  %vm6496_vm11 = vmmov %vm6372_vm0 }
 0x3d9   :  { %2707 = vmatpush.bf16.msra.mxu3 %v3763_v11  ;;  %v3782_v11 = vld [vmem:[#allocation2 + $0xe8] sm:$0xff] }
 0x3da   :  { %v3138_v42 = vpack.c.b16 %v3137_v55, %v3136_v20  ;;  %v2332_v55 = vpack.c.bf16 %v5992_v43, %v5992_v43 }
 0x3db   :  { %v2260_v39 = vpop.f32.mrf.mxu3 }
 0x3dc   :  { %v2335_v47 = vpack.c.bf16 %v2260_v39, %v2260_v39  ;;  %v6485_v39 = vpack.c.b16 %v5893_v5, %v5891_v37  ;;  %v3775_v5 = vld [vmem:[#allocation2 + $0xb0] sm:$0xff] }
 0x3de   :  { %v6021_v16 = vunpack.c.l.b16 %v2335_v47 }
 0x3e0   :  { %v3194_v36 = vpack.c.b16 %v6021_v16, %v6019_v40 }
 0x3e1   :  { %v2485_v41 = vpop.f32.mrf.mxu0 }
 0x3e4   :  { %3621 = vmatmul.msk.bf16.vlgmr.msra.gmra.mxu2 %vm6372_vm0, %v6477_v45  ;;  %v3778_v45 = vld [vmem:[#allocation2 + $0xc8] sm:$0xff] }
 0x3e5   :  { %2763 = vmatpush.bf16.msra.mxu2 %v3765_v31  ;;  %3691 = vmatmul.msk.bf16.vlgmr.msrb.gmra.mxu0 %vm6478_vm2, %v2970_v48  ;;  %vm6497_vm2 = vmmov %vm6372_vm0 }
 0x3e6   :  { %3155 = vmatpush.bf16.msrb.mxu0 %v3779_v6 }
 0x3e8   :  { %3626 = vmatmul.msk.bf16.vlgmr.msrb.gmra.mxu3 %vm6479_vm8, %v2606_v53  ;;  %vm6498_vm8 = vmmov %vm6372_vm0 }
 0x3e9   :  { %2791 = vmatpush.bf16.msrb.mxu3 %v3766_v56 }
 0x3eb   :  { %v2263_v47 = vpop.f32.mrf.mxu3 }
 0x3ec   :  { %v2336_v31 = vpack.c.bf16 %v2263_v47, %v2263_v47 }
 0x3ee   :  { %v3220_v34 = vunpack.c.l.b16 %v2336_v31 }
 0x3f3   :  { %v2233_v18 = vpop.f32.mrf.mxu2  ;;  %v2265_v37 = vpop.f32.mrf.mxu3 }
 0x3f4   :  { %3636 = vmatmul.msk.bf16.vlgmr.msrb.gmra.mxu2 %vm6480_vm6, %v2662_v49  ;;  %v2324_v60 = vpack.c.bf16 %v2233_v18, %v2233_v18  ;;  %v2337_v17 = vpack.c.bf16 %v2265_v37, %v2265_v37  ;;  %vm6499_vm6 = vmmov %vm6372_vm0 }
 0x3f5   :  { %2847 = vmatpush.bf16.msrb.mxu2 %v3768_v29 }
 0x3f6   :  { %v3052_v38 = vunpack.c.l.b16 %v2324_v60  ;;  %v3221_v1 = vunpack.c.l.b16 %v2337_v17 }
 0x3f8   :  { %3641 = vmatmul.msk.bf16.vlgmr.msra.gmra.mxu3 %vm6481_vm13, %v2690_v4  ;;  %v3222_v25 = vpack.c.b16 %v3221_v1, %v3220_v34  ;;  %vm6500_vm13 = vmmov %vm6372_vm0 }
 0x3f9   :  { %2875 = vmatpush.bf16.msra.mxu3 %v3769_v32  ;;  %v2487_v32 = vpop.f32.mrf.mxu0 }
 0x3fb   :  { %v2235_v44 = vpop.f32.mrf.mxu2 }
 0x3fc   :  { %v2325_v63 = vpack.c.bf16 %v2235_v44, %v2235_v44 }
 0x3fd   :  { %v2223_v0 = vpop.f32.mrf.mxu1 }
 0x3fe   :  { %v3053_v59 = vunpack.c.l.b16 %v2325_v63  ;;  %v2320_v53 = vpack.c.bf16 %v2223_v0, %v2223_v0  ;;  %v3165_v0 = vunpack.c.l.b16 %v2333_v3 }
 0x400   :  { %v3054_v52 = vpack.c.b16 %v3053_v59, %v3052_v38  ;;  %v2996_v10 = vunpack.c.l.b16 %v2320_v53  ;;  %v3783_v38 = vld [vmem:[#allocation2 + $0xf0] sm:$0xff] }
 0x402   :  { %3706 = vmatmul.msk.bf16.vlgmr.msra.gmra.mxu0 %vm6482_vm14, %v3054_v52  ;;  %vm6501_vm14 = vmmov %vm6372_vm0 }
 0x403   :  { %3239 = vmatpush.bf16.msra.mxu0 %v3782_v11 }
 0x404   :  { %3651 = vmatmul.msk.bf16.vlgmr.msra.gmra.mxu2 %vm6484_vm3, %v6483_v57  ;;  %v3784_v57 = vld [vmem:[#allocation2 + $0xf8] sm:$0xff] }
 0x405   :  { %2931 = vmatpush.bf16.msra.mxu2 %v3771_v51  ;;  %v2225_v50 = vpop.f32.mrf.mxu1 }
 0x406   :  { %v2321_v30 = vpack.c.bf16 %v2225_v50, %v2225_v50 }
 0x408   :  { %3656 = vmatmul.msk.bf16.vlgmr.msrb.gmra.mxu3 %vm6486_vm5, %v6485_v39  ;;  %v2997_v24 = vunpack.c.l.b16 %v2321_v30 }
 0x409   :  { %2959 = vmatpush.bf16.msrb.mxu3 %v3772_v61 }
 0x40a   :  { %v2998_v2 = vpack.c.b16 %v2997_v24, %v2996_v10 }
 0x412   :  { %3721 = vmatmul.msk.bf16.vlgmr.msrb.gmra.mxu0 %vm6487_vm9, %v3138_v42  ;;  %v2569_v35 = vpop.f32.mrf.mxu0  ;;  %vm6502_vm9 = vmmov %vm6372_vm0 }
 0x414   :  { %3666 = vmatmul.msk.bf16.vlgmr.msrb.gmra.mxu2 %vm6489_vm10, %v6488_v13  ;;  %v2238_v22 = vpop.f32.mrf.mxu2  ;;  %vm6503_vm10 = vmmov %vm6372_vm0 }
 0x415   :  { %3015 = vmatpush.bf16.msrb.mxu2 %v3774_v21  ;;  %v2326_v18 = vpack.c.bf16 %v2238_v22, %v2238_v22  ;;  %v3164_v21 = vunpack.c.l.b16 %v2332_v55 }
 0x417   :  { %v3080_v60 = vunpack.c.l.b16 %v2326_v18  ;;  %v3166_v37 = vpack.c.b16 %v3165_v0, %v3164_v21 }
 0x418   :  { %3671 = vmatmul.msk.bf16.vlgmr.msra.gmra.mxu3 %vm6491_vm15, %v6490_v28  ;;  %vm6504_vm15 = vmmov %vm6372_vm0 }
 0x419   :  { %3043 = vmatpush.bf16.msra.mxu3 %v3775_v5 }
 0x41a   :  { %v2571_v13 = vpop.f32.mrf.mxu0 }
 0x41c   :  { %v6074_v46 = vpop.f32.mrf.mxu3  ;;  %v2240_v19 = vpop.f32.mrf.mxu2 }
 0x41d   :  { %v2327_v49 = vpack.c.bf16 %v2240_v19, %v2240_v19  ;;  %v2338_v34 = vpack.c.bf16 %v6074_v46, %v6074_v46 }
 0x41e   :  { %v2228_v48 = vpop.f32.mrf.mxu1 }
 0x41f   :  { %v3081_v9 = vunpack.c.l.b16 %v2327_v49  ;;  %v3248_v30 = vunpack.c.l.b16 %v2338_v34 }
 0x421   :  { %v3082_v59 = vpack.c.b16 %v3081_v9, %v3080_v60 }
 0x422   :  { %3736 = vmatmul.msk.bf16.vlgmr.msra.gmra.mxu0 %vm6492_vm12, %v3222_v25  ;;  %v2653_v43 = vpop.f32.mrf.mxu0  ;;  %vm6505_vm12 = vmmov %vm6372_vm0 }
 0x424   :  { %3681 = vmatmul.msk.bf16.vlgmr.msra.gmra.mxu2 %vm6493_vm7, %v2914_v58  ;;  %v2322_v58 = vpack.c.bf16 %v2228_v48, %v2228_v48  ;;  %v2270_v12 = vpop.f32.mrf.mxu3  ;;  %vm6506_vm7 = vmmov %vm6372_vm0 }
 0x425   :  { %3099 = vmatpush.bf16.msra.mxu2 %v3777_v7  ;;  %v2339_v27 = vpack.c.bf16 %v2270_v12, %v2270_v12 }
 0x426   :  { %v2230_v56 = vpop.f32.mrf.mxu1  ;;  %v3024_v54 = vunpack.c.l.b16 %v2322_v58 }
 0x427   :  { %v2323_v6 = vpack.c.bf16 %v2230_v56, %v2230_v56  ;;  %v3249_v48 = vunpack.c.l.b16 %v2339_v27 }
 0x428   :  { %3686 = vmatmul.msk.bf16.vlgmr.msrb.gmra.mxu3 %vm6494_vm1, %v2942_v26 }
 0x429   :  { %3127 = vmatpush.bf16.msrb.mxu3 %v3778_v45  ;;  %v3025_v33 = vunpack.c.l.b16 %v2323_v6  ;;  %v3250_v24 = vpack.c.b16 %v3249_v48, %v3248_v30 }
 0x42b   :  { %v3026_v26 = vpack.c.b16 %v3025_v33, %v3024_v54 }
 0x434   :  { %3696 = vmatmul.msk.bf16.vlgmr.msrb.gmra.mxu2 %vm6495_vm4, %v2998_v2 }
 0x435   :  { %3183 = vmatpush.bf16.msrb.mxu2 %v3780_v8 }
 0x437   :  { %v2243_v29 = vpop.f32.mrf.mxu2 }
 0x438   :  { %3701 = vmatmul.msk.bf16.vlgmr.msra.gmra.mxu3 %vm6496_vm11, %v3026_v26  ;;  %v2328_v44 = vpack.c.bf16 %v2243_v29, %v2243_v29 }
 0x439   :  { %3211 = vmatpush.bf16.msra.mxu3 %v3781_v14 }
 0x43a   :  { %v3108_v11 = vunpack.c.l.b16 %v2328_v44 }
 0x43b   :  { %v2273_v62 = vpop.f32.mrf.mxu3 }
 0x43c   :  { %v2340_v56 = vpack.c.bf16 %v2273_v62, %v2273_v62 }
 0x43e   :  { %v3276_v40 = vunpack.c.l.b16 %v2340_v56 }
 0x43f   :  { %v2245_v4 = vpop.f32.mrf.mxu2 }
 0x440   :  { %v2329_v63 = vpack.c.bf16 %v2245_v4, %v2245_v4 }
 0x442   :  { %v3109_v52 = vunpack.c.l.b16 %v2329_v63 }
 0x443   :  { %v2275_v51 = vpop.f32.mrf.mxu3 }
 0x444   :  { %3711 = vmatmul.msk.bf16.vlgmr.msra.gmra.mxu2 %vm6372_vm0, %v3082_v59  ;;  %v3110_v61 = vpack.c.b16 %v3109_v52, %v3108_v11  ;;  %v2341_v7 = vpack.c.bf16 %v2275_v51, %v2275_v51 }
 0x445   :  { %3267 = vmatpush.bf16.msra.mxu2 %v3783_v38 }
 0x446   :  { %v3277_v6 = vunpack.c.l.b16 %v2341_v7 }
 0x447   :  { %v2429_v39 = vpop.f32.mrf.mxu2 }
 0x448   :  { %3716 = vmatmul.msk.bf16.vlgmr.msrb.gmra.mxu3 %vm6497_vm2, %v3110_v61  ;;  %v3278_v10 = vpack.c.b16 %v3277_v6, %v3276_v40 }
 0x449   :  { %3295 = vmatpush.bf16.msrb.mxu3 %v3784_v57 }
 0x44b   :  { %v2457_v47 = vpop.f32.mrf.mxu3 }
 0x44c   :  { %v3302_v20 = vadd.f32 %v2457_v47, %v2429_v39 }
 0x44e   :  { %v3303_v28 = vadd.f32 %v3302_v20, %v2485_v41 }
 0x44f   :  { %v2431_v42 = vpop.f32.mrf.mxu2 }
 0x453   :  { %v2459_v5 = vpop.f32.mrf.mxu3 }
 0x454   :  { %v3333_v17 = vadd.f32 %v2459_v5, %v2431_v42  ;;  %3726 = vmatmul.msk.bf16.vlgmr.msrb.gmra.mxu2 %vm6498_vm8, %v3166_v37 }
 0x456   :  { %v3334_v22 = vadd.f32 %v3333_v17, %v2487_v32 }
 0x457   :  { %v2513_v50 = vpop.f32.mrf.mxu2 }
 0x458   :  { %v3304_v31 = vadd.f32 %v3303_v28, %v2513_v50  ;;  %3731 = vmatmul.msk.bf16.vlgmr.msra.gmra.mxu3 %vm6499_vm6, %v3194_v36  ;;  %v2655_v36 = vpop.f32.mrf.mxu0 }
 0x45b   :  { %v2541_v1 = vpop.f32.mrf.mxu3 }
 0x45c   :  { %v3305_v25 = vadd.f32 %v3304_v31, %v2541_v1 }
 0x45e   :  { %v3306_v58 = vadd.f32 %v3305_v25, %v2569_v35 }
 0x45f   :  { %v2515_v45 = vpop.f32.mrf.mxu2 }
 0x460   :  { %v3335_v53 = vadd.f32 %v3334_v22, %v2515_v45  ;;  %v2737_v41 = vpop.f32.mrf.mxu0 }
 0x463   :  { %v2543_v19 = vpop.f32.mrf.mxu3 }
 0x464   :  { %v3336_v16 = vadd.f32 %v3335_v53, %v2543_v19  ;;  %3741 = vmatmul.msk.bf16.vlgmr.msra.gmra.mxu2 %vm6500_vm13, %v3250_v24 }
 0x466   :  { %v3337_v12 = vadd.f32 %v3336_v16, %v2571_v13 }
 0x467   :  { %v2597_v8 = vpop.f32.mrf.mxu2 }
 0x468   :  { %v3307_v46 = vadd.f32 %v3306_v58, %v2597_v8  ;;  %3746 = vmatmul.msk.bf16.vlgmr.msrb.gmra.mxu3 %vm6501_vm14, %v3278_v10  ;;  %v2739_v32 = vpop.f32.mrf.mxu0 }
 0x46b   :  { %v2625_v2 = vpop.f32.mrf.mxu3 }
 0x46c   :  { %v3308_v33 = vadd.f32 %v3307_v46, %v2625_v2 }
 0x46e   :  { %v3309_v54 = vadd.f32 %v3308_v33, %v2653_v43 }
 0x46f   :  { %v2599_v14 = vpop.f32.mrf.mxu2 }
 0x470   :  { %v3338_v26 = vadd.f32 %v3337_v12, %v2599_v14  ;;  %v2821_v38 = vpop.f32.mrf.mxu0 }
 0x473   :  { %v2627_v29 = vpop.f32.mrf.mxu3 }
 0x474   :  { %v3339_v49 = vadd.f32 %v3338_v26, %v2627_v29 }
 0x476   :  { %v3340_v62 = vadd.f32 %v3339_v49, %v2655_v36 }
 0x477   :  { %v2681_v18 = vpop.f32.mrf.mxu2 }
 0x478   :  { %v3310_v9 = vadd.f32 %v3309_v54, %v2681_v18  ;;  %v2823_v57 = vpop.f32.mrf.mxu0 }
 0x47b   :  { %v2709_v4 = vpop.f32.mrf.mxu3 }
 0x47c   :  { %v3311_v60 = vadd.f32 %v3310_v9, %v2709_v4 }
 0x47e   :  { %v3312_v50 = vadd.f32 %v3311_v60, %v2737_v41 }
 0x47f   :  { %v2683_v44 = vpop.f32.mrf.mxu2 }
 0x480   :  { %v3341_v63 = vadd.f32 %v3340_v62, %v2683_v44  ;;  %v2905_v39 = vpop.f32.mrf.mxu0 }
 0x483   :  { %v2711_v59 = vpop.f32.mrf.mxu3 }
 0x484   :  { %v3342_v52 = vadd.f32 %v3341_v63, %v2711_v59 }
 0x486   :  { %v3343_v25 = vadd.f32 %v3342_v52, %v2739_v32 }
 0x487   :  { %v2765_v51 = vpop.f32.mrf.mxu2 }
 0x488   :  { %v2907_v20 = vpop.f32.mrf.mxu0  ;;  %v3313_v31 = vadd.f32 %v3312_v50, %v2765_v51 }
 0x48b   :  { %v2793_v11 = vpop.f32.mrf.mxu3 }
 0x48c   :  { %v3314_v43 = vadd.f32 %v3313_v31, %v2793_v11 }
 0x48e   :  { %v3315_v48 = vadd.f32 %v3314_v43, %v2821_v38 }
 0x48f   :  { %v2767_v61 = vpop.f32.mrf.mxu2 }
 0x490   :  { %v2989_v21 = vpop.f32.mrf.mxu0  ;;  %v3344_v7 = vadd.f32 %v3343_v25, %v2767_v61 }
 0x493   :  { %v2795_v35 = vpop.f32.mrf.mxu3 }
 0x494   :  { %v3345_v30 = vadd.f32 %v3344_v7, %v2795_v35  ;;  %v3376_v7 = vld [vmem:[%s6121_s6 + $0x2] sm:$0x1] }
 0x496   :  { %v3346_v6 = vadd.f32 %v3345_v30, %v2823_v57 }
 0x497   :  { %v2849_v3 = vpop.f32.mrf.mxu2 }
 0x498   :  { %v2991_v17 = vpop.f32.mrf.mxu0  ;;  %v3316_v22 = vadd.f32 %v3315_v48, %v2849_v3 }
 0x49b   :  { %v2877_v47 = vpop.f32.mrf.mxu3 }
 0x49c   :  { %v3317_v56 = vadd.f32 %v3316_v22, %v2877_v47 }
 0x49e   :  { %v3318_v19 = vadd.f32 %v3317_v56, %v2905_v39 }
 0x49f   :  { %v2851_v55 = vpop.f32.mrf.mxu2 }
 0x4a0   :  { %v3073_v1 = vpop.f32.mrf.mxu0  ;;  %v3347_v40 = vadd.f32 %v3346_v6, %v2851_v55 }
 0x4a3   :  { %v2879_v0 = vpop.f32.mrf.mxu3 }
 0x4a4   :  { %v3348_v10 = vadd.f32 %v3347_v40, %v2879_v0  ;;  %v3798_v0 = vld [vmem:[%s6121_s6] ss:$0 sm:$0xff] }
 0x4a6   :  { %v3349_v46 = vadd.f32 %v3348_v10, %v2907_v20 }
 0x4a7   :  { %v2933_v42 = vpop.f32.mrf.mxu2 }
 0x4a8   :  { %v3075_v53 = vpop.f32.mrf.mxu0  ;;  %v3319_v16 = vadd.f32 %v3318_v19, %v2933_v42 }
 0x4ab   :  { %v2961_v13 = vpop.f32.mrf.mxu3 }
 0x4ac   :  { %v3320_v58 = vadd.f32 %v3319_v16, %v2961_v13 }
 0x4ae   :  { %v3321_v2 = vadd.f32 %v3320_v58, %v2989_v21 }
 0x4af   :  { %v2935_v37 = vpop.f32.mrf.mxu2 }
 0x4b0   :  { %v3157_v33 = vpop.f32.mrf.mxu0  ;;  %v3350_v12 = vadd.f32 %v3349_v46, %v2935_v37  ;;  %v3799_v37 = vld [vmem:[%s6121_s6 + $0x1] ss:$0 sm:$0xff] }
 0x4b3   :  { %v2963_v5 = vpop.f32.mrf.mxu3 }
 0x4b4   :  { %v3351_v14 = vadd.f32 %v3350_v12, %v2963_v5 }
 0x4b6   :  { %v3352_v49 = vadd.f32 %v3351_v14, %v2991_v17 }
 0x4b7   :  { %v3017_v28 = vpop.f32.mrf.mxu2 }
 0x4b8   :  { %v3322_v54 = vadd.f32 %v3321_v2, %v3017_v28  ;;  %v3159_v32 = vpop.f32.mrf.mxu0 }
 0x4bb   :  { %v3045_v27 = vpop.f32.mrf.mxu3 }
 0x4bc   :  { %v3323_v26 = vadd.f32 %v3322_v54, %v3045_v27 }
 0x4be   :  { %v3324_v62 = vadd.f32 %v3323_v26, %v3073_v1 }
 0x4bf   :  { %v3019_v34 = vpop.f32.mrf.mxu2 }
 0x4c0   :  { %v3353_v18 = vadd.f32 %v3352_v49, %v3019_v34  ;;  %v3241_v35 = vpop.f32.mrf.mxu0 }
 0x4c3   :  { %v3047_v45 = vpop.f32.mrf.mxu3 }
 0x4c4   :  { %v3354_v60 = vadd.f32 %v3353_v18, %v3047_v45 }
 0x4c6   :  { %v3355_v38 = vadd.f32 %v3354_v60, %v3075_v53  ;;  %v3800_v60 = vld [vmem:[%s6121_s6 + $0x3] ss:$0 sm:$0xff]  ;;  %s4130_s6 = smov [#allocation5]  }
 0x4c7   :  { %v3101_v24 = vpop.f32.mrf.mxu2  ;;  %s3495_s5 = sshll.u32 %s4130_s6, 4  ;;  %s3496_s5 = int_to_ptr.vmem [resolvable:$true] %s3495_s5 }
 0x4c8   :  { %v3325_v9 = vadd.f32 %v3324_v62, %v3101_v24  ;;  %v3243_v17 = vpop.f32.mrf.mxu0 }
 0x4cb   :  { %v3129_v36 = vpop.f32.mrf.mxu3 }
 0x4cc   :  { %v3326_v44 = vadd.f32 %v3325_v9, %v3129_v36 }
 0x4ce   :  { %v3327_v59 = vadd.f32 %v3326_v44, %v3157_v33 }
 0x4cf   :  { %v3103_v8 = vpop.f32.mrf.mxu2 }
 0x4d0   :  { %v3356_v52 = vadd.f32 %v3355_v38, %v3103_v8 }
 0x4d3   :  { %v3131_v41 = vpop.f32.mrf.mxu3 }
 0x4d4   :  { %v3357_v57 = vadd.f32 %v3356_v52, %v3131_v41 }
 0x4d6   :  { %v3358_v3 = vadd.f32 %v3357_v57, %v3159_v32 }
 0x4d7   :  { %v3185_v29 = vpop.f32.mrf.mxu2 }
 0x4d8   :  { %v3328_v51 = vadd.f32 %v3327_v59, %v3185_v29 }
 0x4db   :  { %v3213_v4 = vpop.f32.mrf.mxu3 }
 0x4dc   :  { %v3329_v61 = vadd.f32 %v3328_v51, %v3213_v4 }
 0x4de   :  { %v3330_v47 = vadd.f32 %v3329_v61, %v3241_v35 }
 0x4df   :  { %v3187_v63 = vpop.f32.mrf.mxu2 }
 0x4e0   :  { %v3359_v55 = vadd.f32 %v3358_v3, %v3187_v63 }
 0x4e3   :  { %v3215_v11 = vpop.f32.mrf.mxu3 }
 0x4e4   :  { %v3360_v21 = vadd.f32 %v3359_v55, %v3215_v11 }
 0x4e6   :  { %v3361_v50 = vadd.f32 %v3360_v21, %v3243_v17 }
 0x4e7   :  { %v3269_v39 = vpop.f32.mrf.mxu2 }
 0x4e8   :  { %v3331_v20 = vadd.f32 %v3330_v47, %v3269_v39 }
 0x4eb   :  { %v3297_v42 = vpop.f32.mrf.mxu3 }
 0x4ec   :  { %v3332_v13 = vadd.f32 %v3331_v20, %v3297_v42 }
 0x4ee   :  { %v3366_v5 = vadd.f32 %v3798_v0, %v3332_v13 }
 0x4ef   :  { %v3271_v28 = vpop.f32.mrf.mxu2 }
 0x4f0   :  { %v3370_v31 = vmul.f32 %v3799_v37, %v3366_v5  ;;  %v3362_v27 = vadd.f32 %v3361_v50, %v3271_v28 }
 0x4f2   :  { %3372 = vadd.xlane.f32.xlu0 %v3370_v31 }
 0x4f3   :  { %v3299_v43 = vpop.f32.mrf.mxu3 }
 0x4f4   :  { %v3363_v1 = vadd.f32 %v3362_v27, %v3299_v43 }
 0x4f6   :  { %v3367_v34 = vadd.f32 %v3798_v0, %v3363_v1 }
 0x4f8   :  { %v3431_v25 = vpack.c.bf16 %v3367_v34, %v3366_v5  ;;  %3391 = vmatpush.xpose.msrb.mxu0 %v3367_v34  ;;  %v3371_v48 = vmul.f32 %v3799_v37, %v3367_v34 }
 0x4fa   :  { %3444 = vmatpush.bf16.msrb.mxu2 %v3431_v25  ;;  %3374 = vadd.xlane.f32.xlu1 %v3371_v48 }
 0x4fc   :  { %3392 = vmatpush.xpose.msrb.mxu0 %v3366_v5 }
 0x4ff   :  { %3393 = vmatmul.f32.vlgmr.msrb.gmra.mxu0 %v3376_v7 }
 0x565   :  { %v3373_v30 = vpop.xlane.xlu0 %3372 }
 0x56d   :  { %v3375_v56 = vpop.xlane.xlu1 %3374 }
 0x57c   :  { %v3394_v22 = vpop.f32.mrf.mxu0 }
 0x57d   :  { %v3397_v45 = vperm.slane %v3394_v22, 0 }
 0x57f   :  { %v3398_v53 = vadd.f32 %v3397_v45, %v3373_v30  ;;  %v3399_v24 = vadd.f32 %v3397_v45, %v3375_v56 }
 0x581   :  { %vm3400_vm3 = vcmp.ge.f32.partialorder %v3398_v53, 0.0  ;;  %vm3401_vm5 = vcmp.ge.f32.partialorder %v3399_v24, 0.0  ;;  %v3402_v6 = vmul.f32 0.2, %v3398_v53  ;;  %v3403_v19 = vmul.f32 0.2, %v3399_v24 }
 0x583   :  { %v3404_v40 = vsel %vm3400_vm3, %v3398_v53, %v3402_v6  ;;  %v3405_v16 = vsel %vm3401_vm5, %v3399_v24, %v3403_v19 }
 0x584   :  { %v3406_v36 = vadd.f32 %v4750_v23, %v3404_v40  ;;  %v3407_v10 = vadd.f32 %v4910_v15, %v3405_v16 }
 0x586   :  { %v3408_v58 = vsel %vm6502_vm9, %v3406_v36, -inf  ;;  %v3411_v8 = vsel %vm6503_vm10, %v3407_v10, -inf }
 0x587   :  { %3409 = vmax.xlane.f32.xlu2 %v3408_v58  ;;  %3412 = vmax.xlane.f32.xlu0 %v3411_v8 }
 0x5fa   :  { %v3410_v46 = vpop.xlane.xlu2 %3409  ;;  %v3413_v2 = vpop.xlane.xlu0 %3412 }
 0x5fb   :  { %v3414_v33 = vsub.f32 %v3406_v36, %v3410_v46  ;;  %v3415_v12 = vsub.f32 %v3407_v10, %v3413_v2 }
 0x5fd   :  { %v3416_v54 = vmul.f32 1.442695, %v3414_v33  ;;  %v3418_v41 = vmul.f32 1.442695, %v3415_v12 }
 0x5ff   :  { %4057 = vpow2.f32 %v3416_v54 }
 0x600   :  { %4059 = vpow2.f32 %v3418_v41 }
 0x605   :  { %v4058_v14 = vpop.eup %4057 }
 0x606   :  { %v4060_v26 = vpop.eup %4059  ;;  %v3420_v23 = vsel %vm6504_vm15, %v4058_v14, 0.0 }
 0x607   :  { %3421 = vadd.xlane.f32.xlu1 %v3420_v23  ;;  %v3423_v15 = vsel %vm6505_vm12, %v4060_v26, 0.0 }
 0x608   :  { %3424 = vadd.xlane.f32.xlu2 %v3423_v15 }
 0x67a   :  { %v3422_v29 = vpop.xlane.xlu1 %3421 }
 0x67b   :  { %v3425_v49 = vpop.xlane.xlu2 %3424  ;;  %4061 = vrcp.f32 %v3422_v29 }
 0x67c   :  { %4063 = vrcp.f32 %v3425_v49 }
 0x681   :  { %v4062_v62 = vpop.eup %4061 }
 0x682   :  { %v4064_v18 = vpop.eup %4063  ;;  %v3428_v9 = vmul.f32 %v4062_v62, %v4058_v14 }
 0x683   :  { %v3429_v32 = vmul.f32 %v4064_v18, %v4060_v26 }
 0x685   :  { %v3430_v4 = vpack.c.bf16 %v3429_v32, %v3428_v9 }
 0x687   :  { %3747 = vmatmul.msk.bf16.vlgmr.msrb.gmra.mxu2 %vm6506_vm7, %v3430_v4 }
 0x70a   :  { %v3446_v44 = vpop.f32.mrf.mxu2 }
 0x70b   :  { %v3447_v63 = vadd.f32 %v3800_v60, %v3446_v44 }
 0x70d   :  { %v3748_v38 = vmul.f32 -1.442695, %v3447_v63 }
 0x70f   :  { %4065 = vpow2.f32 %v3748_v38 }
 0x712   :  { %v3448_v59 = vpop.f32.mrf.mxu2 }
 0x713   :  { %v3449_v52 = vadd.f32 %v3800_v60, %v3448_v59 }
 0x715   :  { %v4066_v51 = vpop.eup %4065  ;;  %v3749_v11 = vmul.f32 -1.442695, %v3449_v52 }
 0x716   :  { %v3457_v57 = vadd.f32 1.0, %v4066_v51 }
 0x717   :  { %4067 = vpow2.f32 %v3749_v11 }
 0x718   :  { %4069 = vrcp.f32 %v3457_v57  ;;  %v3470_v55 = vand.u32 2147483648, %v3457_v57  ;;  %v3468_v0 = vand.u32 2147483647, %v3457_v57  ;;  %vm3464_vm4 = vweird.f32 %v3457_v57 }
 0x71a   :  { %v3471_v13 = vor.u32 1.1754944e-38, %v3470_v55  ;;  %vm3469_vm0 = vcmp.eq.f32.partialorder %v3468_v0, 8.507059e+37 }
 0x71d   :  { %v4068_v61 = vpop.eup %4067 }
 0x71e   :  { %v4070_v35 = vpop.eup %4069  ;;  %v3458_v39 = vadd.f32 1.0, %v4068_v61 }
 0x71f   :  { %v3460_v3 = vmul.f32 %v4070_v35, %v3457_v57  ;;  %vm3465_vm1 = vweird.f32 %v4070_v35 }
 0x720   :  { %4071 = vrcp.f32 %v3458_v39  ;;  %vm3466_vm11 = vmor %vm3464_vm4, %vm3465_vm1  ;;  %v3485_v50 = vand.u32 2147483648, %v3458_v39  ;;  %v3483_v27 = vand.u32 2147483647, %v3458_v39  ;;  %vm3479_vm8 = vweird.f32 %v3458_v39 }
 0x721   :  { %v3461_v47 = vsub.f32 1.0, %v3460_v3 }
 0x722   :  { %v3486_v1 = vor.u32 1.1754944e-38, %v3485_v50  ;;  %vm3484_vm13 = vcmp.eq.f32.partialorder %v3483_v27, 8.507059e+37 }
 0x723   :  { %v3462_v20 = vmul.f32 %v4070_v35, %v3461_v47 }
 0x725   :  { %v3463_v42 = vadd.f32 %v4070_v35, %v3462_v20 }
 0x726   :  { %v4072_v21 = vpop.eup %4071 }
 0x727   :  { %v3475_v37 = vmul.f32 %v4072_v21, %v3458_v39  ;;  %v3467_v5 = vsel %vm3466_vm11, %v4070_v35, %v3463_v42  ;;  %vm3480_vm2 = vweird.f32 %v4072_v21 }
 0x728   :  { %v3472_v17 = vsel %vm3469_vm0, %v3471_v13, %v3467_v5  ;;  %vm3481_vm6 = vmor %vm3479_vm8, %vm3480_vm2 }
 0x729   :  { %v3476_v28 = vsub.f32 1.0, %v3475_v37  ;;  %3489 = vst [vmem:[#allocation5] sm:$0xff] %v3472_v17 }
 0x72b   :  { %v3477_v31 = vmul.f32 %v4072_v21, %v3476_v28 }
 0x72d   :  { %v3478_v43 = vadd.f32 %v4072_v21, %v3477_v31 }
 0x72f   :  { %v3482_v34 = vsel %vm3481_vm6, %v4072_v21, %v3478_v43 }
 0x730   :  { %v3487_v25 = vsel %vm3484_vm13, %v3486_v1, %v3482_v34 }
 0x731   :  { %3490 = vst [vmem:[#allocation5 + $0x8] sm:$0xff] %v3487_v25 }
 0x732   :  { %3503 = dma.vmem_to_hbm [thread:$0]  %s3496_s5, 256, %s3498_s14, [#allocation4], %s4131_s3, %s4131_s3, %s4132_s15  }
 0x733   :  { %4125 = dma.done.wait [#allocation4], 256  }
 0x734   :  { %4126 = vsyncadd [#allocation4], 4294967040 }
 0x735   :  { %3508 = vsyncpa [#allocation3], 1 }
 0x736   :  { %3509 = vsyncpa [#allocation4], 1 }

</bundles_post_ra>
